<compile_context>
chip_gen: v6e
topology: v6e:2x2x1
jax: 0.10.0
libtpu: 0.0.40
codegen_flags: <defaults>
</compile_context>

<pallas_src>
import jax
import jax.numpy as jnp
from jax.experimental import pallas as pl
from jax.experimental.pallas import tpu as pltpu

DIM_VEC = 10
VEC_NUM = 20
IN_DIM = DIM_VEC * VEC_NUM   # 200
H1 = 1000
H2 = 840
OUT = 1

# lane-aligned (multiple of 128) padded sizes
IN_PAD = 256
H1_PAD = 1024
H2_PAD = 896

BN_EPS = 1e-5

# rows of the packed parameter slab (8, H1_PAD) f32
ROW_B1, ROW_G1, ROW_BETA1, ROW_B2, ROW_G2, ROW_BETA2, ROW_W3, ROW_B3 = range(8)


def net_kernel(x_ref, w1_ref, w2_ref, p_ref, o_ref):
    x = x_ref[...]                                        # (B, 256) bf16
    B = x.shape[0]
    inv_b = 1.0 / B                                       # static scalar

    # one lane-dense parameter slab, loaded once
    p = p_ref[...]                                        # (8, 1024) f32
    b1 = p[ROW_B1:ROW_B1 + 1, :]
    g1 = p[ROW_G1:ROW_G1 + 1, :]
    beta1 = p[ROW_BETA1:ROW_BETA1 + 1, :]
    b2 = p[ROW_B2:ROW_B2 + 1, :H2_PAD]
    g2 = p[ROW_G2:ROW_G2 + 1, :H2_PAD]
    beta2 = p[ROW_BETA2:ROW_BETA2 + 1, :H2_PAD]
    w3t = p[ROW_W3:ROW_W3 + 1, :H2_PAD]
    b3 = p[ROW_B3:ROW_B3 + 1, 0:1]                        # (1, 1)

    # ---- fc1 + relu  (bf16 MXU matmul, f32 accumulation) ----
    h1 = jnp.dot(x, w1_ref[...], preferred_element_type=jnp.float32) + b1
    h1 = jnp.maximum(h1, 0.0)                             # (B, 1024)

    # ---- bn1 (training mode), affine folded into one FMA ----
    m1 = jnp.sum(h1, axis=0, keepdims=True) * inv_b
    v1 = jnp.maximum(jnp.sum(h1 * h1, axis=0, keepdims=True) * inv_b - m1 * m1,
                     0.0)                                 # clamp cancellation
    s1 = jax.lax.rsqrt(v1 + BN_EPS) * g1
    h1 = h1 * s1 + (beta1 - m1 * s1)

    # ---- fc2 + relu ----
    h2 = jnp.dot(h1.astype(jnp.bfloat16), w2_ref[...],
                 preferred_element_type=jnp.float32) + b2
    h2 = jnp.maximum(h2, 0.0)                             # (B, 896)

    # ---- bn2 ----
    m2 = jnp.sum(h2, axis=0, keepdims=True) * inv_b
    v2 = jnp.maximum(jnp.sum(h2 * h2, axis=0, keepdims=True) * inv_b - m2 * m2,
                     0.0)
    s2 = jax.lax.rsqrt(v2 + BN_EPS) * g2
    h2 = h2 * s2 + (beta2 - m2 * s2)

    # ---- fc3 (N=1) as a lane-reduce instead of a degenerate MXU matmul ----
    logits = jnp.sum(h2 * w3t, axis=-1, keepdims=True) + b3   # (B, 1)
    o_ref[...] = jax.nn.sigmoid(logits)


def _pad2(w, rows, cols):
    return jnp.pad(w, ((0, rows - w.shape[0]), (0, cols - w.shape[1])))


def init_params(key):
    """Returns (kernel_params, f32_reference_params)."""
    ks = jax.random.split(key, 6)

    def linear_init(kw, kb, fan_in, fan_out):
        # deterministic uniform init in the style of torch.nn.Linear
        bound = 1.0 / jnp.sqrt(jnp.float32(fan_in))
        w = jax.random.uniform(kw, (fan_in, fan_out), jnp.float32, -bound, bound)
        b = jax.random.uniform(kb, (1, fan_out), jnp.float32, -bound, bound)
        return w, b

    w1, b1 = linear_init(ks[0], ks[1], IN_DIM, H1)
    w2, b2 = linear_init(ks[2], ks[3], H1, H2)
    w3, b3 = linear_init(ks[4], ks[5], H2, OUT)

    # Packed parameter slab. Padded columns carry b=0, gamma=0, beta=0, w3=0,
    # so padded lanes stay exactly 0 through relu/BN and contribute nothing.
    pslab = jnp.zeros((8, H1_PAD), jnp.float32)
    pslab = pslab.at[ROW_B1, :H1].set(b1[0])
    pslab = pslab.at[ROW_G1, :H1].set(1.0)        # gamma1 (fresh BN)
    # ROW_BETA1 stays 0
    pslab = pslab.at[ROW_B2, :H2].set(b2[0])
    pslab = pslab.at[ROW_G2, :H2].set(1.0)        # gamma2
    # ROW_BETA2 stays 0
    pslab = pslab.at[ROW_W3, :H2].set(w3[:, 0])
    pslab = pslab.at[ROW_B3, 0].set(b3[0, 0])

    kernel_params = dict(
        w1=_pad2(w1, IN_PAD, H1_PAD).astype(jnp.bfloat16),
        w2=_pad2(w2, H1_PAD, H2_PAD).astype(jnp.bfloat16),
        pslab=pslab,
    )
    f32_params = dict(w1=w1, b1=b1, w2=w2, b2=b2, w3=w3, b3=b3)
    return kernel_params, f32_params


@jax.jit
def net_forward(x, params):
    # x: (B, vec_num, dim_vec) -> flatten like x.view(-1, dim_vec * vec_num),
    # cast to bf16 on the host side (halves x DMA, no in-kernel pack).
    B = x.shape[0]
    x2 = x.reshape(B, IN_DIM).astype(jnp.bfloat16)
    x2 = jnp.pad(x2, ((0, 0), (0, IN_PAD - IN_DIM)))

    ins = (x2, params["w1"], params["w2"], params["pslab"])

    vmem = pl.BlockSpec(memory_space=pltpu.MemorySpace.VMEM)
    cost = pl.CostEstimate(
        flops=2 * B * (IN_PAD * H1_PAD + H1_PAD * H2_PAD + H2_PAD),
        transcendentals=B + H1_PAD + H2_PAD,           # sigmoid + rsqrt lanes
        bytes_accessed=(x2.size * 2 + params["w1"].size * 2
                        + params["w2"].size * 2 + params["pslab"].size * 4
                        + B * OUT * 4),
    )
    return pl.pallas_call(
        net_kernel,
        out_shape=jax.ShapeDtypeStruct((B, OUT), jnp.float32),
        in_specs=[vmem] * len(ins),
        out_specs=vmem,
        cost_estimate=cost,
        compiler_params=pltpu.CompilerParams(vmem_limit_bytes=64 << 20),
    )(*ins)


def _reference_f32(x, fp):
    """True float32 reference of the PyTorch forward (training-mode BN)."""
    h = x.reshape(-1, IN_DIM).astype(jnp.float32)

    h = jnp.maximum(h @ fp["w1"] + fp["b1"], 0.0)
    m = h.mean(0, keepdims=True)
    v = ((h - m) ** 2).mean(0, keepdims=True)
    h = (h - m) / jnp.sqrt(v + BN_EPS)                    # gamma=1, beta=0

    h = jnp.maximum(h @ fp["w2"] + fp["b2"], 0.0)
    m = h.mean(0, keepdims=True)
    v = ((h - m) ** 2).mean(0, keepdims=True)
    h = (h - m) / jnp.sqrt(v + BN_EPS)

    logits = h @ fp["w3"] + fp["b3"]
    return jax.nn.sigmoid(logits)


if __name__ == "__main__":
    key = jax.random.PRNGKey(0)
    kp, kx = jax.random.split(key)

    params, f32_params = init_params(kp)
    B = 8  # small example batch; raise to hundreds+ to amortize the weight DMA
    x = jax.random.normal(kx, (B, VEC_NUM, DIM_VEC), jnp.float32)

    out = net_forward(x, params)
    out = jax.block_until_ready(out)

    ref = _reference_f32(x, f32_params)
    assert out.shape == (B, OUT)
    max_diff = float(jnp.max(jnp.abs(out - ref)))
    assert max_diff < 2e-2, f"max abs diff vs f32 reference: {max_diff}"

    print("KERNEL_OK")
</pallas_src>

<mosaic_0001>
module attributes {stable_mosaic.version = 11 : i64} {
  func.func @net_kernel(%arg0: memref<8x256xbf16, #tpu.memory_space<vmem>>, %arg1: memref<256x1024xbf16, #tpu.memory_space<vmem>>, %arg2: memref<1024x896xbf16, #tpu.memory_space<vmem>>, %arg3: memref<8x1024xf32, #tpu.memory_space<vmem>>, %arg4: memref<8x1xf32, #tpu.memory_space<vmem>>) attributes {dimension_semantics = [], scalar_prefetch = 0 : i64, scratch_operands = 0 : i64, tpu.core_type = #tpu.core_type<tc>} {
    %c0 = arith.constant 0 : index
    %c0_0 = arith.constant 0 : index
    %0 = vector.load %arg0[%c0, %c0_0] : memref<8x256xbf16, #tpu.memory_space<vmem>>, vector<8x256xbf16>
    %c0_1 = arith.constant 0 : index
    %c0_2 = arith.constant 0 : index
    %1 = vector.load %arg3[%c0_1, %c0_2] : memref<8x1024xf32, #tpu.memory_space<vmem>>, vector<8x1024xf32>
    %2 = vector.extract_strided_slice %1 {offsets = [0, 0], sizes = [1, 1024], strides = [1, 1]} : vector<8x1024xf32> to vector<1x1024xf32>
    %3 = vector.extract_strided_slice %1 {offsets = [1, 0], sizes = [1, 1024], strides = [1, 1]} : vector<8x1024xf32> to vector<1x1024xf32>
    %4 = vector.extract_strided_slice %1 {offsets = [2, 0], sizes = [1, 1024], strides = [1, 1]} : vector<8x1024xf32> to vector<1x1024xf32>
    %5 = vector.extract_strided_slice %1 {offsets = [3, 0], sizes = [1, 896], strides = [1, 1]} : vector<8x1024xf32> to vector<1x896xf32>
    %6 = vector.extract_strided_slice %1 {offsets = [4, 0], sizes = [1, 896], strides = [1, 1]} : vector<8x1024xf32> to vector<1x896xf32>
    %7 = vector.extract_strided_slice %1 {offsets = [5, 0], sizes = [1, 896], strides = [1, 1]} : vector<8x1024xf32> to vector<1x896xf32>
    %8 = vector.extract_strided_slice %1 {offsets = [6, 0], sizes = [1, 896], strides = [1, 1]} : vector<8x1024xf32> to vector<1x896xf32>
    %9 = vector.extract_strided_slice %1 {offsets = [7, 0], sizes = [1, 1], strides = [1, 1]} : vector<8x1024xf32> to vector<1x1xf32>
    %c0_3 = arith.constant 0 : index
    %c0_4 = arith.constant 0 : index
    %10 = vector.load %arg1[%c0_3, %c0_4] : memref<256x1024xbf16, #tpu.memory_space<vmem>>, vector<256x1024xbf16>
    %cst = arith.constant dense<0.000000e+00> : vector<8x1024xf32>
    %11 = tpu.matmul %0, %10, %cst {dimension_numbers = #tpu.dot_dimension_numbers<[1], [0], [0], [1], [0, 0, 1, 1], [], []>} : vector<8x256xbf16>, vector<256x1024xbf16>, vector<8x1024xf32> -> vector<8x1024xf32>
    %12 = vector.broadcast %2 : vector<1x1024xf32> to vector<8x1024xf32>
    %13 = arith.addf %11, %12 : vector<8x1024xf32>
    %cst_5 = arith.constant 0.000000e+00 : f32
    %14 = vector.broadcast %cst_5 : f32 to vector<8x1024xf32>
    %15 = arith.maximumf %13, %14 : vector<8x1024xf32>
    %cst_6 = arith.constant dense<0.000000e+00> : vector<1024xf32>
    %16 = vector.multi_reduction <add>, %15, %cst_6 [0] : vector<8x1024xf32> to vector<1024xf32>
    %17 = vector.shape_cast %16 : vector<1024xf32> to vector<1x1024xf32>
    %cst_7 = arith.constant 1.250000e-01 : f32
    %18 = vector.broadcast %cst_7 : f32 to vector<1x1024xf32>
    %19 = arith.mulf %17, %18 : vector<1x1024xf32>
    %20 = arith.mulf %15, %15 : vector<8x1024xf32>
    %cst_8 = arith.constant dense<0.000000e+00> : vector<1024xf32>
    %21 = vector.multi_reduction <add>, %20, %cst_8 [0] : vector<8x1024xf32> to vector<1024xf32>
    %22 = vector.shape_cast %21 : vector<1024xf32> to vector<1x1024xf32>
    %cst_9 = arith.constant 1.250000e-01 : f32
    %23 = vector.broadcast %cst_9 : f32 to vector<1x1024xf32>
    %24 = arith.mulf %22, %23 : vector<1x1024xf32>
    %25 = arith.mulf %19, %19 : vector<1x1024xf32>
    %26 = arith.subf %24, %25 : vector<1x1024xf32>
    %cst_10 = arith.constant 0.000000e+00 : f32
    %27 = vector.broadcast %cst_10 : f32 to vector<1x1024xf32>
    %28 = arith.maximumf %26, %27 : vector<1x1024xf32>
    %cst_11 = arith.constant 9.99999974E-6 : f32
    %29 = vector.broadcast %cst_11 : f32 to vector<1x1024xf32>
    %30 = arith.addf %28, %29 : vector<1x1024xf32>
    %31 = math.rsqrt %30 : vector<1x1024xf32>
    %32 = arith.mulf %31, %3 : vector<1x1024xf32>
    %33 = vector.broadcast %32 : vector<1x1024xf32> to vector<8x1024xf32>
    %34 = arith.mulf %15, %33 : vector<8x1024xf32>
    %35 = arith.mulf %19, %32 : vector<1x1024xf32>
    %36 = arith.subf %4, %35 : vector<1x1024xf32>
    %37 = vector.broadcast %36 : vector<1x1024xf32> to vector<8x1024xf32>
    %38 = arith.addf %34, %37 : vector<8x1024xf32>
    %39 = arith.truncf %38 : vector<8x1024xf32> to vector<8x1024xbf16>
    %c0_12 = arith.constant 0 : index
    %c0_13 = arith.constant 0 : index
    %40 = vector.load %arg2[%c0_12, %c0_13] : memref<1024x896xbf16, #tpu.memory_space<vmem>>, vector<1024x896xbf16>
    %cst_14 = arith.constant dense<0.000000e+00> : vector<8x896xf32>
    %41 = tpu.matmul %39, %40, %cst_14 {dimension_numbers = #tpu.dot_dimension_numbers<[1], [0], [0], [1], [0, 0, 1, 1], [], []>} : vector<8x1024xbf16>, vector<1024x896xbf16>, vector<8x896xf32> -> vector<8x896xf32>
    %42 = vector.broadcast %5 : vector<1x896xf32> to vector<8x896xf32>
    %43 = arith.addf %41, %42 : vector<8x896xf32>
    %cst_15 = arith.constant 0.000000e+00 : f32
    %44 = vector.broadcast %cst_15 : f32 to vector<8x896xf32>
    %45 = arith.maximumf %43, %44 : vector<8x896xf32>
    %cst_16 = arith.constant dense<0.000000e+00> : vector<896xf32>
    %46 = vector.multi_reduction <add>, %45, %cst_16 [0] : vector<8x896xf32> to vector<896xf32>
    %47 = vector.shape_cast %46 : vector<896xf32> to vector<1x896xf32>
    %cst_17 = arith.constant 1.250000e-01 : f32
    %48 = vector.broadcast %cst_17 : f32 to vector<1x896xf32>
    %49 = arith.mulf %47, %48 : vector<1x896xf32>
    %50 = arith.mulf %45, %45 : vector<8x896xf32>
    %cst_18 = arith.constant dense<0.000000e+00> : vector<896xf32>
    %51 = vector.multi_reduction <add>, %50, %cst_18 [0] : vector<8x896xf32> to vector<896xf32>
    %52 = vector.shape_cast %51 : vector<896xf32> to vector<1x896xf32>
    %cst_19 = arith.constant 1.250000e-01 : f32
    %53 = vector.broadcast %cst_19 : f32 to vector<1x896xf32>
    %54 = arith.mulf %52, %53 : vector<1x896xf32>
    %55 = arith.mulf %49, %49 : vector<1x896xf32>
    %56 = arith.subf %54, %55 : vector<1x896xf32>
    %cst_20 = arith.constant 0.000000e+00 : f32
    %57 = vector.broadcast %cst_20 : f32 to vector<1x896xf32>
    %58 = arith.maximumf %56, %57 : vector<1x896xf32>
    %cst_21 = arith.constant 9.99999974E-6 : f32
    %59 = vector.broadcast %cst_21 : f32 to vector<1x896xf32>
    %60 = arith.addf %58, %59 : vector<1x896xf32>
    %61 = math.rsqrt %60 : vector<1x896xf32>
    %62 = arith.mulf %61, %6 : vector<1x896xf32>
    %63 = vector.broadcast %62 : vector<1x896xf32> to vector<8x896xf32>
    %64 = arith.mulf %45, %63 : vector<8x896xf32>
    %65 = arith.mulf %49, %62 : vector<1x896xf32>
    %66 = arith.subf %7, %65 : vector<1x896xf32>
    %67 = vector.broadcast %66 : vector<1x896xf32> to vector<8x896xf32>
    %68 = arith.addf %64, %67 : vector<8x896xf32>
    %69 = vector.broadcast %8 : vector<1x896xf32> to vector<8x896xf32>
    %70 = arith.mulf %68, %69 : vector<8x896xf32>
    %cst_22 = arith.constant dense<0.000000e+00> : vector<8xf32>
    %71 = vector.multi_reduction <add>, %70, %cst_22 [1] : vector<8x896xf32> to vector<8xf32>
    %72 = vector.shape_cast %71 : vector<8xf32> to vector<8x1xf32>
    %73 = vector.broadcast %9 : vector<1x1xf32> to vector<8x1xf32>
    %74 = arith.addf %72, %73 : vector<8x1xf32>
    %75 = arith.negf %74 : vector<8x1xf32>
    %76 = math.exp %75 : vector<8x1xf32>
    %cst_23 = arith.constant 1.000000e+00 : f32
    %77 = vector.broadcast %cst_23 : f32 to vector<8x1xf32>
    %78 = arith.addf %77, %76 : vector<8x1xf32>
    %79 = arith.divf %77, %78 : vector<8x1xf32>
    %c0_24 = arith.constant 0 : index
    %c0_25 = arith.constant 0 : index
    %80 = vector.load %arg4[%c0_24, %c0_25] : memref<8x1xf32, #tpu.memory_space<vmem>>, vector<8x1xf32>
    tpu.vector_store %arg4[%c0_24, %c0_25], %79 {strides = array<i32>} : memref<8x1xf32, #tpu.memory_space<vmem>>, vector<8x1xf32>,
    return
  }
}

</mosaic_0001>

<bundles_post_ra>
// kernel: net_forward.1
= control target key start
LH: loop header
LB: loop body
LE: loop exit
PB: predicated region body
PF: predicated region fallthrough
CT: control target
= control target key end

     0   :  { %9 = vsyncpa [#allocation3], 0  ;;  %s6977_s0 = inlined_call_operand.vmem [shape: bf16[8,256], index: 0, kind: input, shape index: {}]   ;;  %s6978_s1 = inlined_call_operand.hbm [shape: bf16[256,1024], index: 1, kind: input, shape index: {}]   ;;  %s6979_s2 = inlined_call_operand.hbm [shape: bf16[1024,896], index: 2, kind: input, shape index: {}]   ;;  %s6980_s3 = inlined_call_operand.hbm [shape: f32[8,1024], index: 3, kind: input, shape index: {}]   ;;  %s6981_s4 = inlined_call_operand.vmem [shape: f32[8,1], index: 4, kind: output, shape index: {}]  }
   0x1   :  { %10 = vsyncpa [#allocation5], 0  ;;  %s6580_s15 = smov [#allocation4]  }
   0x2   :  { %s30_s16 = sshll.u32 %s6580_s15, 4  ;;  %s31_s16 = int_to_ptr.vmem [resolvable:$true] %s30_s16 }
   0x3   :  { %s6524_s17 = scalar_lea.vmem %s31_s16, 57344  ;;  %p6529_p1 = scmp.lt.s32.totalorder %s31_s16, %s31_s16 }
   0x4   :  { %p6525_p0 = scmp.ne.s32.totalorder %s31_s16, %s6524_s17  ;;  %p6530_p2 = scmp.lt.s32.totalorder %s6524_s17, %s6524_s17 }
   0x6   :  { %p6531_p3 = por %p6530_p2, %p6529_p1 }
   0x8   :  { %p6532_p4 = pnand %p6531_p3, %p6525_p0 }
   0xa   :  { %6535 = shalt.err (!%p6532_p4)
}
   0xb   :  { %s6581_s18 = smov 448   ;;  %s6582_s19 = smov 28  }
   0xc   :  { %36 = dma.hbm_to_vmem [thread:$0]  %s6979_s2, 57344, %s31_s16, [#allocation5], %s6581_s18, %s6581_s18, %s6582_s19  }
   0xd   :  { %s6583_s22 = smov [#allocation2]  }
   0xe   :  { %s18_s23 = sshll.u32 %s6583_s22, 4  ;;  %s19_s23 = int_to_ptr.vmem [resolvable:$true] %s18_s23 }
   0xf   :  { %s6544_s24 = scalar_lea.vmem %s19_s23, 16384  ;;  %p6549_p6 = scmp.lt.s32.totalorder %s19_s23, %s19_s23 }
  0x10   :  { %p6545_p5 = scmp.ne.s32.totalorder %s19_s23, %s6544_s24  ;;  %p6550_p7 = scmp.lt.s32.totalorder %s6544_s24, %s6544_s24 }
  0x12   :  { %p6551_p8 = por %p6550_p7, %p6549_p6 }
  0x14   :  { %p6552_p9 = pnand %p6551_p8, %p6545_p5 }
  0x16   :  { %6555 = shalt.err (!%p6552_p9)
}
  0x17   :  { %s6584_s25 = smov 512   ;;  %s6585_s26 = smov 32  }
  0x18   :  { %24 = dma.hbm_to_vmem [thread:$0]  %s6978_s1, 16384, %s19_s23, [#allocation3], %s6584_s25, %s6584_s25, %s6585_s26  }
  0x19   :  { %s6586_s29 = smov [#allocation6]  }
  0x1a   :  { %s43_s30 = sshll.u32 %s6586_s29, 4  ;;  %s44_s30 = int_to_ptr.vmem [resolvable:$true] %s43_s30 }
  0x1b   :  { %s6564_s2 = scalar_lea.vmem %s44_s30, 1024  ;;  %p6569_p11 = scmp.lt.s32.totalorder %s44_s30, %s44_s30 }
  0x1c   :  { %p6565_p10 = scmp.ne.s32.totalorder %s44_s30, %s6564_s2  ;;  %p6570_p12 = scmp.lt.s32.totalorder %s6564_s2, %s6564_s2 }
  0x1e   :  { %p6571_p13 = por %p6570_p12, %p6569_p11 }
  0x20   :  { %p6572_p0 = pnand %p6571_p13, %p6565_p10 }
  0x22   :  { %6575 = shalt.err (!%p6572_p0)
}
  0x23   :  { %46 = dma.hbm_to_vmem [thread:$0]  %s6980_s3, 1024, %s44_s30, [#allocation5]  }
  0x24   :  { %6576 = dma.done.wait [#allocation3], 16384  }
  0x25   :  { %6577 = vsyncadd [#allocation3], 4294950912 }
  0x26   :  { %6578 = dma.done.wait [#allocation5], 58368  }
  0x27   :  { %6579 = vsyncadd [#allocation5], 4294908928  ;;  %v122_v0 = vld [vmem:[#allocation2 + $0x1c0] sm:$0xff]  ;;  %v123_v2 = vld [vmem:[#allocation2 + $0x1c8] sm:$0xff]  ;;  %vm5150_vm0 = vcmask 7168  }
  0x28   :  { %v126_v1 = vld [vmem:[#allocation2 + $0x1e0] sm:$0xff]  ;;  %v127_v4 = vld [vmem:[#allocation2 + $0x1e8] sm:$0xff] }
  0x29   :  { %v5217_v3 = vcombine.high %v122_v0, %v126_v1  ;;  %v5216_v5 = vcombine.low %v122_v0, %v126_v1  ;;  %v114_v6 = vld [vmem:[#allocation2 + $0x180] sm:$0xff]  ;;  %v5219_v8 = vcombine.high %v123_v2, %v127_v4  ;;  %v5218_v9 = vcombine.low %v123_v2, %v127_v4  ;;  %v115_v11 = vld [vmem:[#allocation2 + $0x188] sm:$0xff] }
  0x2a   :  { %v118_v7 = vld [vmem:[#allocation2 + $0x1a0] sm:$0xff]  ;;  %v119_v12 = vld [vmem:[#allocation2 + $0x1a8] sm:$0xff] }
  0x2b   :  { %v5209_v10 = vcombine.high %v114_v6, %v118_v7  ;;  %v106_v13 = vld [vmem:[#allocation2 + $0x140] sm:$0xff]  ;;  %873 = vmatprep.subr.bf16.mxu0 %v5217_v3  ;;  %v5211_v14 = vcombine.high %v115_v11, %v119_v12  ;;  %v107_v16 = vld [vmem:[#allocation2 + $0x148] sm:$0xff]  ;;  %914 = vmatprep.subr.bf16.mxu1 %v5219_v8  ;;  %v5208_v18 = vcombine.low %v114_v6, %v118_v7 }
  0x2c   :  { %v110_v15 = vld [vmem:[#allocation2 + $0x160] sm:$0xff]  ;;  %v111_v17 = vld [vmem:[#allocation2 + $0x168] sm:$0xff]  ;;  %874 = vmatpush1.bf16.msra.mxu0 %v5216_v5  ;;  %915 = vmatpush1.bf16.msra.mxu1 %v5218_v9  ;;  %v5210_v19 = vcombine.low %v115_v11, %v119_v12 }
  0x2d   :  { %875 = vmatprep.subr.bf16.mxu0 %v5209_v10  ;;  %v5201_v20 = vcombine.high %v106_v13, %v110_v15  ;;  %916 = vmatprep.subr.bf16.mxu1 %v5211_v14  ;;  %v5203_v21 = vcombine.high %v107_v16, %v111_v17  ;;  %v98_v22 = vld [vmem:[#allocation2 + $0x100] sm:$0xff]  ;;  %v99_v24 = vld [vmem:[#allocation2 + $0x108] sm:$0xff]  ;;  %v5200_v26 = vcombine.low %v106_v13, %v110_v15 }
  0x2e   :  { %v102_v23 = vld [vmem:[#allocation2 + $0x120] sm:$0xff]  ;;  %v103_v25 = vld [vmem:[#allocation2 + $0x128] sm:$0xff]  ;;  %v5202_v27 = vcombine.low %v107_v16, %v111_v17 }
  0x2f   :  { %v5193_v28 = vcombine.high %v98_v22, %v102_v23  ;;  %v5195_v29 = vcombine.high %v99_v24, %v103_v25  ;;  %v90_v30 = vld [vmem:[#allocation2 + $0xc0] sm:$0xff]  ;;  %v91_v32 = vld [vmem:[#allocation2 + $0xc8] sm:$0xff]  ;;  %v5192_v34 = vcombine.low %v98_v22, %v102_v23  ;;  %v5194_v35 = vcombine.low %v99_v24, %v103_v25 }
  0x30   :  { %876 = vmatpush1.bf16.msra.mxu0 %v5208_v18  ;;  %917 = vmatpush1.bf16.msra.mxu1 %v5210_v19  ;;  %v94_v31 = vld [vmem:[#allocation2 + $0xe0] sm:$0xff]  ;;  %v95_v33 = vld [vmem:[#allocation2 + $0xe8] sm:$0xff] }
  0x31   :  { %877 = vmatprep.subr.bf16.mxu0 %v5201_v20  ;;  %918 = vmatprep.subr.bf16.mxu1 %v5203_v21  ;;  %v5185_v36 = vcombine.high %v90_v30, %v94_v31  ;;  %v5187_v37 = vcombine.high %v91_v32, %v95_v33  ;;  %v82_v38 = vld [vmem:[#allocation2 + $0x80] sm:$0xff]  ;;  %v83_v40 = vld [vmem:[#allocation2 + $0x88] sm:$0xff]  ;;  %v5184_v42 = vcombine.low %v90_v30, %v94_v31 }
  0x32   :  { %v86_v39 = vld [vmem:[#allocation2 + $0xa0] sm:$0xff]  ;;  %v87_v41 = vld [vmem:[#allocation2 + $0xa8] sm:$0xff]  ;;  %v5186_v43 = vcombine.low %v91_v32, %v95_v33 }
  0x33   :  { %v5177_v44 = vcombine.high %v82_v38, %v86_v39  ;;  %v5179_v45 = vcombine.high %v83_v40, %v87_v41  ;;  %v74_v46 = vld [vmem:[#allocation2 + $0x40] sm:$0xff]  ;;  %v75_v48 = vld [vmem:[#allocation2 + $0x48] sm:$0xff]  ;;  %v5176_v50 = vcombine.low %v82_v38, %v86_v39  ;;  %v5178_v51 = vcombine.low %v83_v40, %v87_v41 }
  0x34   :  { %878 = vmatpush1.bf16.msra.mxu0 %v5200_v26  ;;  %919 = vmatpush1.bf16.msra.mxu1 %v5202_v27  ;;  %v78_v47 = vld [vmem:[#allocation2 + $0x60] sm:$0xff]  ;;  %v79_v49 = vld [vmem:[#allocation2 + $0x68] sm:$0xff] }
  0x35   :  { %879 = vmatprep.subr.bf16.mxu0 %v5193_v28  ;;  %920 = vmatprep.subr.bf16.mxu1 %v5195_v29  ;;  %v5169_v52 = vcombine.high %v74_v46, %v78_v47  ;;  %v6624_v53 = vld [vmem:[%s6977_s0] sm:$0xff]  ;;  %v5171_v54 = vcombine.high %v75_v48, %v79_v49  ;;  %v67_v58 = vld [vmem:[#allocation2 + $0x8] sm:$0xff]  ;;  %v5168_v60 = vcombine.low %v74_v46, %v78_v47 }
  0x36   :  { %v66_v55 = vld [vmem:[#allocation2] sm:$0xff]  ;;  %v6628_v57 = vcombine.high %v6624_v53, %v6624_v53  ;;  %v71_v59 = vld [vmem:[#allocation2 + $0x28] sm:$0xff]  ;;  %v5170_v61 = vcombine.low %v75_v48, %v79_v49 }
  0x37   :  { %v70_v56 = vld [vmem:[#allocation2 + $0x20] sm:$0xff]  ;;  %v5163_v63 = vcombine.high %v67_v58, %v71_v59  ;;  %v187_v2 = vld [vmem:[#allocation2 + $0x3c8] sm:$0xff]  ;;  %v5162_v5 = vcombine.low %v67_v58, %v71_v59 }
  0x38   :  { %880 = vmatpush1.bf16.msra.mxu0 %v5192_v34  ;;  %921 = vmatpush1.bf16.msra.mxu1 %v5194_v35  ;;  %v5161_v62 = vcombine.high %v66_v55, %v70_v56  ;;  %v186_v0 = vld [vmem:[#allocation2 + $0x3c0] sm:$0xff]  ;;  %v191_v3 = vld [vmem:[#allocation2 + $0x3e8] sm:$0xff]  ;;  %v5160_v4 = vcombine.low %v66_v55, %v70_v56 }
  0x39   :  { %881 = vmatprep.subr.bf16.mxu0 %v5185_v36  ;;  %922 = vmatprep.subr.bf16.mxu1 %v5187_v37  ;;  %v190_v1 = vld [vmem:[#allocation2 + $0x3e0] sm:$0xff]  ;;  %v5283_v7 = vcombine.high %v187_v2, %v191_v3  ;;  %v179_v10 = vld [vmem:[#allocation2 + $0x388] sm:$0xff]  ;;  %v5282_v13 = vcombine.low %v187_v2, %v191_v3  ;;  %v125_v3 = vld [vmem:[#allocation2 + $0x1d8] sm:$0xff] }
  0x3a   :  { %905 = vmatprep.mubr.bf16.mxu0 %v6628_v57  ;;  %946 = vmatprep.mubr.bf16.mxu1 %v6628_v57  ;;  %v5281_v6 = vcombine.high %v186_v0, %v190_v1  ;;  %v178_v8 = vld [vmem:[#allocation2 + $0x380] sm:$0xff]  ;;  %v183_v11 = vld [vmem:[#allocation2 + $0x3a8] sm:$0xff]  ;;  %v5280_v12 = vcombine.low %v186_v0, %v190_v1  ;;  %v128_v0 = vld [vmem:[#allocation2 + $0x1f0] sm:$0xff] }
  0x3b   :  { %v182_v9 = vld [vmem:[#allocation2 + $0x3a0] sm:$0xff]  ;;  %v5275_v15 = vcombine.high %v179_v10, %v183_v11  ;;  %v171_v18 = vld [vmem:[#allocation2 + $0x348] sm:$0xff]  ;;  %v5274_v21 = vcombine.low %v179_v10, %v183_v11  ;;  %v117_v11 = vld [vmem:[#allocation2 + $0x198] sm:$0xff] }
  0x3c   :  { %882 = vmatpush1.bf16.msra.mxu0 %v5184_v42  ;;  %923 = vmatpush1.bf16.msra.mxu1 %v5186_v43  ;;  %v5273_v14 = vcombine.high %v178_v8, %v182_v9  ;;  %v170_v16 = vld [vmem:[#allocation2 + $0x340] sm:$0xff]  ;;  %v175_v19 = vld [vmem:[#allocation2 + $0x368] sm:$0xff]  ;;  %v5272_v20 = vcombine.low %v178_v8, %v182_v9  ;;  %v120_v8 = vld [vmem:[#allocation2 + $0x1b0] sm:$0xff] }
  0x3d   :  { %883 = vmatprep.subr.bf16.mxu0 %v5177_v44  ;;  %924 = vmatprep.subr.bf16.mxu1 %v5179_v45  ;;  %v174_v17 = vld [vmem:[#allocation2 + $0x360] sm:$0xff]  ;;  %v5267_v23 = vcombine.high %v171_v18, %v175_v19  ;;  %v163_v26 = vld [vmem:[#allocation2 + $0x308] sm:$0xff]  ;;  %v5266_v29 = vcombine.low %v171_v18, %v175_v19 }
  0x3e   :  { %v5265_v22 = vcombine.high %v170_v16, %v174_v17  ;;  %v162_v24 = vld [vmem:[#allocation2 + $0x300] sm:$0xff]  ;;  %v167_v27 = vld [vmem:[#allocation2 + $0x328] sm:$0xff]  ;;  %v5264_v28 = vcombine.low %v170_v16, %v174_v17  ;;  %v108_v16 = vld [vmem:[#allocation2 + $0x150] sm:$0xff] }
  0x3f   :  { %v166_v25 = vld [vmem:[#allocation2 + $0x320] sm:$0xff]  ;;  %v5259_v31 = vcombine.high %v163_v26, %v167_v27  ;;  %v155_v34 = vld [vmem:[#allocation2 + $0x2c8] sm:$0xff]  ;;  %v5258_v37 = vcombine.low %v163_v26, %v167_v27  ;;  %v112_v17 = vld [vmem:[#allocation2 + $0x170] sm:$0xff] }
  0x40   :  { %884 = vmatpush1.bf16.msra.mxu0 %v5176_v50  ;;  %925 = vmatpush1.bf16.msra.mxu1 %v5178_v51  ;;  %v5257_v30 = vcombine.high %v162_v24, %v166_v25  ;;  %v154_v32 = vld [vmem:[#allocation2 + $0x2c0] sm:$0xff]  ;;  %v159_v35 = vld [vmem:[#allocation2 + $0x2e8] sm:$0xff]  ;;  %v5256_v36 = vcombine.low %v162_v24, %v166_v25  ;;  %v104_v24 = vld [vmem:[#allocation2 + $0x130] sm:$0xff]  ;;  %v5205_v26 = vcombine.high %v108_v16, %v112_v17 }
  0x41   :  { %885 = vmatprep.subr.bf16.mxu0 %v5169_v52  ;;  %926 = vmatprep.subr.bf16.mxu1 %v5171_v54  ;;  %v158_v33 = vld [vmem:[#allocation2 + $0x2e0] sm:$0xff]  ;;  %v5251_v40 = vcombine.high %v155_v34, %v159_v35  ;;  %v147_v42 = vld [vmem:[#allocation2 + $0x288] sm:$0xff]  ;;  %v5250_v47 = vcombine.low %v155_v34, %v159_v35  ;;  %v101_v27 = vld [vmem:[#allocation2 + $0x118] sm:$0xff] }
  0x42   :  { %v5249_v38 = vcombine.high %v154_v32, %v158_v33  ;;  %v146_v39 = vld [vmem:[#allocation2 + $0x280] sm:$0xff]  ;;  %v151_v43 = vld [vmem:[#allocation2 + $0x2a8] sm:$0xff]  ;;  %v5248_v44 = vcombine.low %v154_v32, %v158_v33  ;;  %v96_v32 = vld [vmem:[#allocation2 + $0xf0] sm:$0xff] }
  0x43   :  { %v150_v41 = vld [vmem:[#allocation2 + $0x2a0] sm:$0xff]  ;;  %v139_v49 = vld [vmem:[#allocation2 + $0x248] sm:$0xff]  ;;  %v5243_v51 = vcombine.high %v147_v42, %v151_v43  ;;  %v5242_v56 = vcombine.low %v147_v42, %v151_v43  ;;  %v93_v35 = vld [vmem:[#allocation2 + $0xd8] sm:$0xff] }
  0x44   :  { %886 = vmatpush1.bf16.msra.mxu0 %v5168_v60  ;;  %927 = vmatpush1.bf16.msra.mxu1 %v5170_v61  ;;  %v138_v45 = vld [vmem:[#allocation2 + $0x240] sm:$0xff]  ;;  %v5241_v48 = vcombine.high %v146_v39, %v150_v41  ;;  %v143_v50 = vld [vmem:[#allocation2 + $0x268] sm:$0xff]  ;;  %v5240_v52 = vcombine.low %v146_v39, %v150_v41  ;;  %v84_v39 = vld [vmem:[#allocation2 + $0x90] sm:$0xff] }
  0x45   :  { %887 = vmatprep.subr.bf16.mxu0 %v5161_v62  ;;  %928 = vmatprep.subr.bf16.mxu1 %v5163_v63  ;;  %v142_v46 = vld [vmem:[#allocation2 + $0x260] sm:$0xff]  ;;  %v131_v59 = vld [vmem:[#allocation2 + $0x208] sm:$0xff]  ;;  %v5235_v61 = vcombine.high %v139_v49, %v143_v50  ;;  %v124_v63 = vld [vmem:[#allocation2 + $0x1d0] sm:$0xff]  ;;  %v5234_v1 = vcombine.low %v139_v49, %v143_v50 }
  0x46   :  { %v130_v54 = vld [vmem:[#allocation2 + $0x200] sm:$0xff]  ;;  %v5233_v58 = vcombine.high %v138_v45, %v142_v46  ;;  %v135_v60 = vld [vmem:[#allocation2 + $0x228] sm:$0xff]  ;;  %v5232_v62 = vcombine.low %v138_v45, %v142_v46  ;;  %v5221_v10 = vcombine.high %v124_v63, %v128_v0  ;;  %v85_v42 = vld [vmem:[#allocation2 + $0x98] sm:$0xff] }
  0x47   :  { %v134_v55 = vld [vmem:[#allocation2 + $0x220] sm:$0xff]  ;;  %v5226_v9 = vcombine.low %v131_v59, %v135_v60  ;;  %v89_v43 = vld [vmem:[#allocation2 + $0xb8] sm:$0xff]  ;;  %v76_v46 = vld [vmem:[#allocation2 + $0x50] sm:$0xff] }
  0x48   :  { %888 = vmatpush1.bf16.msra.mxu0 %v5160_v4  ;;  %929 = vmatpush1.bf16.msra.mxu1 %v5162_v5  ;;  %v5225_v2 = vcombine.high %v130_v54, %v134_v55  ;;  %v129_v4 = vld [vmem:[#allocation2 + $0x1f8] sm:$0xff]  ;;  %v5227_v5 = vcombine.high %v131_v59, %v135_v60 }
  0x49   :  { %889 = vmatprep.subr.bf16.mxu0 %v5281_v6  ;;  %930 = vmatprep.subr.bf16.mxu1 %v5283_v7  ;;  %v5224_v6 = vcombine.low %v130_v54, %v134_v55  ;;  %v116_v7 = vld [vmem:[#allocation2 + $0x190] sm:$0xff]  ;;  %v5222_v18 = vcombine.low %v125_v3, %v129_v4  ;;  %v77_v50 = vld [vmem:[#allocation2 + $0x58] sm:$0xff] }
  0x4a   :  { %v5213_v19 = vcombine.high %v116_v7, %v120_v8  ;;  %v68_v55 = vld [vmem:[#allocation2 + $0x10] sm:$0xff]  ;;  %v69_v60 = vld [vmem:[#allocation2 + $0x18] sm:$0xff] }
  0x4c   :  { %890 = vmatpush2.bf16.msra.mxu0 %v5280_v12  ;;  %931 = vmatpush2.bf16.msra.mxu1 %v5282_v13  ;;  %v121_v12 = vld [vmem:[#allocation2 + $0x1b8] sm:$0xff]  ;;  %v5223_v13 = vcombine.high %v125_v3, %v129_v4 }
  0x4d   :  { %891 = vmatprep.subr.bf16.mxu0 %v5273_v14  ;;  %932 = vmatprep.subr.bf16.mxu1 %v5275_v15  ;;  %v6634_v14 = vcombine.low %v6624_v53, %v6624_v53  ;;  %v5220_v15 = vcombine.low %v124_v63, %v128_v0  ;;  %v100_v53 = vld [vmem:[#allocation2 + $0x110] sm:$0xff]  ;;  %v5214_v25 = vcombine.low %v117_v11, %v121_v12  ;;  %v189_v4 = vld [vmem:[#allocation2 + $0x3d8] sm:$0xff] }
  0x4e   :  { %v5197_v34 = vcombine.high %v100_v53, %v104_v24  ;;  %v188_v0 = vld [vmem:[#allocation2 + $0x3d0] sm:$0xff] }
  0x50   :  { %892 = vmatpush2.bf16.msra.mxu0 %v5272_v20  ;;  %933 = vmatpush2.bf16.msra.mxu1 %v5274_v21  ;;  %v109_v20 = vld [vmem:[#allocation2 + $0x158] sm:$0xff] }
  0x51   :  { %893 = vmatprep.subr.bf16.mxu0 %v5265_v22  ;;  %934 = vmatprep.subr.bf16.mxu1 %v5267_v23  ;;  %v113_v21 = vld [vmem:[#allocation2 + $0x178] sm:$0xff]  ;;  %v5215_v22 = vcombine.high %v117_v11, %v121_v12  ;;  %v5212_v23 = vcombine.low %v116_v7, %v120_v8  ;;  %v180_v8 = vld [vmem:[#allocation2 + $0x390] sm:$0xff] }
  0x52   :  { %v5206_v33 = vcombine.low %v109_v20, %v113_v21  ;;  %v181_v12 = vld [vmem:[#allocation2 + $0x398] sm:$0xff] }
  0x54   :  { %894 = vmatpush2.bf16.msra.mxu0 %v5264_v28  ;;  %935 = vmatpush2.bf16.msra.mxu1 %v5266_v29  ;;  %v105_v28 = vld [vmem:[#allocation2 + $0x138] sm:$0xff]  ;;  %v5207_v29 = vcombine.high %v109_v20, %v113_v21 }
  0x55   :  { %895 = vmatprep.subr.bf16.mxu0 %v5257_v30  ;;  %936 = vmatprep.subr.bf16.mxu1 %v5259_v31  ;;  %v5204_v30 = vcombine.low %v108_v16, %v112_v17  ;;  %v92_v31 = vld [vmem:[#allocation2 + $0xd0] sm:$0xff]  ;;  %v5198_v41 = vcombine.low %v101_v27, %v105_v28  ;;  %v173_v21 = vld [vmem:[#allocation2 + $0x358] sm:$0xff] }
  0x56   :  { %v5188_v45 = vcombine.low %v92_v31, %v96_v32  ;;  %v172_v17 = vld [vmem:[#allocation2 + $0x350] sm:$0xff] }
  0x58   :  { %896 = vmatpush2.bf16.msra.mxu0 %v5256_v36  ;;  %937 = vmatpush2.bf16.msra.mxu1 %v5258_v37  ;;  %v97_v36 = vld [vmem:[#allocation2 + $0xf8] sm:$0xff]  ;;  %v5199_v37 = vcombine.high %v101_v27, %v105_v28 }
  0x59   :  { %897 = vmatprep.subr.bf16.mxu0 %v5249_v38  ;;  %938 = vmatprep.subr.bf16.mxu1 %v5251_v40  ;;  %v5196_v38 = vcombine.low %v100_v53, %v104_v24  ;;  %v88_v40 = vld [vmem:[#allocation2 + $0xb0] sm:$0xff]  ;;  %v165_v28 = vld [vmem:[#allocation2 + $0x318] sm:$0xff] }
  0x5a   :  { %v5181_v49 = vcombine.high %v84_v39, %v88_v40  ;;  %v5180_v54 = vcombine.low %v84_v39, %v88_v40  ;;  %v164_v24 = vld [vmem:[#allocation2 + $0x310] sm:$0xff] }
  0x5b   :  { %v148_v40 = vld [vmem:[#allocation2 + $0x290] sm:$0xff] }
  0x5c   :  { %898 = vmatpush2.bf16.msra.mxu0 %v5248_v44  ;;  %939 = vmatpush2.bf16.msra.mxu1 %v5250_v47  ;;  %v5191_v44 = vcombine.high %v93_v35, %v97_v36  ;;  %v80_v47 = vld [vmem:[#allocation2 + $0x70] sm:$0xff] }
  0x5d   :  { %899 = vmatprep.subr.bf16.mxu0 %v5241_v48  ;;  %940 = vmatprep.subr.bf16.mxu1 %v5243_v51  ;;  %v5190_v48 = vcombine.low %v93_v35, %v97_v36  ;;  %v81_v51 = vld [vmem:[#allocation2 + $0x78] sm:$0xff]  ;;  %v5173_v59 = vcombine.high %v76_v46, %v80_v47  ;;  %v5172_v63 = vcombine.low %v76_v46, %v80_v47  ;;  %v140_v47 = vld [vmem:[#allocation2 + $0x250] sm:$0xff] }
  0x5e   :  { %v157_v36 = vld [vmem:[#allocation2 + $0x2d8] sm:$0xff] }
  0x60   :  { %900 = vmatpush2.bf16.msra.mxu0 %v5240_v52  ;;  %941 = vmatpush2.bf16.msra.mxu1 %v5242_v56  ;;  %v5183_v52 = vcombine.high %v85_v42, %v89_v43  ;;  %v72_v56 = vld [vmem:[#allocation2 + $0x30] sm:$0xff] }
  0x61   :  { %901 = vmatprep.subr.bf16.mxu0 %v5233_v58  ;;  %942 = vmatprep.subr.bf16.mxu1 %v5235_v61  ;;  %v5182_v58 = vcombine.low %v85_v42, %v89_v43  ;;  %v73_v61 = vld [vmem:[#allocation2 + $0x38] sm:$0xff]  ;;  %v5165_v3 = vcombine.high %v68_v55, %v72_v56  ;;  %v5164_v7 = vcombine.low %v68_v55, %v72_v56  ;;  %v132_v56 = vld [vmem:[#allocation2 + $0x210] sm:$0xff] }
  0x62   :  { %v149_v43 = vld [vmem:[#allocation2 + $0x298] sm:$0xff] }
  0x64   :  { %902 = vmatpush2.bf16.msra.mxu0 %v5232_v62  ;;  %943 = vmatpush2.bf16.msra.mxu1 %v5234_v1  ;;  %v5175_v62 = vcombine.high %v77_v50, %v81_v51  ;;  %v192_v1 = vld [vmem:[#allocation2 + $0x3f0] sm:$0xff] }
  0x65   :  { %903 = vmatprep.subr.bf16.mxu0 %v5225_v2  ;;  %944 = vmatprep.subr.bf16.mxu1 %v5227_v5  ;;  %v5174_v2 = vcombine.low %v77_v50, %v81_v51  ;;  %v193_v5 = vld [vmem:[#allocation2 + $0x3f8] sm:$0xff]  ;;  %v5285_v11 = vcombine.high %v188_v0, %v192_v1  ;;  %v5284_v16 = vcombine.low %v188_v0, %v192_v1 }
  0x66   :  { %v141_v51 = vld [vmem:[#allocation2 + $0x258] sm:$0xff] }
  0x68   :  { %904 = vmatpush2.bf16.msra.mxu0 %v5224_v6  ;;  %945 = vmatpush2.bf16.msra.mxu1 %v5226_v9  ;;  %v5167_v6 = vcombine.high %v69_v60, %v73_v61  ;;  %v184_v9 = vld [vmem:[#allocation2 + $0x3b0] sm:$0xff] }
  0x69   :  { %955 = vmatprep.subr.bf16.mxu0 %v5221_v10  ;;  %996 = vmatprep.subr.bf16.mxu1 %v5223_v13  ;;  %v5166_v10 = vcombine.low %v69_v60, %v73_v61  ;;  %v185_v13 = vld [vmem:[#allocation2 + $0x3b8] sm:$0xff]  ;;  %v5277_v20 = vcombine.high %v180_v8, %v184_v9  ;;  %v5276_v53 = vcombine.low %v180_v8, %v184_v9  ;;  %v5834_v8 = vld [vmem:[#allocation4 + $0x188] ss:$28 sps:$4 sm:$0xff]  }
  0x6a   :  { %v133_v61 = vld [vmem:[#allocation2 + $0x218] sm:$0xff]  ;;  %v5837_v9 = vld [vmem:[#allocation4 + $0x508] ss:$28 sps:$4 sm:$0xff]  }
  0x6b   :  { %906 = vmatmul.mubr.bf16.vlgmr.msra.gmra.mxu0 %v6634_v14  ;;  %947 = vmatmul.mubr.bf16.vlgmr.msra.gmra.mxu1 %v6634_v14 }
  0x6c   :  { %956 = vmatpush1.bf16.msra.mxu0 %v5220_v15  ;;  %997 = vmatpush1.bf16.msra.mxu1 %v5222_v18  ;;  %v5287_v15 = vcombine.high %v189_v4, %v193_v5  ;;  %v176_v18 = vld [vmem:[#allocation2 + $0x370] sm:$0xff] }
  0x6d   :  { %957 = vmatprep.subr.bf16.mxu0 %v5213_v19  ;;  %998 = vmatprep.subr.bf16.mxu1 %v5215_v22  ;;  %v5286_v19 = vcombine.low %v189_v4, %v193_v5  ;;  %v177_v22 = vld [vmem:[#allocation2 + $0x378] sm:$0xff]  ;;  %v5269_v27 = vcombine.high %v172_v17, %v176_v18  ;;  %v5836_v4 = vld [vmem:[#allocation4 + $0x18c] ss:$28 sps:$4 sm:$0xff]  }
  0x6e   :  { %987 = vmatprep.mubr.bf16.mxu0 %v6628_v57  ;;  %1028 = vmatprep.mubr.bf16.mxu1 %v6628_v57  ;;  %v5189_v57 = vcombine.high %v92_v31, %v96_v32  ;;  %v5268_v31 = vcombine.low %v172_v17, %v176_v18  ;;  %v156_v32 = vld [vmem:[#allocation2 + $0x2d0] sm:$0xff] }
  0x6f   :  { %v5846_v17 = vld [vmem:[#allocation4 + $0x118] ss:$28 sps:$4 sm:$0xff]  }
  0x70   :  { %958 = vmatpush1.bf16.msra.mxu0 %v5212_v23  ;;  %999 = vmatpush1.bf16.msra.mxu1 %v5214_v25  ;;  %v5279_v23 = vcombine.high %v181_v12, %v185_v13  ;;  %v168_v25 = vld [vmem:[#allocation2 + $0x330] sm:$0xff] }
  0x71   :  { %959 = vmatprep.subr.bf16.mxu0 %v5205_v26  ;;  %1000 = vmatprep.subr.bf16.mxu1 %v5207_v29  ;;  %v5278_v26 = vcombine.low %v181_v12, %v185_v13  ;;  %v169_v29 = vld [vmem:[#allocation2 + $0x338] sm:$0xff]  ;;  %v5261_v35 = vcombine.high %v164_v24, %v168_v25  ;;  %v5260_v39 = vcombine.low %v164_v24, %v168_v25  ;;  %v5840_v12 = vld [vmem:[#allocation4 + $0x150] ss:$28 sps:$4 sm:$0xff]   ;;  %v5861_v24 = vld [vmem:[#allocation4 + $0x428] ss:$28 sps:$4 sm:$0xff]  }
  0x72   :  { %v5843_v13 = vld [vmem:[#allocation4 + $0x4d0] ss:$28 sps:$4 sm:$0xff]   ;;  %v5849_v18 = vld [vmem:[#allocation4 + $0x498] ss:$28 sps:$4 sm:$0xff]  }
  0x73   :  { %v5866_v25 = vld [vmem:[#allocation4 + $0x74] ss:$28 sps:$4 sm:$0xff]  }
  0x74   :  { %960 = vmatpush1.bf16.msra.mxu0 %v5204_v30  ;;  %1001 = vmatpush1.bf16.msra.mxu1 %v5206_v33  ;;  %v5271_v30 = vcombine.high %v173_v21, %v177_v22  ;;  %v160_v33 = vld [vmem:[#allocation2 + $0x2f0] sm:$0xff] }
  0x75   :  { %961 = vmatprep.subr.bf16.mxu0 %v5197_v34  ;;  %1002 = vmatprep.subr.bf16.mxu1 %v5199_v37  ;;  %v5270_v34 = vcombine.low %v173_v21, %v177_v22  ;;  %v161_v37 = vld [vmem:[#allocation2 + $0x2f8] sm:$0xff]  ;;  %v5253_v42 = vcombine.high %v156_v32, %v160_v33  ;;  %v5252_v46 = vcombine.low %v156_v32, %v160_v33  ;;  %v5878_v33 = vld [vmem:[#allocation4 + $0x4] ss:$28 sps:$4 sm:$0xff]  }
  0x76   :  { %v5852_v21 = vld [vmem:[#allocation4 + $0xe0] ss:$28 sps:$4 sm:$0xff]   ;;  %v5873_v32 = vld [vmem:[#allocation4 + $0x3b8] ss:$28 sps:$4 sm:$0xff]  }
  0x77   :  { %v5855_v22 = vld [vmem:[#allocation4 + $0x460] ss:$28 sps:$4 sm:$0xff]  }
  0x78   :  { %962 = vmatpush1.bf16.msra.mxu0 %v5196_v38  ;;  %1003 = vmatpush1.bf16.msra.mxu1 %v5198_v41  ;;  %v5263_v38 = vcombine.high %v165_v28, %v169_v29  ;;  %v152_v41 = vld [vmem:[#allocation2 + $0x2b0] sm:$0xff] }
  0x79   :  { %963 = vmatprep.subr.bf16.mxu0 %v5189_v57  ;;  %1004 = vmatprep.subr.bf16.mxu1 %v5191_v44  ;;  %v5262_v57 = vcombine.low %v165_v28, %v169_v29  ;;  %v153_v44 = vld [vmem:[#allocation2 + $0x2b8] sm:$0xff]  ;;  %v5245_v50 = vcombine.high %v148_v40, %v152_v41  ;;  %v5244_v55 = vcombine.low %v148_v40, %v152_v41  ;;  %v5867_v28 = vld [vmem:[#allocation4 + $0x3f0] ss:$28 sps:$4 sm:$0xff]   ;;  %v5885_v40 = vld [vmem:[#allocation4 + $0x6c8] ss:$28 sps:$4 sm:$0xff]  }
  0x7a   :  { %v5872_v29 = vld [vmem:[#allocation4 + $0x3c] ss:$28 sps:$4 sm:$0xff]   ;;  %v5890_v41 = vld [vmem:[#allocation4 + $0x314] ss:$28 sps:$4 sm:$0xff]  }
  0x7c   :  { %964 = vmatpush1.bf16.msra.mxu0 %v5188_v45  ;;  %1005 = vmatpush1.bf16.msra.mxu1 %v5190_v48  ;;  %v5255_v45 = vcombine.high %v157_v36, %v161_v37  ;;  %v144_v48 = vld [vmem:[#allocation2 + $0x270] sm:$0xff] }
  0x7d   :  { %965 = vmatprep.subr.bf16.mxu0 %v5181_v49  ;;  %1006 = vmatprep.subr.bf16.mxu1 %v5183_v52  ;;  %v5254_v49 = vcombine.low %v157_v36, %v161_v37  ;;  %v145_v52 = vld [vmem:[#allocation2 + $0x278] sm:$0xff]  ;;  %v5237_v60 = vcombine.high %v140_v47, %v144_v48  ;;  %v5236_v0 = vcombine.low %v140_v47, %v144_v48  ;;  %v5884_v37 = vld [vmem:[#allocation4 + $0x34c] ss:$28 sps:$4 sm:$0xff]   ;;  %v5902_v48 = vld [vmem:[#allocation4 + $0x2a4] ss:$28 sps:$4 sm:$0xff]  }
  0x7e   :  { %v5238_v1 = vcombine.low %v141_v51, %v145_v52  ;;  %v5879_v36 = vld [vmem:[#allocation4 + $0x380] ss:$28 sps:$4 sm:$0xff]   ;;  %v5897_v47 = vld [vmem:[#allocation4 + $0x658] ss:$28 sps:$4 sm:$0xff]  }
  0x80   :  { %966 = vmatpush1.bf16.msra.mxu0 %v5180_v54  ;;  %1007 = vmatpush1.bf16.msra.mxu1 %v5182_v58  ;;  %v5247_v54 = vcombine.high %v149_v43, %v153_v44  ;;  %v136_v58 = vld [vmem:[#allocation2 + $0x230] sm:$0xff] }
  0x81   :  { %967 = vmatprep.subr.bf16.mxu0 %v5173_v59  ;;  %1008 = vmatprep.subr.bf16.mxu1 %v5175_v62  ;;  %v5246_v59 = vcombine.low %v149_v43, %v153_v44  ;;  %v137_v62 = vld [vmem:[#allocation2 + $0x238] sm:$0xff]  ;;  %v5228_v5 = vcombine.low %v132_v56, %v136_v58  ;;  %v5891_v43 = vld [vmem:[#allocation4 + $0x690] ss:$28 sps:$4 sm:$0xff]  }
  0x82   :  { %v5896_v44 = vld [vmem:[#allocation4 + $0x2dc] ss:$28 sps:$4 sm:$0xff]  }
  0x84   :  { %968 = vmatpush1.bf16.msra.mxu0 %v5172_v63  ;;  %1009 = vmatpush1.bf16.msra.mxu1 %v5174_v2  ;;  %v5239_v63 = vcombine.high %v141_v51, %v145_v52  ;;  %v5229_v2 = vcombine.high %v132_v56, %v136_v58  ;;  %v5903_v51 = vld [vmem:[#allocation4 + $0x620] ss:$28 sps:$4 sm:$0xff]   ;;  %v5908_v52 = vld [vmem:[#allocation4 + $0x26c] ss:$28 sps:$4 sm:$0xff]   ;;  %v5914_v58 = vld [vmem:[#allocation4 + $0x234] ss:$28 sps:$4 sm:$0xff]  }
  0x85   :  { %969 = vmatprep.subr.bf16.mxu0 %v5165_v3  ;;  %1010 = vmatprep.subr.bf16.mxu1 %v5167_v6  ;;  %v5231_v3 = vcombine.high %v133_v61, %v137_v62  ;;  %v5839_v6 = vld [vmem:[#allocation4 + $0x50c] ss:$28 sps:$4 sm:$0xff]  }
  0x86   :  { %v5909_v56 = vld [vmem:[#allocation4 + $0x5e8] ss:$28 sps:$4 sm:$0xff]  }
  0x88   :  { %970 = vmatpush1.bf16.msra.mxu0 %v5164_v7  ;;  %1011 = vmatpush1.bf16.msra.mxu1 %v5166_v10  ;;  %v5230_v7 = vcombine.low %v133_v61, %v137_v62  ;;  %v5842_v10 = vld [vmem:[#allocation4 + $0x154] ss:$28 sps:$4 sm:$0xff]   ;;  %v5920_v62 = vld [vmem:[#allocation4 + $0x1fc] ss:$28 sps:$4 sm:$0xff]  }
  0x89   :  { %971 = vmatprep.subr.bf16.mxu0 %v5285_v11  ;;  %1012 = vmatprep.subr.bf16.mxu1 %v5287_v15  ;;  %v5845_v11 = vld [vmem:[#allocation4 + $0x4d4] ss:$28 sps:$4 sm:$0xff]   ;;  %v5848_v15 = vld [vmem:[#allocation4 + $0x11c] ss:$28 sps:$4 sm:$0xff]  }
  0x8a   :  { %v5915_v61 = vld [vmem:[#allocation4 + $0x5b0] ss:$28 sps:$4 sm:$0xff]  }
  0x8c   :  { %972 = vmatpush2.bf16.msra.mxu0 %v5284_v16  ;;  %1013 = vmatpush2.bf16.msra.mxu1 %v5286_v19  ;;  %v5851_v16 = vld [vmem:[#allocation4 + $0x49c] ss:$28 sps:$4 sm:$0xff]   ;;  %v5854_v19 = vld [vmem:[#allocation4 + $0xe4] ss:$28 sps:$4 sm:$0xff]  }
  0x8d   :  { %973 = vmatprep.subr.bf16.mxu0 %v5277_v20  ;;  %1014 = vmatprep.subr.bf16.mxu1 %v5279_v23  ;;  %v5857_v20 = vld [vmem:[#allocation4 + $0x464] ss:$28 sps:$4 sm:$0xff]   ;;  %v5863_v23 = vld [vmem:[#allocation4 + $0x42c] ss:$28 sps:$4 sm:$0xff]  }
  0x90   :  { %974 = vmatpush2.bf16.msra.mxu0 %v5276_v53  ;;  %1015 = vmatpush2.bf16.msra.mxu1 %v5278_v26  ;;  %v5858_v53 = vld [vmem:[#allocation4 + $0xa8] ss:$28 sps:$4 sm:$0xff]   ;;  %v5869_v26 = vld [vmem:[#allocation4 + $0x3f4] ss:$28 sps:$4 sm:$0xff]  }
  0x91   :  { %975 = vmatprep.subr.bf16.mxu0 %v5269_v27  ;;  %1016 = vmatprep.subr.bf16.mxu1 %v5271_v30  ;;  %v5864_v27 = vld [vmem:[#allocation4 + $0x70] ss:$28 sps:$4 sm:$0xff]   ;;  %v5875_v30 = vld [vmem:[#allocation4 + $0x3bc] ss:$28 sps:$4 sm:$0xff]  }
  0x94   :  { %976 = vmatpush2.bf16.msra.mxu0 %v5268_v31  ;;  %1017 = vmatpush2.bf16.msra.mxu1 %v5270_v34  ;;  %v5870_v31 = vld [vmem:[#allocation4 + $0x38] ss:$28 sps:$4 sm:$0xff]   ;;  %v5881_v34 = vld [vmem:[#allocation4 + $0x384] ss:$28 sps:$4 sm:$0xff]  }
  0x95   :  { %977 = vmatprep.subr.bf16.mxu0 %v5261_v35  ;;  %1018 = vmatprep.subr.bf16.mxu1 %v5263_v38  ;;  %v5876_v35 = vld [vmem:[#allocation4] ss:$28 sps:$4 sm:$0xff]   ;;  %v5887_v38 = vld [vmem:[#allocation4 + $0x6cc] ss:$28 sps:$4 sm:$0xff]  }
  0x98   :  { %978 = vmatpush2.bf16.msra.mxu0 %v5260_v39  ;;  %1019 = vmatpush2.bf16.msra.mxu1 %v5262_v57  ;;  %v5882_v39 = vld [vmem:[#allocation4 + $0x348] ss:$28 sps:$4 sm:$0xff]   ;;  %v5893_v57 = vld [vmem:[#allocation4 + $0x694] ss:$28 sps:$4 sm:$0xff]  }
  0x99   :  { %979 = vmatprep.subr.bf16.mxu0 %v5253_v42  ;;  %1020 = vmatprep.subr.bf16.mxu1 %v5255_v45  ;;  %v5888_v42 = vld [vmem:[#allocation4 + $0x310] ss:$28 sps:$4 sm:$0xff]   ;;  %v5899_v45 = vld [vmem:[#allocation4 + $0x65c] ss:$28 sps:$4 sm:$0xff]  }
  0x9c   :  { %980 = vmatpush2.bf16.msra.mxu0 %v5252_v46  ;;  %1021 = vmatpush2.bf16.msra.mxu1 %v5254_v49  ;;  %v5894_v46 = vld [vmem:[#allocation4 + $0x2d8] ss:$28 sps:$4 sm:$0xff]   ;;  %v5905_v49 = vld [vmem:[#allocation4 + $0x624] ss:$28 sps:$4 sm:$0xff]  }
  0x9d   :  { %981 = vmatprep.subr.bf16.mxu0 %v5245_v50  ;;  %1022 = vmatprep.subr.bf16.mxu1 %v5247_v54  ;;  %v5900_v50 = vld [vmem:[#allocation4 + $0x2a0] ss:$28 sps:$4 sm:$0xff]   ;;  %v5911_v54 = vld [vmem:[#allocation4 + $0x5ec] ss:$28 sps:$4 sm:$0xff]  }
  0xa0   :  { %982 = vmatpush2.bf16.msra.mxu0 %v5244_v55  ;;  %1023 = vmatpush2.bf16.msra.mxu1 %v5246_v59  ;;  %v5906_v55 = vld [vmem:[#allocation4 + $0x268] ss:$28 sps:$4 sm:$0xff]   ;;  %v5917_v59 = vld [vmem:[#allocation4 + $0x5b4] ss:$28 sps:$4 sm:$0xff]  }
  0xa1   :  { %983 = vmatprep.subr.bf16.mxu0 %v5237_v60  ;;  %1024 = vmatprep.subr.bf16.mxu1 %v5239_v63  ;;  %v5912_v60 = vld [vmem:[#allocation4 + $0x230] ss:$28 sps:$4 sm:$0xff]   ;;  %v5923_v63 = vld [vmem:[#allocation4 + $0x57c] ss:$28 sps:$4 sm:$0xff]  }
  0xa4   :  { %984 = vmatpush2.bf16.msra.mxu0 %v5236_v0  ;;  %1025 = vmatpush2.bf16.msra.mxu1 %v5238_v1  ;;  %v5918_v0 = vld [vmem:[#allocation4 + $0x1f8] ss:$28 sps:$4 sm:$0xff]  }
  0xa5   :  { %985 = vmatprep.subr.bf16.mxu0 %v5229_v2  ;;  %1026 = vmatprep.subr.bf16.mxu1 %v5231_v3  ;;  %v5921_v1 = vld [vmem:[#allocation4 + $0x578] ss:$28 sps:$4 sm:$0xff]   ;;  %v5926_v2 = vld [vmem:[#allocation4 + $0x1c4] ss:$28 sps:$4 sm:$0xff]  }
  0xa6   :  { %v5929_v3 = vld [vmem:[#allocation4 + $0x544] ss:$28 sps:$4 sm:$0xff]  }
  0xa8   :  { %986 = vmatpush2.bf16.msra.mxu0 %v5228_v5  ;;  %1027 = vmatpush2.bf16.msra.mxu1 %v5230_v7  ;;  %v5927_v5 = vld [vmem:[#allocation4 + $0x540] ss:$28 sps:$4 sm:$0xff]   ;;  %v5935_v7 = vld [vmem:[#allocation4 + $0xc0c] ss:$28 sps:$4 sm:$0xff]  }
  0xa9   :  { %4185 = vmatprep.subr.bf16.mxu0 %v5836_v4  ;;  %4226 = vmatprep.subr.bf16.mxu1 %v5839_v6  ;;  %v5924_v4 = vld [vmem:[#allocation4 + $0x1c0] ss:$28 sps:$4 sm:$0xff]   ;;  %v5932_v6 = vld [vmem:[#allocation4 + $0x88c] ss:$28 sps:$4 sm:$0xff]  }
  0xab   :  { %988 = vmatmul.mubr.bf16.vlgmr.msra.gmra.mxu0 %v6634_v14  ;;  %1029 = vmatmul.mubr.bf16.vlgmr.msra.gmra.mxu1 %v6634_v14  ;;  %v5860_v14 = vld [vmem:[#allocation4 + $0xac] ss:$28 sps:$4 sm:$0xff]  }
  0xac   :  { %4186 = vmatpush1.bf16.msra.mxu0 %v5834_v8  ;;  %4227 = vmatpush1.bf16.msra.mxu1 %v5837_v9  ;;  %v194_v8 = vlaneseq }
  0xad   :  { %4187 = vmatprep.subr.bf16.mxu0 %v5842_v10  ;;  %4228 = vmatprep.subr.bf16.mxu1 %v5845_v11  ;;  %v6644_v10 = vld [vmem:[#allocation6] sm:$0xff] }
  0xae   :  { %v6642_v9 = vshrl.u32 %v194_v8, 7 }
  0xb0   :  { %4188 = vmatpush1.bf16.msra.mxu0 %v5840_v12  ;;  %4229 = vmatpush1.bf16.msra.mxu1 %v5843_v13  ;;  %v6647_v11 = vsub.s32 0, %v6642_v9  ;;  %v6649_v12 = vld [vmem:[#allocation6 + $0x10] sm:$0xff]  ;;  %v6651_v13 = vld [vmem:[#allocation6 + $0x8] sm:$0xff] }
  0xb1   :  { %4189 = vmatprep.subr.bf16.mxu0 %v5848_v15  ;;  %4230 = vmatprep.subr.bf16.mxu1 %v5851_v16  ;;  %v6655_v16 = vld [vmem:[#allocation6 + $0x18] sm:$0xff] }
  0xb2   :  { %v197_v15 = vrot.slane %v6644_v10, %v6647_v11 }
  0xb4   :  { %4190 = vmatpush1.bf16.msra.mxu0 %v5846_v17  ;;  %4231 = vmatpush1.bf16.msra.mxu1 %v5849_v18  ;;  %v205_v17 = vrot.slane %v6649_v12, %v6647_v11  ;;  %v201_v18 = vrot.slane %v6651_v13, %v6647_v11 }
  0xb5   :  { %4191 = vmatprep.subr.bf16.mxu0 %v5854_v19  ;;  %4232 = vmatprep.subr.bf16.mxu1 %v5857_v20  ;;  %v209_v20 = vrot.slane %v6655_v16, %v6647_v11 }
  0xb8   :  { %4192 = vmatpush1.bf16.msra.mxu0 %v5852_v21  ;;  %4233 = vmatpush1.bf16.msra.mxu1 %v5855_v22 }
  0xb9   :  { %4193 = vmatprep.subr.bf16.mxu0 %v5860_v14  ;;  %4234 = vmatprep.subr.bf16.mxu1 %v5863_v23 }
  0xbc   :  { %4194 = vmatpush1.bf16.msra.mxu0 %v5858_v53  ;;  %4235 = vmatpush1.bf16.msra.mxu1 %v5861_v24 }
  0xbd   :  { %4195 = vmatprep.subr.bf16.mxu0 %v5866_v25  ;;  %4236 = vmatprep.subr.bf16.mxu1 %v5869_v26 }
  0xc0   :  { %4196 = vmatpush1.bf16.msra.mxu0 %v5864_v27  ;;  %4237 = vmatpush1.bf16.msra.mxu1 %v5867_v28 }
  0xc1   :  { %4197 = vmatprep.subr.bf16.mxu0 %v5872_v29  ;;  %4238 = vmatprep.subr.bf16.mxu1 %v5875_v30 }
  0xc4   :  { %4198 = vmatpush1.bf16.msra.mxu0 %v5870_v31  ;;  %4239 = vmatpush1.bf16.msra.mxu1 %v5873_v32 }
  0xc5   :  { %4199 = vmatprep.subr.bf16.mxu0 %v5878_v33  ;;  %4240 = vmatprep.subr.bf16.mxu1 %v5881_v34 }
  0xc8   :  { %4200 = vmatpush1.bf16.msra.mxu0 %v5876_v35  ;;  %4241 = vmatpush1.bf16.msra.mxu1 %v5879_v36 }
  0xc9   :  { %4201 = vmatprep.subr.bf16.mxu0 %v5884_v37  ;;  %4242 = vmatprep.subr.bf16.mxu1 %v5887_v38 }
  0xcc   :  { %4202 = vmatpush2.bf16.msra.mxu0 %v5882_v39  ;;  %4243 = vmatpush2.bf16.msra.mxu1 %v5885_v40 }
  0xcd   :  { %4203 = vmatprep.subr.bf16.mxu0 %v5890_v41  ;;  %4244 = vmatprep.subr.bf16.mxu1 %v5893_v57 }
  0xd0   :  { %4204 = vmatpush2.bf16.msra.mxu0 %v5888_v42  ;;  %4245 = vmatpush2.bf16.msra.mxu1 %v5891_v43 }
  0xd1   :  { %4205 = vmatprep.subr.bf16.mxu0 %v5896_v44  ;;  %4246 = vmatprep.subr.bf16.mxu1 %v5899_v45 }
  0xd4   :  { %4206 = vmatpush2.bf16.msra.mxu0 %v5894_v46  ;;  %4247 = vmatpush2.bf16.msra.mxu1 %v5897_v47 }
  0xd5   :  { %4207 = vmatprep.subr.bf16.mxu0 %v5902_v48  ;;  %4248 = vmatprep.subr.bf16.mxu1 %v5905_v49 }
  0xd8   :  { %4208 = vmatpush2.bf16.msra.mxu0 %v5900_v50  ;;  %4249 = vmatpush2.bf16.msra.mxu1 %v5903_v51 }
  0xd9   :  { %4209 = vmatprep.subr.bf16.mxu0 %v5908_v52  ;;  %4250 = vmatprep.subr.bf16.mxu1 %v5911_v54 }
  0xdc   :  { %4210 = vmatpush2.bf16.msra.mxu0 %v5906_v55  ;;  %4251 = vmatpush2.bf16.msra.mxu1 %v5909_v56 }
  0xdd   :  { %4211 = vmatprep.subr.bf16.mxu0 %v5914_v58  ;;  %4252 = vmatprep.subr.bf16.mxu1 %v5917_v59 }
  0xe0   :  { %4212 = vmatpush2.bf16.msra.mxu0 %v5912_v60  ;;  %4253 = vmatpush2.bf16.msra.mxu1 %v5915_v61 }
  0xe1   :  { %4213 = vmatprep.subr.bf16.mxu0 %v5920_v62  ;;  %4254 = vmatprep.subr.bf16.mxu1 %v5923_v63 }
  0xe4   :  { %4214 = vmatpush2.bf16.msra.mxu0 %v5918_v0  ;;  %4255 = vmatpush2.bf16.msra.mxu1 %v5921_v1 }
  0xe5   :  { %4215 = vmatprep.subr.bf16.mxu0 %v5926_v2  ;;  %4256 = vmatprep.subr.bf16.mxu1 %v5929_v3 }
  0xe8   :  { %4216 = vmatpush2.bf16.msra.mxu0 %v5924_v4  ;;  %4257 = vmatpush2.bf16.msra.mxu1 %v5927_v5 }
  0xe9   :  { %4267 = vmatprep.subr.bf16.mxu0 %v5932_v6  ;;  %4308 = vmatprep.subr.bf16.mxu1 %v5935_v7 }
 0x12b   :  { %v907_v19 = vpop.f32.mrf.mxu0  ;;  %v948_v22 = vpop.f32.mrf.mxu1 }
 0x12c   :  { %v908_v21 = vadd.f32 %v907_v19, %v197_v15  ;;  %v949_v14 = vadd.f32 %v948_v22, %v205_v17 }
 0x12d   :  { %v909_v23 = vpop.f32.mrf.mxu0  ;;  %v950_v25 = vpop.f32.mrf.mxu1 }
 0x12e   :  { %v6663_v53 = vmax.f32 %v908_v21, 0.0  ;;  %v910_v24 = vadd.f32 %v909_v23, %v201_v18  ;;  %v6665_v26 = vmax.f32 %v949_v14, 0.0  ;;  %v951_v27 = vadd.f32 %v950_v25, %v209_v20 }
 0x12f   :  { %v911_v28 = vpop.f32.mrf.mxu0  ;;  %v952_v32 = vpop.f32.mrf.mxu1 }
 0x130   :  { %v1045_v29 = vrot.slane %v6663_v53, 4  ;;  %v1101_v30 = vmul.f32 %v6663_v53, %v6663_v53  ;;  %v6670_v31 = vmax.f32 %v910_v24, 0.0  ;;  %v1057_v33 = vrot.slane %v6665_v26, 4 }
 0x131   :  { %v1103_v34 = vmul.f32 %v6665_v26, %v6665_v26  ;;  %v6675_v35 = vmax.f32 %v951_v27, 0.0  ;;  %v912_v36 = vpop.f32.mrf.mxu0  ;;  %v953_v41 = vpop.f32.mrf.mxu1 }
 0x132   :  { %v1046_v37 = vadd.f32 %v1045_v29, %v6663_v53  ;;  %v1109_v38 = vrot.slane %v1101_v30, 4  ;;  %v1051_v39 = vrot.slane %v6670_v31, 4  ;;  %v1102_v40 = vmul.f32 %v6670_v31, %v6670_v31 }
 0x133   :  { %v1058_v57 = vadd.f32 %v1057_v33, %v6665_v26  ;;  %v1121_v42 = vrot.slane %v1103_v34, 4  ;;  %v1063_v43 = vrot.slane %v6675_v35, 4  ;;  %v1104_v44 = vmul.f32 %v6675_v35, %v6675_v35 }
 0x134   :  { %v1047_v45 = vrot.slane %v1046_v37, 2  ;;  %v1110_v46 = vadd.f32 %v1109_v38, %v1101_v30  ;;  %v1052_v47 = vadd.f32 %v1051_v39, %v6670_v31  ;;  %v1115_v48 = vrot.slane %v1102_v40, 4 }
 0x135   :  { %v1059_v49 = vrot.slane %v1058_v57, 2  ;;  %v1122_v50 = vadd.f32 %v1121_v42, %v1103_v34  ;;  %v1064_v51 = vadd.f32 %v1063_v43, %v6675_v35  ;;  %v1127_v52 = vrot.slane %v1104_v44, 4 }
 0x136   :  { %v1048_v54 = vadd.f32 %v1047_v45, %v1046_v37  ;;  %v1111_v55 = vrot.slane %v1110_v46, 2  ;;  %v1053_v56 = vrot.slane %v1052_v47, 2  ;;  %v1116_v58 = vadd.f32 %v1115_v48, %v1102_v40 }
 0x137   :  { %v1060_v59 = vadd.f32 %v1059_v49, %v1058_v57  ;;  %v1123_v60 = vrot.slane %v1122_v50, 2  ;;  %v1065_v61 = vrot.slane %v1064_v51, 2  ;;  %v1128_v62 = vadd.f32 %v1127_v52, %v1104_v44 }
 0x138   :  { %v1049_v63 = vrot.slane %v1048_v54, 1  ;;  %v1112_v0 = vadd.f32 %v1111_v55, %v1110_v46  ;;  %v1054_v1 = vadd.f32 %v1053_v56, %v1052_v47  ;;  %v1117_v2 = vrot.slane %v1116_v58, 2 }
 0x139   :  { %v1061_v3 = vrot.slane %v1060_v59, 1  ;;  %v1124_v4 = vadd.f32 %v1123_v60, %v1122_v50  ;;  %v1066_v5 = vadd.f32 %v1065_v61, %v1064_v51  ;;  %v1129_v6 = vrot.slane %v1128_v62, 2 }
 0x13a   :  { %v1050_v7 = vadd.f32 %v1049_v63, %v1048_v54  ;;  %v1113_v8 = vrot.slane %v1112_v0, 1  ;;  %v1055_v15 = vrot.slane %v1054_v1, 1  ;;  %v1118_v17 = vadd.f32 %v1117_v2, %v1116_v58 }
 0x13b   :  { %v1062_v18 = vadd.f32 %v1061_v3, %v1060_v59  ;;  %v1125_v19 = vrot.slane %v1124_v4, 1  ;;  %v1067_v20 = vrot.slane %v1066_v5, 1  ;;  %v1130_v21 = vadd.f32 %v1129_v6, %v1128_v62 }
 0x13c   :  { %v1093_v22 = vmul.f32 0.125, %v1050_v7  ;;  %v1114_v14 = vadd.f32 %v1113_v8, %v1112_v0  ;;  %v1056_v23 = vadd.f32 %v1055_v15, %v1054_v1  ;;  %v1119_v24 = vrot.slane %v1118_v17, 1 }
 0x13d   :  { %v1095_v25 = vmul.f32 0.125, %v1062_v18  ;;  %v1126_v27 = vadd.f32 %v1125_v19, %v1124_v4  ;;  %v1068_v28 = vadd.f32 %v1067_v20, %v1066_v5  ;;  %v1131_v29 = vrot.slane %v1130_v21, 1 }
 0x13e   :  { %v1157_v30 = vmul.f32 0.125, %v1114_v14  ;;  %v1165_v32 = vmul.f32 %v1093_v22, %v1093_v22  ;;  %v1094_v33 = vmul.f32 0.125, %v1056_v23  ;;  %v1120_v34 = vadd.f32 %v1119_v24, %v1118_v17 }
 0x13f   :  { %v1159_v36 = vmul.f32 0.125, %v1126_v27  ;;  %v1167_v37 = vmul.f32 %v1095_v25, %v1095_v25  ;;  %v1096_v38 = vmul.f32 0.125, %v1068_v28  ;;  %v1132_v39 = vadd.f32 %v1131_v29, %v1130_v21 }
 0x140   :  { %v1173_v40 = vsub.f32 %v1157_v30, %v1165_v32  ;;  %v1158_v41 = vmul.f32 0.125, %v1120_v34  ;;  %v1166_v57 = vmul.f32 %v1094_v33, %v1094_v33  ;;  %v6689_v61 = vsub.s32 1, %v6642_v9 }
 0x141   :  { %v1175_v42 = vsub.f32 %v1159_v36, %v1167_v37  ;;  %v1160_v43 = vmul.f32 0.125, %v1132_v39  ;;  %v1168_v44 = vmul.f32 %v1096_v38, %v1096_v38  ;;  %v6695_v5 = vsub.s32 2, %v6642_v9 }
 0x142   :  { %v1181_v45 = vmax.f32 %v1173_v40, 0.0  ;;  %v1174_v46 = vsub.f32 %v1158_v41, %v1166_v57  ;;  %v6724_v40 = vld [vmem:[#allocation6 + $0x20] sm:$0xff]  ;;  %v5936_v41 = vld [vmem:[#allocation4 + $0x850] ss:$28 sps:$4 sm:$0xff]  }
 0x143   :  { %v1183_v47 = vmax.f32 %v1175_v42, 0.0  ;;  %v1176_v48 = vsub.f32 %v1160_v43, %v1168_v44  ;;  %v6727_v57 = vld [vmem:[#allocation6 + $0x30] sm:$0xff]  ;;  %v5944_v43 = vld [vmem:[#allocation4 + $0x81c] ss:$28 sps:$4 sm:$0xff]   ;;  %v6729_v44 = vld [vmem:[#allocation6 + $0x28] sm:$0xff] }
 0x144   :  { %v1189_v49 = vadd.f32 1e-05, %v1181_v45  ;;  %v1182_v50 = vmax.f32 %v1174_v46, 0.0  ;;  %v5939_v42 = vld [vmem:[#allocation4 + $0xbd0] ss:$28 sps:$4 sm:$0xff]   ;;  %v213_v45 = vrot.slane %v6724_v40, %v6647_v11 }
 0x145   :  { %v1191_v51 = vadd.f32 1e-05, %v1183_v47  ;;  %v1184_v52 = vmax.f32 %v1176_v48, 0.0  ;;  %v5947_v46 = vld [vmem:[#allocation4 + $0xb9c] ss:$28 sps:$4 sm:$0xff]   ;;  %v221_v48 = vrot.slane %v6727_v57, %v6647_v11 }
 0x146   :  { %6474 = vrsqrt.f32 %v1189_v49  ;;  %v1190_v54 = vadd.f32 1e-05, %v1182_v50  ;;  %v6733_v47 = vld [vmem:[#allocation6 + $0x38] sm:$0xff]  ;;  %v217_v50 = vrot.slane %v6729_v44, %v6647_v11 }
 0x147   :  { %6476 = vrsqrt.f32 %v1191_v51  ;;  %v1192_v55 = vadd.f32 1e-05, %v1184_v52  ;;  %v5942_v49 = vld [vmem:[#allocation4 + $0x818] ss:$28 sps:$4 sm:$0xff]  }
 0x148   :  { %6478 = vrsqrt.f32 %v1190_v54  ;;  %v5945_v52 = vld [vmem:[#allocation4 + $0xb98] ss:$28 sps:$4 sm:$0xff]   ;;  %v225_v54 = vrot.slane %v6733_v47, %v6647_v11  ;;  %v5951_v11 = vld [vmem:[#allocation4 + $0xb60] ss:$28 sps:$4 sm:$0xff]  }
 0x149   :  { %6480 = vrsqrt.f32 %v1192_v55  ;;  %v5950_v55 = vld [vmem:[#allocation4 + $0x7e4] ss:$28 sps:$4 sm:$0xff]  }
 0x153   :  { %v6475_v56 = vpop.eup %6474 }
 0x154   :  { %v6477_v58 = vpop.eup %6476  ;;  %v1205_v59 = vmul.f32 %v6475_v56, %v6644_v10 }
 0x155   :  { %v6479_v60 = vpop.eup %6478  ;;  %v1207_v62 = vmul.f32 %v6477_v58, %v6649_v12 }
 0x156   :  { %v6481_v63 = vpop.eup %6480  ;;  %v1206_v0 = vmul.f32 %v6479_v60, %v6651_v13  ;;  %v1253_v1 = vmul.f32 %v1205_v59, %v1093_v22  ;;  %v1216_v7 = vrot.slane %v1205_v59, %v6689_v61  ;;  %v5953_v59 = vld [vmem:[#allocation4 + $0xb64] ss:$28 sps:$4 sm:$0xff]  }
 0x157   :  { %v1208_v2 = vmul.f32 %v6481_v63, %v6655_v16  ;;  %v1255_v3 = vmul.f32 %v1207_v62, %v1095_v25  ;;  %v1224_v17 = vrot.slane %v1207_v62, %v6689_v61 }
 0x158   :  { %v1254_v4 = vmul.f32 %v1206_v0, %v1094_v33  ;;  %v1269_v6 = vrot.slane %v1253_v1, 7  ;;  %v1220_v18 = vrot.slane %v1206_v0, %v6689_v61  ;;  %v1245_v25 = vmul.f32 %v1216_v7, %v6663_v53  ;;  %v5930_v53 = vld [vmem:[#allocation4 + $0x888] ss:$28 sps:$4 sm:$0xff]  }
 0x159   :  { %v1256_v8 = vmul.f32 %v1208_v2, %v1096_v38  ;;  %v1271_v15 = vrot.slane %v1255_v3, 7  ;;  %v1228_v21 = vrot.slane %v1208_v2, %v6689_v61  ;;  %v1247_v29 = vmul.f32 %v1224_v17, %v6665_v26  ;;  %v5933_v38 = vld [vmem:[#allocation4 + $0xc08] ss:$28 sps:$4 sm:$0xff]   ;;  %v5938_v26 = vld [vmem:[#allocation4 + $0x854] ss:$28 sps:$4 sm:$0xff]  }
 0x15a   :  { %v1270_v19 = vrot.slane %v1254_v4, 7  ;;  %v1285_v20 = vsub.f32 %v6644_v10, %v1269_v6  ;;  %v1246_v30 = vmul.f32 %v1220_v18, %v6670_v31  ;;  %v5948_v2 = vld [vmem:[#allocation4 + $0x7e0] ss:$28 sps:$4 sm:$0xff]   ;;  %v5956_v7 = vld [vmem:[#allocation4 + $0x7ac] ss:$28 sps:$4 sm:$0xff]  }
 0x15b   :  { %v1272_v22 = vrot.slane %v1256_v8, 7  ;;  %v1287_v14 = vsub.f32 %v6649_v12, %v1271_v15  ;;  %v1248_v32 = vmul.f32 %v1228_v21, %v6675_v35  ;;  %v5941_v35 = vld [vmem:[#allocation4 + $0xbd4] ss:$28 sps:$4 sm:$0xff]  }
 0x15c   :  { %v1286_v23 = vsub.f32 %v6651_v13, %v1270_v19  ;;  %v1296_v24 = vrot.slane %v1285_v20, %v6695_v5  ;;  %v5959_v19 = vld [vmem:[#allocation4 + $0xb2c] ss:$28 sps:$4 sm:$0xff]  }
 0x15d   :  { %v1288_v27 = vsub.f32 %v6655_v16, %v1272_v22  ;;  %v1304_v28 = vrot.slane %v1287_v14, %v6695_v5 }
 0x15e   :  { %v1300_v10 = vrot.slane %v1286_v23, %v6695_v5  ;;  %v1325_v33 = vadd.f32 %v1296_v24, %v1245_v25 }
 0x15f   :  { %v1308_v12 = vrot.slane %v1288_v27, %v6695_v5  ;;  %v1327_v34 = vadd.f32 %v1304_v28, %v1247_v29  ;;  %v5954_v29 = vld [vmem:[#allocation4 + $0x7a8] ss:$28 sps:$4 sm:$0xff]  }
 0x160   :  { %v1326_v13 = vadd.f32 %v1300_v10, %v1246_v30  ;;  %v6717_v39 = vpack.c.bf16 %v1325_v33, %v1325_v33  ;;  %v5957_v33 = vld [vmem:[#allocation4 + $0xb28] ss:$28 sps:$4 sm:$0xff]  }
 0x161   :  { %v1328_v36 = vadd.f32 %v1308_v12, %v1248_v32  ;;  %v6720_v31 = vpack.c.bf16 %v1327_v34, %v1327_v34 }
 0x162   :  { %v6713_v37 = vpack.c.bf16 %v1326_v13, %v1326_v13  ;;  %v5962_v13 = vld [vmem:[#allocation4 + $0x774] ss:$28 sps:$4 sm:$0xff]  }
 0x163   :  { %v6715_v16 = vpack.c.bf16 %v1328_v36, %v1328_v36 }
 0x164   :  { %4217 = vmatprep.mubr.bf16.mxu0 %v6713_v37 }
 0x165   :  { %4258 = vmatprep.mubr.bf16.mxu1 %v6715_v16  ;;  %4218 = vmatmul.mubr.bf16.vlgmr.msra.gmra.mxu0 %v6717_v39 }
 0x166   :  { %4259 = vmatmul.mubr.bf16.vlgmr.msra.gmra.mxu1 %v6720_v31  ;;  %4268 = vmatpush1.bf16.msra.mxu0 %v5930_v53 }
 0x167   :  { %4309 = vmatpush1.bf16.msra.mxu1 %v5933_v38  ;;  %4269 = vmatprep.subr.bf16.mxu0 %v5938_v26  ;;  %v5965_v26 = vld [vmem:[#allocation4 + $0xaf4] ss:$28 sps:$4 sm:$0xff]  }
 0x168   :  { %4310 = vmatprep.subr.bf16.mxu1 %v5941_v35 }
 0x16a   :  { %4270 = vmatpush1.bf16.msra.mxu0 %v5936_v41 }
 0x16b   :  { %4311 = vmatpush1.bf16.msra.mxu1 %v5939_v42  ;;  %v989_v51 = vpop.f32.mrf.mxu0  ;;  %4271 = vmatprep.subr.bf16.mxu0 %v5944_v43  ;;  %v1030_v58 = vpop.f32.mrf.mxu1 }
 0x16c   :  { %v990_v56 = vadd.f32 %v989_v51, %v213_v45  ;;  %4312 = vmatprep.subr.bf16.mxu1 %v5947_v46  ;;  %v1031_v60 = vadd.f32 %v1030_v58, %v221_v48  ;;  %v5968_v58 = vld [vmem:[#allocation4 + $0x73c] ss:$28 sps:$4 sm:$0xff]  }
 0x16d   :  { %v991_v62 = vpop.f32.mrf.mxu0  ;;  %v1032_v1 = vpop.f32.mrf.mxu1 }
 0x16e   :  { %v6741_v63 = vmax.f32 %v990_v56, 0.0  ;;  %v992_v0 = vadd.f32 %v991_v62, %v217_v50  ;;  %4272 = vmatpush1.bf16.msra.mxu0 %v5942_v49  ;;  %v6743_v3 = vmax.f32 %v1031_v60, 0.0  ;;  %v1033_v4 = vadd.f32 %v1032_v1, %v225_v54  ;;  %v5960_v50 = vld [vmem:[#allocation4 + $0x770] ss:$28 sps:$4 sm:$0xff]   ;;  %v5971_v1 = vld [vmem:[#allocation4 + $0xabc] ss:$28 sps:$4 sm:$0xff]  }
 0x16f   :  { %4313 = vmatpush1.bf16.msra.mxu1 %v5945_v52  ;;  %v993_v6 = vpop.f32.mrf.mxu0  ;;  %4273 = vmatprep.subr.bf16.mxu0 %v5950_v55  ;;  %v1034_v18 = vpop.f32.mrf.mxu1  ;;  %v5963_v56 = vld [vmem:[#allocation4 + $0xaf0] ss:$28 sps:$4 sm:$0xff]  }
 0x170   :  { %v1069_v8 = vrot.slane %v6741_v63, 4  ;;  %v1105_v15 = vmul.f32 %v6741_v63, %v6741_v63  ;;  %v6748_v17 = vmax.f32 %v992_v0, 0.0  ;;  %4314 = vmatprep.subr.bf16.mxu1 %v5953_v59  ;;  %v1081_v20 = vrot.slane %v6743_v3, 4 }
 0x171   :  { %v1107_v21 = vmul.f32 %v6743_v3, %v6743_v3  ;;  %v6753_v22 = vmax.f32 %v1033_v4, 0.0  ;;  %v994_v14 = vpop.f32.mrf.mxu0  ;;  %v1035_v28 = vpop.f32.mrf.mxu1 }
 0x172   :  { %v1070_v23 = vadd.f32 %v1069_v8, %v6741_v63  ;;  %v1133_v24 = vrot.slane %v1105_v15, 4  ;;  %v1075_v25 = vrot.slane %v6748_v17, 4  ;;  %v1106_v27 = vmul.f32 %v6748_v17, %v6748_v17  ;;  %4274 = vmatpush1.bf16.msra.mxu0 %v5948_v2 }
 0x173   :  { %v1082_v30 = vadd.f32 %v1081_v20, %v6743_v3  ;;  %v1145_v10 = vrot.slane %v1107_v21, 4  ;;  %v1087_v32 = vrot.slane %v6753_v22, 4  ;;  %v1108_v12 = vmul.f32 %v6753_v22, %v6753_v22  ;;  %4315 = vmatpush1.bf16.msra.mxu1 %v5951_v11  ;;  %4275 = vmatprep.subr.bf16.mxu0 %v5956_v7 }
 0x174   :  { %v1071_v34 = vrot.slane %v1070_v23, 2  ;;  %v1134_v36 = vadd.f32 %v1133_v24, %v1105_v15  ;;  %v1076_v53 = vadd.f32 %v1075_v25, %v6748_v17  ;;  %v1139_v38 = vrot.slane %v1106_v27, 4  ;;  %4316 = vmatprep.subr.bf16.mxu1 %v5959_v19  ;;  %v5966_v19 = vld [vmem:[#allocation4 + $0x738] ss:$28 sps:$4 sm:$0xff]   ;;  %v5974_v25 = vld [vmem:[#allocation4 + $0x704] ss:$28 sps:$4 sm:$0xff]  }
 0x175   :  { %v1083_v35 = vrot.slane %v1082_v30, 2  ;;  %v1146_v41 = vadd.f32 %v1145_v10, %v1107_v21  ;;  %v1088_v42 = vadd.f32 %v1087_v32, %v6753_v22  ;;  %v1151_v43 = vrot.slane %v1108_v12, 4  ;;  %v5969_v24 = vld [vmem:[#allocation4 + $0xab8] ss:$28 sps:$4 sm:$0xff]   ;;  %v5977_v10 = vld [vmem:[#allocation4 + $0xa84] ss:$28 sps:$4 sm:$0xff]  }
 0x176   :  { %v1072_v45 = vadd.f32 %v1071_v34, %v1070_v23  ;;  %v1135_v46 = vrot.slane %v1134_v36, 2  ;;  %v1077_v48 = vrot.slane %v1076_v53, 2  ;;  %v1140_v49 = vadd.f32 %v1139_v38, %v1106_v27  ;;  %4276 = vmatpush1.bf16.msra.mxu0 %v5954_v29 }
 0x177   :  { %v1084_v51 = vadd.f32 %v1083_v35, %v1082_v30  ;;  %v1147_v52 = vrot.slane %v1146_v41, 2  ;;  %v1089_v54 = vrot.slane %v1088_v42, 2  ;;  %v1152_v55 = vadd.f32 %v1151_v43, %v1108_v12  ;;  %4317 = vmatpush1.bf16.msra.mxu1 %v5957_v33  ;;  %4277 = vmatprep.subr.bf16.mxu0 %v5962_v13 }
 0x178   :  { %v1073_v59 = vrot.slane %v1072_v45, 1  ;;  %v1136_v60 = vadd.f32 %v1135_v46, %v1134_v36  ;;  %v1078_v62 = vadd.f32 %v1077_v48, %v1076_v53  ;;  %v1141_v0 = vrot.slane %v1140_v49, 2  ;;  %4318 = vmatprep.subr.bf16.mxu1 %v5965_v26  ;;  %v5972_v26 = vld [vmem:[#allocation4 + $0x700] ss:$28 sps:$4 sm:$0xff]   ;;  %v5980_v46 = vld [vmem:[#allocation4 + $0xa4c] ss:$28 sps:$4 sm:$0xff]  }
 0x179   :  { %v1085_v2 = vrot.slane %v1084_v51, 1  ;;  %v1148_v4 = vadd.f32 %v1147_v52, %v1146_v41  ;;  %v1090_v6 = vadd.f32 %v1089_v54, %v1088_v42  ;;  %v1153_v11 = vrot.slane %v1152_v55, 2 }
 0x17a   :  { %v1074_v7 = vadd.f32 %v1073_v59, %v1072_v45  ;;  %v1137_v8 = vrot.slane %v1136_v60, 1  ;;  %v1079_v15 = vrot.slane %v1078_v62, 1  ;;  %v1142_v18 = vadd.f32 %v1141_v0, %v1140_v49  ;;  %4278 = vmatpush1.bf16.msra.mxu0 %v5960_v50  ;;  %v5975_v45 = vld [vmem:[#allocation4 + $0xa80] ss:$28 sps:$4 sm:$0xff]   ;;  %v5978_v59 = vld [vmem:[#allocation4 + $0xa48] ss:$28 sps:$4 sm:$0xff]  }
 0x17b   :  { %v1086_v20 = vadd.f32 %v1085_v2, %v1084_v51  ;;  %v1149_v21 = vrot.slane %v1148_v4, 1  ;;  %v1091_v14 = vrot.slane %v1090_v6, 1  ;;  %v1154_v23 = vadd.f32 %v1153_v11, %v1152_v55  ;;  %4319 = vmatpush1.bf16.msra.mxu1 %v5963_v56  ;;  %4279 = vmatprep.subr.bf16.mxu0 %v5968_v58  ;;  %v5983_v51 = vld [vmem:[#allocation4 + $0xdcc] ss:$28 sps:$4 sm:$0xff]  }
 0x17c   :  { %v6765_v27 = vmul.f32 0.125, %v1074_v7  ;;  %v1138_v28 = vadd.f32 %v1137_v8, %v1136_v60  ;;  %v1080_v29 = vadd.f32 %v1079_v15, %v1078_v62  ;;  %v1143_v30 = vrot.slane %v1142_v18, 1  ;;  %4320 = vmatprep.subr.bf16.mxu1 %v5971_v1  ;;  %v5981_v0 = vld [vmem:[#allocation4 + $0xdc8] ss:$28 sps:$4 sm:$0xff]   ;;  %v5986_v1 = vld [vmem:[#allocation4 + $0xa14] ss:$28 sps:$4 sm:$0xff]  }
 0x17d   :  { %v6767_v32 = vmul.f32 0.125, %v1086_v20  ;;  %v1150_v12 = vadd.f32 %v1149_v21, %v1148_v4  ;;  %v1092_v33 = vadd.f32 %v1091_v14, %v1090_v6  ;;  %v1155_v13 = vrot.slane %v1154_v23, 1  ;;  %v5989_v6 = vld [vmem:[#allocation4 + $0xd94] ss:$28 sps:$4 sm:$0xff]   ;;  %v5992_v20 = vld [vmem:[#allocation4 + $0x9dc] ss:$28 sps:$4 sm:$0xff]  }
 0x17e   :  { %v1161_v34 = vmul.f32 0.125, %v1138_v28  ;;  %v1169_v36 = vmul.f32 %v6765_v27, %v6765_v27  ;;  %v6771_v53 = vmul.f32 0.125, %v1080_v29  ;;  %v1144_v38 = vadd.f32 %v1143_v30, %v1142_v18  ;;  %4280 = vmatpush1.bf16.msra.mxu0 %v5966_v19  ;;  %v5984_v15 = vld [vmem:[#allocation4 + $0xa10] ss:$28 sps:$4 sm:$0xff]   ;;  %v5995_v21 = vld [vmem:[#allocation4 + $0xd5c] ss:$28 sps:$4 sm:$0xff]  }
 0x17f   :  { %v1163_v35 = vmul.f32 0.125, %v1150_v12  ;;  %v1171_v41 = vmul.f32 %v6767_v32, %v6767_v32  ;;  %v6775_v42 = vmul.f32 0.125, %v1092_v33  ;;  %v1156_v43 = vadd.f32 %v1155_v13, %v1154_v23  ;;  %4321 = vmatpush1.bf16.msra.mxu1 %v5969_v24  ;;  %4281 = vmatprep.subr.bf16.mxu0 %v5974_v25  ;;  %v5987_v19 = vld [vmem:[#allocation4 + $0xd90] ss:$28 sps:$4 sm:$0xff]   ;;  %v5990_v14 = vld [vmem:[#allocation4 + $0x9d8] ss:$28 sps:$4 sm:$0xff]  }
 0x180   :  { %v1177_v48 = vsub.f32 %v1161_v34, %v1169_v36  ;;  %v1162_v49 = vmul.f32 0.125, %v1144_v38  ;;  %v1170_v50 = vmul.f32 %v6771_v53, %v6771_v53  ;;  %4322 = vmatprep.subr.bf16.mxu1 %v5977_v10  ;;  %v5993_v23 = vld [vmem:[#allocation4 + $0xd58] ss:$28 sps:$4 sm:$0xff]   ;;  %v5998_v24 = vld [vmem:[#allocation4 + $0x9a4] ss:$28 sps:$4 sm:$0xff]  }
 0x181   :  { %v1179_v52 = vsub.f32 %v1163_v35, %v1171_v41  ;;  %v1164_v54 = vmul.f32 0.125, %v1156_v43  ;;  %v1172_v55 = vmul.f32 %v6775_v42, %v6775_v42  ;;  %v6001_v25 = vld [vmem:[#allocation4 + $0xd24] ss:$28 sps:$4 sm:$0xff]   ;;  %v6004_v30 = vld [vmem:[#allocation4 + $0x96c] ss:$28 sps:$4 sm:$0xff]  }
 0x182   :  { %v1185_v56 = vmax.f32 %v1177_v48, 0.0  ;;  %v1178_v58 = vsub.f32 %v1162_v49, %v1170_v50  ;;  %4282 = vmatpush1.bf16.msra.mxu0 %v5972_v26  ;;  %v5996_v28 = vld [vmem:[#allocation4 + $0x9a0] ss:$28 sps:$4 sm:$0xff]   ;;  %v6007_v10 = vld [vmem:[#allocation4 + $0xcec] ss:$28 sps:$4 sm:$0xff]  }
 0x183   :  { %v1187_v60 = vmax.f32 %v1179_v52, 0.0  ;;  %v1180_v62 = vsub.f32 %v1164_v54, %v1172_v55  ;;  %4323 = vmatpush1.bf16.msra.mxu1 %v5975_v45  ;;  %4283 = vmatprep.subr.bf16.mxu0 %v5980_v46  ;;  %v5999_v29 = vld [vmem:[#allocation4 + $0xd20] ss:$28 sps:$4 sm:$0xff]   ;;  %v6002_v12 = vld [vmem:[#allocation4 + $0x968] ss:$28 sps:$4 sm:$0xff]  }
 0x184   :  { %v1193_v2 = vadd.f32 1e-05, %v1185_v56  ;;  %v1186_v4 = vmax.f32 %v1178_v58, 0.0  ;;  %4324 = vmatprep.subr.bf16.mxu1 %v5983_v51  ;;  %v6005_v13 = vld [vmem:[#allocation4 + $0xce8] ss:$28 sps:$4 sm:$0xff]  }
 0x185   :  { %v1195_v11 = vadd.f32 1e-05, %v1187_v60  ;;  %v1188_v7 = vmax.f32 %v1180_v62, 0.0  ;;  %v6010_v34 = vld [vmem:[#allocation4 + $0x934] ss:$28 sps:$4 sm:$0xff]  }
 0x186   :  { %6482 = vrsqrt.f32 %v1193_v2  ;;  %v1194_v8 = vadd.f32 1e-05, %v1186_v4  ;;  %4284 = vmatpush2.bf16.msra.mxu0 %v5978_v59  ;;  %v6013_v26 = vld [vmem:[#allocation4 + $0xcb4] ss:$28 sps:$4 sm:$0xff]   ;;  %v6016_v51 = vld [vmem:[#allocation4 + $0x8fc] ss:$28 sps:$4 sm:$0xff]  }
 0x187   :  { %6484 = vrsqrt.f32 %v1195_v11  ;;  %v1196_v18 = vadd.f32 1e-05, %v1188_v7  ;;  %4325 = vmatpush2.bf16.msra.mxu1 %v5981_v0  ;;  %4285 = vmatprep.subr.bf16.mxu0 %v5986_v1  ;;  %v6008_v46 = vld [vmem:[#allocation4 + $0x930] ss:$28 sps:$4 sm:$0xff]   ;;  %v6019_v54 = vld [vmem:[#allocation4 + $0xc7c] ss:$28 sps:$4 sm:$0xff]  }
 0x188   :  { %6486 = vrsqrt.f32 %v1194_v8  ;;  %4326 = vmatprep.subr.bf16.mxu1 %v5989_v6  ;;  %v6011_v50 = vld [vmem:[#allocation4 + $0xcb0] ss:$28 sps:$4 sm:$0xff]   ;;  %v6014_v0 = vld [vmem:[#allocation4 + $0x8f8] ss:$28 sps:$4 sm:$0xff]   ;;  %v6022_v6 = vld [vmem:[#allocation4 + $0x8c4] ss:$28 sps:$4 sm:$0xff]  }
 0x189   :  { %6488 = vrsqrt.f32 %v1196_v18 }
 0x18a   :  { %4286 = vmatpush2.bf16.msra.mxu0 %v5984_v15 }
 0x18b   :  { %4327 = vmatpush2.bf16.msra.mxu1 %v5987_v19  ;;  %4287 = vmatprep.subr.bf16.mxu0 %v5992_v20  ;;  %v6020_v20 = vld [vmem:[#allocation4 + $0x8c0] ss:$28 sps:$4 sm:$0xff]  }
 0x18c   :  { %4328 = vmatprep.subr.bf16.mxu1 %v5995_v21 }
 0x18e   :  { %4288 = vmatpush2.bf16.msra.mxu0 %v5990_v14  ;;  %v6023_v14 = vld [vmem:[#allocation4 + $0xc40] ss:$28 sps:$4 sm:$0xff]  }
 0x18f   :  { %4329 = vmatpush2.bf16.msra.mxu1 %v5993_v23  ;;  %4289 = vmatprep.subr.bf16.mxu0 %v5998_v24  ;;  %v6031_v24 = vld [vmem:[#allocation4 + $0x514] ss:$28 sps:$4 sm:$0xff]  }
 0x190   :  { %4330 = vmatprep.subr.bf16.mxu1 %v6001_v25 }
 0x192   :  { %4290 = vmatpush2.bf16.msra.mxu0 %v5996_v28  ;;  %v6026_v28 = vld [vmem:[#allocation4 + $0x190] ss:$28 sps:$4 sm:$0xff]  }
 0x193   :  { %v6483_v33 = vpop.eup %6482  ;;  %4331 = vmatpush2.bf16.msra.mxu1 %v5999_v29  ;;  %4291 = vmatprep.subr.bf16.mxu0 %v6004_v30 }
 0x194   :  { %v6485_v36 = vpop.eup %6484  ;;  %v1209_v38 = vmul.f32 %v6483_v33, %v6724_v40  ;;  %4332 = vmatprep.subr.bf16.mxu1 %v6007_v10  ;;  %v6034_v10 = vld [vmem:[#allocation4 + $0x15c] ss:$28 sps:$4 sm:$0xff]  }
 0x195   :  { %v6487_v35 = vpop.eup %6486  ;;  %v1211_v41 = vmul.f32 %v6485_v36, %v6727_v57  ;;  %v6032_v33 = vld [vmem:[#allocation4 + $0x158] ss:$28 sps:$4 sm:$0xff]   ;;  %v6043_v36 = vld [vmem:[#allocation4 + $0x4a4] ss:$28 sps:$4 sm:$0xff]  }
 0x196   :  { %v6489_v43 = vpop.eup %6488  ;;  %v1210_v45 = vmul.f32 %v6487_v35, %v6729_v44  ;;  %4292 = vmatpush2.bf16.msra.mxu0 %v6002_v12  ;;  %v1257_v48 = vmul.f32 %v1209_v38, %v6765_v27  ;;  %v1232_v58 = vrot.slane %v1209_v38, %v6689_v61  ;;  %v6037_v12 = vld [vmem:[#allocation4 + $0x4dc] ss:$28 sps:$4 sm:$0xff]   ;;  %v6046_v35 = vld [vmem:[#allocation4 + $0xec] ss:$28 sps:$4 sm:$0xff]  }
 0x197   :  { %v1212_v49 = vmul.f32 %v6489_v43, %v6733_v47  ;;  %4333 = vmatpush2.bf16.msra.mxu1 %v6005_v13  ;;  %4293 = vmatprep.subr.bf16.mxu0 %v6010_v34  ;;  %v1259_v52 = vmul.f32 %v1211_v41, %v6767_v32  ;;  %v1240_v27 = vrot.slane %v1211_v41, %v6689_v61  ;;  %v6035_v13 = vld [vmem:[#allocation4 + $0x4d8] ss:$28 sps:$4 sm:$0xff]   ;;  %v6040_v34 = vld [vmem:[#allocation4 + $0x124] ss:$28 sps:$4 sm:$0xff]   ;;  %v6049_v41 = vld [vmem:[#allocation4 + $0x46c] ss:$28 sps:$4 sm:$0xff]  }
 0x198   :  { %4334 = vmatprep.subr.bf16.mxu1 %v6013_v26  ;;  %v1258_v55 = vmul.f32 %v1210_v45, %v6771_v53  ;;  %v1273_v56 = vrot.slane %v1257_v48, 7  ;;  %v1236_v62 = vrot.slane %v1210_v45, %v6689_v61  ;;  %v6017_v53 = vld [vmem:[#allocation4 + $0xc78] ss:$28 sps:$4 sm:$0xff]   ;;  %v1249_v15 = vmul.f32 %v1232_v58, %v6741_v63  ;;  %v6038_v38 = vld [vmem:[#allocation4 + $0x120] ss:$28 sps:$4 sm:$0xff]  }
 0x199   :  { %v1260_v59 = vmul.f32 %v1212_v49, %v6775_v42  ;;  %v1275_v60 = vrot.slane %v1259_v52, 7  ;;  %v1244_v32 = vrot.slane %v1212_v49, %v6689_v61  ;;  %v6025_v42 = vld [vmem:[#allocation4 + $0xc44] ss:$28 sps:$4 sm:$0xff]   ;;  %v1251_v61 = vmul.f32 %v1240_v27, %v6743_v3  ;;  %v6028_v63 = vld [vmem:[#allocation4 + $0x194] ss:$28 sps:$4 sm:$0xff]  }
 0x19a   :  { %4294 = vmatpush2.bf16.msra.mxu0 %v6008_v46  ;;  %v1274_v1 = vrot.slane %v1258_v55, 7  ;;  %v1289_v2 = vsub.f32 %v6724_v40, %v1273_v56  ;;  %v1250_v19 = vmul.f32 %v1236_v62, %v6748_v17  ;;  %v6041_v26 = vld [vmem:[#allocation4 + $0x4a0] ss:$28 sps:$4 sm:$0xff]   ;;  %v6044_v43 = vld [vmem:[#allocation4 + $0xe8] ss:$28 sps:$4 sm:$0xff]  }
 0x19b   :  { %v1276_v4 = vrot.slane %v1260_v59, 7  ;;  %4335 = vmatpush2.bf16.msra.mxu1 %v6011_v50  ;;  %4295 = vmatprep.subr.bf16.mxu0 %v6016_v51  ;;  %v1291_v11 = vsub.f32 %v6727_v57, %v1275_v60  ;;  %v1252_v21 = vmul.f32 %v1244_v32, %v6753_v22  ;;  %v6029_v22 = vld [vmem:[#allocation4 + $0x510] ss:$28 sps:$4 sm:$0xff]   ;;  %v6047_v45 = vld [vmem:[#allocation4 + $0x468] ss:$28 sps:$4 sm:$0xff]  }
 0x19c   :  { %4336 = vmatprep.subr.bf16.mxu1 %v6019_v54  ;;  %v1290_v7 = vsub.f32 %v6729_v44, %v1274_v1  ;;  %v1312_v8 = vrot.slane %v1289_v2, %v6695_v5  ;;  %v6052_v46 = vld [vmem:[#allocation4 + $0xb4] ss:$28 sps:$4 sm:$0xff]   ;;  %v6058_v51 = vld [vmem:[#allocation4 + $0x7c] ss:$28 sps:$4 sm:$0xff]   ;;  %v6064_v56 = vld [vmem:[#allocation4 + $0x44] ss:$28 sps:$4 sm:$0xff]  }
 0x19d   :  { %v1292_v18 = vsub.f32 %v6733_v47, %v1276_v4  ;;  %v1320_v40 = vrot.slane %v1291_v11, %v6695_v5  ;;  %v6055_v48 = vld [vmem:[#allocation4 + $0x434] ss:$28 sps:$4 sm:$0xff]   ;;  %v6061_v52 = vld [vmem:[#allocation4 + $0x3fc] ss:$28 sps:$4 sm:$0xff]   ;;  %v6067_v58 = vld [vmem:[#allocation4 + $0x3c4] ss:$28 sps:$4 sm:$0xff]  }
 0x19e   :  { %4296 = vmatpush2.bf16.msra.mxu0 %v6014_v0  ;;  %v1316_v57 = vrot.slane %v1290_v7, %v6695_v5  ;;  %v1329_v23 = vadd.f32 %v1312_v8, %v1249_v15  ;;  %v6050_v49 = vld [vmem:[#allocation4 + $0xb0] ss:$28 sps:$4 sm:$0xff]   ;;  %v6056_v54 = vld [vmem:[#allocation4 + $0x78] ss:$28 sps:$4 sm:$0xff]   ;;  %v6062_v59 = vld [vmem:[#allocation4 + $0x40] ss:$28 sps:$4 sm:$0xff]  }
 0x19f   :  { %v1324_v44 = vrot.slane %v1292_v18, %v6695_v5  ;;  %4337 = vmatpush2.bf16.msra.mxu1 %v6017_v53  ;;  %4297 = vmatprep.subr.bf16.mxu0 %v6022_v6  ;;  %v1331_v25 = vadd.f32 %v1320_v40, %v1251_v61  ;;  %v6053_v50 = vld [vmem:[#allocation4 + $0x430] ss:$28 sps:$4 sm:$0xff]   ;;  %v6059_v55 = vld [vmem:[#allocation4 + $0x3f8] ss:$28 sps:$4 sm:$0xff]   ;;  %v6065_v60 = vld [vmem:[#allocation4 + $0x3c0] ss:$28 sps:$4 sm:$0xff]  }
 0x1a0   :  { %4338 = vmatprep.subr.bf16.mxu1 %v6025_v42  ;;  %v1330_v47 = vadd.f32 %v1316_v57, %v1250_v19  ;;  %v6809_v5 = vpack.c.bf16 %v1329_v23, %v1329_v23  ;;  %v6070_v27 = vld [vmem:[#allocation4 + $0xc] ss:$28 sps:$4 sm:$0xff]   ;;  %v6076_v2 = vld [vmem:[#allocation4 + $0x354] ss:$28 sps:$4 sm:$0xff]   ;;  %v6082_v6 = vld [vmem:[#allocation4 + $0x31c] ss:$28 sps:$4 sm:$0xff]  }
 0x1a1   :  { %v1332_v3 = vadd.f32 %v1324_v44, %v1252_v21  ;;  %v6812_v30 = vpack.c.bf16 %v1331_v25, %v1331_v25  ;;  %v6073_v62 = vld [vmem:[#allocation4 + $0x38c] ss:$28 sps:$4 sm:$0xff]   ;;  %v6079_v32 = vld [vmem:[#allocation4 + $0x6d4] ss:$28 sps:$4 sm:$0xff]   ;;  %v6085_v11 = vld [vmem:[#allocation4 + $0x69c] ss:$28 sps:$4 sm:$0xff]  }
 0x1a2   :  { %4298 = vmatpush2.bf16.msra.mxu0 %v6020_v20  ;;  %v6805_v17 = vpack.c.bf16 %v1330_v47, %v1330_v47  ;;  %v6068_v0 = vld [vmem:[#allocation4 + $0x8] ss:$28 sps:$4 sm:$0xff]   ;;  %v6074_v4 = vld [vmem:[#allocation4 + $0x350] ss:$28 sps:$4 sm:$0xff]   ;;  %v6080_v42 = vld [vmem:[#allocation4 + $0x318] ss:$28 sps:$4 sm:$0xff]  }
 0x1a3   :  { %4339 = vmatpush2.bf16.msra.mxu1 %v6023_v14  ;;  %v6807_v29 = vpack.c.bf16 %v1332_v3, %v1332_v3  ;;  %4349 = vmatprep.subr.bf16.mxu0 %v6028_v63  ;;  %v6071_v1 = vld [vmem:[#allocation4 + $0x388] ss:$28 sps:$4 sm:$0xff]   ;;  %v6077_v53 = vld [vmem:[#allocation4 + $0x6d0] ss:$28 sps:$4 sm:$0xff]   ;;  %v6083_v7 = vld [vmem:[#allocation4 + $0x698] ss:$28 sps:$4 sm:$0xff]  }
 0x1a4   :  { %4299 = vmatprep.mubr.bf16.mxu0 %v6805_v17  ;;  %4390 = vmatprep.subr.bf16.mxu1 %v6031_v24  ;;  %v6088_v8 = vld [vmem:[#allocation4 + $0x2e4] ss:$28 sps:$4 sm:$0xff]   ;;  %v6094_v61 = vld [vmem:[#allocation4 + $0x2ac] ss:$28 sps:$4 sm:$0xff]   ;;  %v6100_v21 = vld [vmem:[#allocation4 + $0x274] ss:$28 sps:$4 sm:$0xff]  }
 0x1a5   :  { %4340 = vmatprep.mubr.bf16.mxu1 %v6807_v29  ;;  %4300 = vmatmul.mubr.bf16.vlgmr.msra.gmra.mxu0 %v6809_v5  ;;  %v6091_v15 = vld [vmem:[#allocation4 + $0x664] ss:$28 sps:$4 sm:$0xff]   ;;  %v6097_v19 = vld [vmem:[#allocation4 + $0x62c] ss:$28 sps:$4 sm:$0xff]   ;;  %v6103_v44 = vld [vmem:[#allocation4 + $0x5f4] ss:$28 sps:$4 sm:$0xff]  }
 0x1a6   :  { %4341 = vmatmul.mubr.bf16.vlgmr.msra.gmra.mxu1 %v6812_v30  ;;  %4350 = vmatpush1.bf16.msra.mxu0 %v6026_v28  ;;  %v6086_v18 = vld [vmem:[#allocation4 + $0x2e0] ss:$28 sps:$4 sm:$0xff]   ;;  %v6092_v20 = vld [vmem:[#allocation4 + $0x2a8] ss:$28 sps:$4 sm:$0xff]   ;;  %v6098_v14 = vld [vmem:[#allocation4 + $0x270] ss:$28 sps:$4 sm:$0xff]  }
 0x1a7   :  { %4391 = vmatpush1.bf16.msra.mxu1 %v6029_v22  ;;  %4381 = vmatprep.mubr.bf16.mxu0 %v6713_v37  ;;  %v6089_v40 = vld [vmem:[#allocation4 + $0x660] ss:$28 sps:$4 sm:$0xff]   ;;  %v6095_v57 = vld [vmem:[#allocation4 + $0x628] ss:$28 sps:$4 sm:$0xff]   ;;  %v6101_v63 = vld [vmem:[#allocation4 + $0x5f0] ss:$28 sps:$4 sm:$0xff]  }
 0x1a8   :  { %4422 = vmatprep.mubr.bf16.mxu1 %v6715_v16  ;;  %4351 = vmatprep.subr.bf16.mxu0 %v6034_v10  ;;  %v6106_v23 = vld [vmem:[#allocation4 + $0x23c] ss:$28 sps:$4 sm:$0xff]   ;;  %v6112_v3 = vld [vmem:[#allocation4 + $0x204] ss:$28 sps:$4 sm:$0xff]  }
 0x1a9   :  { %4392 = vmatprep.subr.bf16.mxu1 %v6037_v12  ;;  %v6109_v47 = vld [vmem:[#allocation4 + $0x5bc] ss:$28 sps:$4 sm:$0xff]   ;;  %v6115_v28 = vld [vmem:[#allocation4 + $0x584] ss:$28 sps:$4 sm:$0xff]   ;;  %v6118_v12 = vld [vmem:[#allocation4 + $0x1cc] ss:$28 sps:$4 sm:$0xff]  }
 0x1aa   :  { %4352 = vmatpush1.bf16.msra.mxu0 %v6032_v33  ;;  %v6104_v24 = vld [vmem:[#allocation4 + $0x238] ss:$28 sps:$4 sm:$0xff]   ;;  %v6110_v22 = vld [vmem:[#allocation4 + $0x200] ss:$28 sps:$4 sm:$0xff]   ;;  %v6121_v33 = vld [vmem:[#allocation4 + $0x54c] ss:$28 sps:$4 sm:$0xff]  }
 0x1ab   :  { %4393 = vmatpush1.bf16.msra.mxu1 %v6035_v13  ;;  %4353 = vmatprep.subr.bf16.mxu0 %v6040_v34  ;;  %v6107_v25 = vld [vmem:[#allocation4 + $0x5b8] ss:$28 sps:$4 sm:$0xff]   ;;  %v6113_v10 = vld [vmem:[#allocation4 + $0x580] ss:$28 sps:$4 sm:$0xff]   ;;  %v6116_v13 = vld [vmem:[#allocation4 + $0x1c8] ss:$28 sps:$4 sm:$0xff]  }
 0x1ac   :  { %4394 = vmatprep.subr.bf16.mxu1 %v6043_v36  ;;  %v6119_v34 = vld [vmem:[#allocation4 + $0x548] ss:$28 sps:$4 sm:$0xff]   ;;  %v6124_v36 = vld [vmem:[#allocation4 + $0x894] ss:$28 sps:$4 sm:$0xff]  }
 0x1ae   :  { %4354 = vmatpush1.bf16.msra.mxu0 %v6038_v38  ;;  %v6127_v38 = vld [vmem:[#allocation4 + $0xc14] ss:$28 sps:$4 sm:$0xff]  }
 0x1af   :  { %4395 = vmatpush1.bf16.msra.mxu1 %v6041_v26  ;;  %4355 = vmatprep.subr.bf16.mxu0 %v6046_v35  ;;  %v6122_v26 = vld [vmem:[#allocation4 + $0x890] ss:$28 sps:$4 sm:$0xff]  }
 0x1b0   :  { %4396 = vmatprep.subr.bf16.mxu1 %v6049_v41  ;;  %v6125_v35 = vld [vmem:[#allocation4 + $0xc10] ss:$28 sps:$4 sm:$0xff]   ;;  %v6130_v41 = vld [vmem:[#allocation4 + $0x85c] ss:$28 sps:$4 sm:$0xff]  }
 0x1b2   :  { %4356 = vmatpush1.bf16.msra.mxu0 %v6044_v43  ;;  %v6133_v43 = vld [vmem:[#allocation4 + $0xbdc] ss:$28 sps:$4 sm:$0xff]  }
 0x1b3   :  { %4397 = vmatpush1.bf16.msra.mxu1 %v6047_v45  ;;  %4357 = vmatprep.subr.bf16.mxu0 %v6052_v46  ;;  %v6128_v45 = vld [vmem:[#allocation4 + $0x858] ss:$28 sps:$4 sm:$0xff]  }
 0x1b4   :  { %4398 = vmatprep.subr.bf16.mxu1 %v6055_v48  ;;  %v6131_v46 = vld [vmem:[#allocation4 + $0xbd8] ss:$28 sps:$4 sm:$0xff]   ;;  %v6136_v48 = vld [vmem:[#allocation4 + $0x824] ss:$28 sps:$4 sm:$0xff]  }
 0x1b6   :  { %4358 = vmatpush1.bf16.msra.mxu0 %v6050_v49  ;;  %v6139_v49 = vld [vmem:[#allocation4 + $0xba4] ss:$28 sps:$4 sm:$0xff]  }
 0x1b7   :  { %4399 = vmatpush1.bf16.msra.mxu1 %v6053_v50  ;;  %4359 = vmatprep.subr.bf16.mxu0 %v6058_v51  ;;  %v6134_v50 = vld [vmem:[#allocation4 + $0x820] ss:$28 sps:$4 sm:$0xff]  }
 0x1b8   :  { %4400 = vmatprep.subr.bf16.mxu1 %v6061_v52  ;;  %v6137_v51 = vld [vmem:[#allocation4 + $0xba0] ss:$28 sps:$4 sm:$0xff]   ;;  %v6142_v52 = vld [vmem:[#allocation4 + $0x7ec] ss:$28 sps:$4 sm:$0xff]  }
 0x1ba   :  { %4360 = vmatpush1.bf16.msra.mxu0 %v6056_v54  ;;  %v6145_v54 = vld [vmem:[#allocation4 + $0xb6c] ss:$28 sps:$4 sm:$0xff]  }
 0x1bb   :  { %4401 = vmatpush1.bf16.msra.mxu1 %v6059_v55  ;;  %4361 = vmatprep.subr.bf16.mxu0 %v6064_v56  ;;  %v6140_v55 = vld [vmem:[#allocation4 + $0x7e8] ss:$28 sps:$4 sm:$0xff]  }
 0x1bc   :  { %4402 = vmatprep.subr.bf16.mxu1 %v6067_v58  ;;  %v6143_v56 = vld [vmem:[#allocation4 + $0xb68] ss:$28 sps:$4 sm:$0xff]   ;;  %v6148_v58 = vld [vmem:[#allocation4 + $0x7b4] ss:$28 sps:$4 sm:$0xff]  }
 0x1be   :  { %4362 = vmatpush1.bf16.msra.mxu0 %v6062_v59  ;;  %v6151_v59 = vld [vmem:[#allocation4 + $0xb34] ss:$28 sps:$4 sm:$0xff]  }
 0x1bf   :  { %4403 = vmatpush1.bf16.msra.mxu1 %v6065_v60  ;;  %4363 = vmatprep.subr.bf16.mxu0 %v6070_v27  ;;  %v6146_v60 = vld [vmem:[#allocation4 + $0x7b0] ss:$28 sps:$4 sm:$0xff]  }
 0x1c0   :  { %4404 = vmatprep.subr.bf16.mxu1 %v6073_v62  ;;  %v6149_v27 = vld [vmem:[#allocation4 + $0xb30] ss:$28 sps:$4 sm:$0xff]   ;;  %v6154_v62 = vld [vmem:[#allocation4 + $0x77c] ss:$28 sps:$4 sm:$0xff]  }
 0x1c2   :  { %4364 = vmatpush1.bf16.msra.mxu0 %v6068_v0  ;;  %v6157_v0 = vld [vmem:[#allocation4 + $0xafc] ss:$28 sps:$4 sm:$0xff]  }
 0x1c3   :  { %4405 = vmatpush1.bf16.msra.mxu1 %v6071_v1  ;;  %4365 = vmatprep.subr.bf16.mxu0 %v6076_v2  ;;  %v6152_v1 = vld [vmem:[#allocation4 + $0x778] ss:$28 sps:$4 sm:$0xff]  }
 0x1c4   :  { %4406 = vmatprep.subr.bf16.mxu1 %v6079_v32  ;;  %v6155_v2 = vld [vmem:[#allocation4 + $0xaf8] ss:$28 sps:$4 sm:$0xff]   ;;  %v6160_v32 = vld [vmem:[#allocation4 + $0x744] ss:$28 sps:$4 sm:$0xff]  }
 0x1c6   :  { %4366 = vmatpush2.bf16.msra.mxu0 %v6074_v4  ;;  %v6163_v4 = vld [vmem:[#allocation4 + $0xac4] ss:$28 sps:$4 sm:$0xff]  }
 0x1c7   :  { %4407 = vmatpush2.bf16.msra.mxu1 %v6077_v53  ;;  %4367 = vmatprep.subr.bf16.mxu0 %v6082_v6  ;;  %v6158_v53 = vld [vmem:[#allocation4 + $0x740] ss:$28 sps:$4 sm:$0xff]  }
 0x1c8   :  { %4408 = vmatprep.subr.bf16.mxu1 %v6085_v11  ;;  %v6161_v6 = vld [vmem:[#allocation4 + $0xac0] ss:$28 sps:$4 sm:$0xff]   ;;  %v6166_v11 = vld [vmem:[#allocation4 + $0x70c] ss:$28 sps:$4 sm:$0xff]  }
 0x1ca   :  { %4368 = vmatpush2.bf16.msra.mxu0 %v6080_v42  ;;  %v6169_v42 = vld [vmem:[#allocation4 + $0xa8c] ss:$28 sps:$4 sm:$0xff]  }
 0x1cb   :  { %4409 = vmatpush2.bf16.msra.mxu1 %v6083_v7  ;;  %4369 = vmatprep.subr.bf16.mxu0 %v6088_v8  ;;  %v6164_v7 = vld [vmem:[#allocation4 + $0x708] ss:$28 sps:$4 sm:$0xff]  }
 0x1cc   :  { %4410 = vmatprep.subr.bf16.mxu1 %v6091_v15  ;;  %v6167_v8 = vld [vmem:[#allocation4 + $0xa88] ss:$28 sps:$4 sm:$0xff]   ;;  %v6172_v15 = vld [vmem:[#allocation4 + $0xa54] ss:$28 sps:$4 sm:$0xff]  }
 0x1ce   :  { %4370 = vmatpush2.bf16.msra.mxu0 %v6086_v18  ;;  %v6175_v18 = vld [vmem:[#allocation4 + $0xdd4] ss:$28 sps:$4 sm:$0xff]  }
 0x1cf   :  { %4411 = vmatpush2.bf16.msra.mxu1 %v6089_v40  ;;  %4371 = vmatprep.subr.bf16.mxu0 %v6094_v61  ;;  %v6170_v40 = vld [vmem:[#allocation4 + $0xa50] ss:$28 sps:$4 sm:$0xff]  }
 0x1d0   :  { %4412 = vmatprep.subr.bf16.mxu1 %v6097_v19  ;;  %v6173_v61 = vld [vmem:[#allocation4 + $0xdd0] ss:$28 sps:$4 sm:$0xff]   ;;  %v6178_v19 = vld [vmem:[#allocation4 + $0xa1c] ss:$28 sps:$4 sm:$0xff]  }
 0x1d2   :  { %4372 = vmatpush2.bf16.msra.mxu0 %v6092_v20  ;;  %v6181_v20 = vld [vmem:[#allocation4 + $0xd9c] ss:$28 sps:$4 sm:$0xff]  }
 0x1d3   :  { %4413 = vmatpush2.bf16.msra.mxu1 %v6095_v57  ;;  %4373 = vmatprep.subr.bf16.mxu0 %v6100_v21  ;;  %v6176_v57 = vld [vmem:[#allocation4 + $0xa18] ss:$28 sps:$4 sm:$0xff]  }
 0x1d4   :  { %4414 = vmatprep.subr.bf16.mxu1 %v6103_v44  ;;  %v6179_v21 = vld [vmem:[#allocation4 + $0xd98] ss:$28 sps:$4 sm:$0xff]   ;;  %v6184_v44 = vld [vmem:[#allocation4 + $0x9e4] ss:$28 sps:$4 sm:$0xff]  }
 0x1d6   :  { %4374 = vmatpush2.bf16.msra.mxu0 %v6098_v14  ;;  %v6187_v14 = vld [vmem:[#allocation4 + $0xd64] ss:$28 sps:$4 sm:$0xff]  }
 0x1d7   :  { %4415 = vmatpush2.bf16.msra.mxu1 %v6101_v63  ;;  %4375 = vmatprep.subr.bf16.mxu0 %v6106_v23  ;;  %v6182_v63 = vld [vmem:[#allocation4 + $0x9e0] ss:$28 sps:$4 sm:$0xff]  }
 0x1d8   :  { %4416 = vmatprep.subr.bf16.mxu1 %v6109_v47  ;;  %v6185_v23 = vld [vmem:[#allocation4 + $0xd60] ss:$28 sps:$4 sm:$0xff]   ;;  %v6190_v47 = vld [vmem:[#allocation4 + $0x9ac] ss:$28 sps:$4 sm:$0xff]  }
 0x1da   :  { %4376 = vmatpush2.bf16.msra.mxu0 %v6104_v24  ;;  %v6193_v24 = vld [vmem:[#allocation4 + $0xd2c] ss:$28 sps:$4 sm:$0xff]  }
 0x1db   :  { %4417 = vmatpush2.bf16.msra.mxu1 %v6107_v25  ;;  %4377 = vmatprep.subr.bf16.mxu0 %v6112_v3  ;;  %v6188_v25 = vld [vmem:[#allocation4 + $0x9a8] ss:$28 sps:$4 sm:$0xff]  }
 0x1dc   :  { %4418 = vmatprep.subr.bf16.mxu1 %v6115_v28  ;;  %v6191_v3 = vld [vmem:[#allocation4 + $0xd28] ss:$28 sps:$4 sm:$0xff]   ;;  %v6196_v28 = vld [vmem:[#allocation4 + $0x974] ss:$28 sps:$4 sm:$0xff]  }
 0x1de   :  { %4378 = vmatpush2.bf16.msra.mxu0 %v6110_v22  ;;  %v6199_v22 = vld [vmem:[#allocation4 + $0xcf4] ss:$28 sps:$4 sm:$0xff]  }
 0x1df   :  { %4419 = vmatpush2.bf16.msra.mxu1 %v6113_v10  ;;  %4379 = vmatprep.subr.bf16.mxu0 %v6118_v12  ;;  %v6194_v10 = vld [vmem:[#allocation4 + $0x970] ss:$28 sps:$4 sm:$0xff]  }
 0x1e0   :  { %4420 = vmatprep.subr.bf16.mxu1 %v6121_v33  ;;  %v6197_v12 = vld [vmem:[#allocation4 + $0xcf0] ss:$28 sps:$4 sm:$0xff]   ;;  %v6202_v33 = vld [vmem:[#allocation4 + $0x93c] ss:$28 sps:$4 sm:$0xff]  }
 0x1e2   :  { %4380 = vmatpush2.bf16.msra.mxu0 %v6116_v13  ;;  %v6205_v13 = vld [vmem:[#allocation4 + $0xcbc] ss:$28 sps:$4 sm:$0xff]  }
 0x1e3   :  { %4421 = vmatpush2.bf16.msra.mxu1 %v6119_v34  ;;  %4431 = vmatprep.subr.bf16.mxu0 %v6124_v36  ;;  %v6200_v34 = vld [vmem:[#allocation4 + $0x938] ss:$28 sps:$4 sm:$0xff]  }
 0x1e4   :  { %4472 = vmatprep.subr.bf16.mxu1 %v6127_v38  ;;  %v6203_v36 = vld [vmem:[#allocation4 + $0xcb8] ss:$28 sps:$4 sm:$0xff]   ;;  %v6208_v38 = vld [vmem:[#allocation4 + $0x904] ss:$28 sps:$4 sm:$0xff]  }
 0x1e5   :  { %4382 = vmatmul.mubr.bf16.vlgmr.msra.gmra.mxu0 %v6717_v39 }
 0x1e6   :  { %4423 = vmatmul.mubr.bf16.vlgmr.msra.gmra.mxu1 %v6720_v31  ;;  %4432 = vmatpush1.bf16.msra.mxu0 %v6122_v26  ;;  %v6211_v26 = vld [vmem:[#allocation4 + $0xc84] ss:$28 sps:$4 sm:$0xff]  }
 0x1e7   :  { %4463 = vmatprep.mubr.bf16.mxu0 %v6805_v17  ;;  %4473 = vmatpush1.bf16.msra.mxu1 %v6125_v35  ;;  %v6206_v35 = vld [vmem:[#allocation4 + $0x900] ss:$28 sps:$4 sm:$0xff]  }
 0x1e8   :  { %4504 = vmatprep.mubr.bf16.mxu1 %v6807_v29  ;;  %4433 = vmatprep.subr.bf16.mxu0 %v6130_v41  ;;  %v6209_v41 = vld [vmem:[#allocation4 + $0xc80] ss:$28 sps:$4 sm:$0xff]  }
 0x1e9   :  { %4474 = vmatprep.subr.bf16.mxu1 %v6133_v43  ;;  %v6214_v43 = vld [vmem:[#allocation4 + $0x8cc] ss:$28 sps:$4 sm:$0xff]  }
 0x1ea   :  { %4434 = vmatpush1.bf16.msra.mxu0 %v6128_v45  ;;  %v6217_v45 = vld [vmem:[#allocation4 + $0xc4c] ss:$28 sps:$4 sm:$0xff]  }
 0x1eb   :  { %4475 = vmatpush1.bf16.msra.mxu1 %v6131_v46  ;;  %4435 = vmatprep.subr.bf16.mxu0 %v6136_v48  ;;  %v6212_v46 = vld [vmem:[#allocation4 + $0x8c8] ss:$28 sps:$4 sm:$0xff]   ;;  %v6824_v48 = vsub.s32 3, %v6642_v9 }
 0x1ec   :  { %4476 = vmatprep.subr.bf16.mxu1 %v6139_v49  ;;  %v6215_v49 = vld [vmem:[#allocation4 + $0xc48] ss:$28 sps:$4 sm:$0xff]  }
 0x1ee   :  { %4436 = vmatpush1.bf16.msra.mxu0 %v6134_v50  ;;  %v6220_v50 = vld [vmem:[#allocation4 + $0x19c] ss:$28 sps:$4 sm:$0xff]  }
 0x1ef   :  { %4477 = vmatpush1.bf16.msra.mxu1 %v6137_v51  ;;  %4437 = vmatprep.subr.bf16.mxu0 %v6142_v52  ;;  %v6223_v51 = vld [vmem:[#allocation4 + $0x51c] ss:$28 sps:$4 sm:$0xff]  }
 0x1f0   :  { %4478 = vmatprep.subr.bf16.mxu1 %v6145_v54  ;;  %v6218_v52 = vld [vmem:[#allocation4 + $0x198] ss:$28 sps:$4 sm:$0xff]   ;;  %v6826_v54 = vld [vmem:[#allocation6] sm:$0xff] }
 0x1f2   :  { %4438 = vmatpush1.bf16.msra.mxu0 %v6140_v55  ;;  %v1856_v55 = vrot.slane %v6826_v54, %v6824_v48 }
 0x1f3   :  { %4479 = vmatpush1.bf16.msra.mxu1 %v6143_v56  ;;  %4439 = vmatprep.subr.bf16.mxu0 %v6148_v58  ;;  %v6221_v56 = vld [vmem:[#allocation4 + $0x518] ss:$28 sps:$4 sm:$0xff]   ;;  %v6830_v58 = vld [vmem:[#allocation6 + $0x8] sm:$0xff] }
 0x1f4   :  { %4480 = vmatprep.subr.bf16.mxu1 %v6151_v59  ;;  %v1860_v59 = vrot.slane %v6830_v58, %v6824_v48 }
 0x1f6   :  { %4440 = vmatpush1.bf16.msra.mxu0 %v6146_v60  ;;  %v6226_v60 = vld [vmem:[#allocation4 + $0x164] ss:$28 sps:$4 sm:$0xff]  }
 0x1f7   :  { %4481 = vmatpush1.bf16.msra.mxu1 %v6149_v27  ;;  %4441 = vmatprep.subr.bf16.mxu0 %v6154_v62  ;;  %v6229_v62 = vld [vmem:[#allocation4 + $0x4e4] ss:$28 sps:$4 sm:$0xff]  }
 0x1f8   :  { %4482 = vmatprep.subr.bf16.mxu1 %v6157_v0 }
 0x1fa   :  { %4442 = vmatpush1.bf16.msra.mxu0 %v6152_v1 }
 0x1fb   :  { %4483 = vmatpush1.bf16.msra.mxu1 %v6155_v2  ;;  %4443 = vmatprep.subr.bf16.mxu0 %v6160_v32  ;;  %v6224_v2 = vld [vmem:[#allocation4 + $0x160] ss:$28 sps:$4 sm:$0xff]  }
 0x1fc   :  { %4484 = vmatprep.subr.bf16.mxu1 %v6163_v4  ;;  %v6227_v4 = vld [vmem:[#allocation4 + $0x4e0] ss:$28 sps:$4 sm:$0xff]  }
 0x1fe   :  { %4444 = vmatpush1.bf16.msra.mxu0 %v6158_v53  ;;  %v6232_v53 = vld [vmem:[#allocation4 + $0x12c] ss:$28 sps:$4 sm:$0xff]  }
 0x1ff   :  { %4485 = vmatpush1.bf16.msra.mxu1 %v6161_v6  ;;  %4445 = vmatprep.subr.bf16.mxu0 %v6166_v11 }
 0x200   :  { %4486 = vmatprep.subr.bf16.mxu1 %v6169_v42 }
 0x202   :  { %4446 = vmatpush1.bf16.msra.mxu0 %v6164_v7  ;;  %v6235_v7 = vld [vmem:[#allocation4 + $0x4ac] ss:$28 sps:$4 sm:$0xff]  }
 0x203   :  { %4487 = vmatpush1.bf16.msra.mxu1 %v6167_v8  ;;  %4447 = vmatprep.subr.bf16.mxu0 %v6172_v15 }
 0x204   :  { %4488 = vmatprep.subr.bf16.mxu1 %v6175_v18 }
 0x206   :  { %4448 = vmatpush2.bf16.msra.mxu0 %v6170_v40  ;;  %v6230_v40 = vld [vmem:[#allocation4 + $0x128] ss:$28 sps:$4 sm:$0xff]  }
 0x207   :  { %4489 = vmatpush2.bf16.msra.mxu1 %v6173_v61  ;;  %4449 = vmatprep.subr.bf16.mxu0 %v6178_v19  ;;  %v6233_v19 = vld [vmem:[#allocation4 + $0x4a8] ss:$28 sps:$4 sm:$0xff]  }
 0x208   :  { %4490 = vmatprep.subr.bf16.mxu1 %v6181_v20  ;;  %v6238_v20 = vld [vmem:[#allocation4 + $0xf4] ss:$28 sps:$4 sm:$0xff]  }
 0x20a   :  { %4450 = vmatpush2.bf16.msra.mxu0 %v6176_v57 }
 0x20b   :  { %4491 = vmatpush2.bf16.msra.mxu1 %v6179_v21  ;;  %4451 = vmatprep.subr.bf16.mxu0 %v6184_v44  ;;  %v6241_v21 = vld [vmem:[#allocation4 + $0x474] ss:$28 sps:$4 sm:$0xff]  }
 0x20c   :  { %4492 = vmatprep.subr.bf16.mxu1 %v6187_v14  ;;  %v6236_v44 = vld [vmem:[#allocation4 + $0xf0] ss:$28 sps:$4 sm:$0xff]  }
 0x20d   :  { %v6239_v14 = vld [vmem:[#allocation4 + $0x470] ss:$28 sps:$4 sm:$0xff]  }
 0x20e   :  { %4452 = vmatpush2.bf16.msra.mxu0 %v6182_v63  ;;  %v6244_v63 = vld [vmem:[#allocation4 + $0xbc] ss:$28 sps:$4 sm:$0xff]  }
 0x20f   :  { %4493 = vmatpush2.bf16.msra.mxu1 %v6185_v23  ;;  %4453 = vmatprep.subr.bf16.mxu0 %v6190_v47  ;;  %v6247_v23 = vld [vmem:[#allocation4 + $0x43c] ss:$28 sps:$4 sm:$0xff]  }
 0x210   :  { %4494 = vmatprep.subr.bf16.mxu1 %v6193_v24  ;;  %v6242_v47 = vld [vmem:[#allocation4 + $0xb8] ss:$28 sps:$4 sm:$0xff]  }
 0x211   :  { %v6245_v24 = vld [vmem:[#allocation4 + $0x438] ss:$28 sps:$4 sm:$0xff]  }
 0x212   :  { %4454 = vmatpush2.bf16.msra.mxu0 %v6188_v25  ;;  %v6250_v25 = vld [vmem:[#allocation4 + $0x84] ss:$28 sps:$4 sm:$0xff]  }
 0x213   :  { %4495 = vmatpush2.bf16.msra.mxu1 %v6191_v3  ;;  %4455 = vmatprep.subr.bf16.mxu0 %v6196_v28  ;;  %v6253_v3 = vld [vmem:[#allocation4 + $0x404] ss:$28 sps:$4 sm:$0xff]  }
 0x214   :  { %4496 = vmatprep.subr.bf16.mxu1 %v6199_v22  ;;  %v6248_v28 = vld [vmem:[#allocation4 + $0x80] ss:$28 sps:$4 sm:$0xff]  }
 0x215   :  { %v6251_v22 = vld [vmem:[#allocation4 + $0x400] ss:$28 sps:$4 sm:$0xff]  }
 0x216   :  { %4456 = vmatpush2.bf16.msra.mxu0 %v6194_v10  ;;  %v6256_v10 = vld [vmem:[#allocation4 + $0x4c] ss:$28 sps:$4 sm:$0xff]  }
 0x217   :  { %4497 = vmatpush2.bf16.msra.mxu1 %v6197_v12  ;;  %4457 = vmatprep.subr.bf16.mxu0 %v6202_v33  ;;  %v6259_v12 = vld [vmem:[#allocation4 + $0x3cc] ss:$28 sps:$4 sm:$0xff]  }
 0x218   :  { %4498 = vmatprep.subr.bf16.mxu1 %v6205_v13  ;;  %v6254_v33 = vld [vmem:[#allocation4 + $0x48] ss:$28 sps:$4 sm:$0xff]  }
 0x219   :  { %v6257_v13 = vld [vmem:[#allocation4 + $0x3c8] ss:$28 sps:$4 sm:$0xff]  }
 0x21a   :  { %4458 = vmatpush2.bf16.msra.mxu0 %v6200_v34  ;;  %v6262_v34 = vld [vmem:[#allocation4 + $0x14] ss:$28 sps:$4 sm:$0xff]  }
 0x21b   :  { %4499 = vmatpush2.bf16.msra.mxu1 %v6203_v36  ;;  %4459 = vmatprep.subr.bf16.mxu0 %v6208_v38  ;;  %v6265_v36 = vld [vmem:[#allocation4 + $0x394] ss:$28 sps:$4 sm:$0xff]  }
 0x21c   :  { %4500 = vmatprep.subr.bf16.mxu1 %v6211_v26  ;;  %v6260_v38 = vld [vmem:[#allocation4 + $0x10] ss:$28 sps:$4 sm:$0xff]  }
 0x21d   :  { %v6263_v26 = vld [vmem:[#allocation4 + $0x390] ss:$28 sps:$4 sm:$0xff]  }
 0x21e   :  { %4460 = vmatpush2.bf16.msra.mxu0 %v6206_v35  ;;  %v6268_v35 = vld [vmem:[#allocation4 + $0x35c] ss:$28 sps:$4 sm:$0xff]  }
 0x21f   :  { %4501 = vmatpush2.bf16.msra.mxu1 %v6209_v41  ;;  %4461 = vmatprep.subr.bf16.mxu0 %v6214_v43  ;;  %v6271_v41 = vld [vmem:[#allocation4 + $0x6dc] ss:$28 sps:$4 sm:$0xff]  }
 0x220   :  { %4502 = vmatprep.subr.bf16.mxu1 %v6217_v45  ;;  %v6266_v43 = vld [vmem:[#allocation4 + $0x358] ss:$28 sps:$4 sm:$0xff]  }
 0x221   :  { %v6269_v45 = vld [vmem:[#allocation4 + $0x6d8] ss:$28 sps:$4 sm:$0xff]  }
 0x222   :  { %4462 = vmatpush2.bf16.msra.mxu0 %v6212_v46  ;;  %v6274_v46 = vld [vmem:[#allocation4 + $0x324] ss:$28 sps:$4 sm:$0xff]  }
 0x223   :  { %4503 = vmatpush2.bf16.msra.mxu1 %v6215_v49  ;;  %4513 = vmatprep.subr.bf16.mxu0 %v6220_v50  ;;  %v6277_v49 = vld [vmem:[#allocation4 + $0x6a4] ss:$28 sps:$4 sm:$0xff]  }
 0x224   :  { %4554 = vmatprep.subr.bf16.mxu1 %v6223_v51  ;;  %v6272_v50 = vld [vmem:[#allocation4 + $0x320] ss:$28 sps:$4 sm:$0xff]  }
 0x225   :  { %4464 = vmatmul.mubr.bf16.vlgmr.msra.gmra.mxu0 %v6809_v5  ;;  %v4219_v27 = vpop.f32.mrf.mxu0  ;;  %v6275_v51 = vld [vmem:[#allocation4 + $0x6a0] ss:$28 sps:$4 sm:$0xff]  }
 0x226   :  { %4505 = vmatmul.mubr.bf16.vlgmr.msra.gmra.mxu1 %v6812_v30  ;;  %v4220_v0 = vadd.f32 %v4219_v27, %v1856_v55  ;;  %v4260_v1 = vpop.f32.mrf.mxu1  ;;  %4514 = vmatpush1.bf16.msra.mxu0 %v6218_v52  ;;  %v6280_v52 = vld [vmem:[#allocation4 + $0x2ec] ss:$28 sps:$4 sm:$0xff]   ;;  %v6289_v27 = vld [vmem:[#allocation4 + $0x634] ss:$28 sps:$4 sm:$0xff]  }
 0x227   :  { %4545 = vmatprep.mubr.bf16.mxu0 %v6713_v37  ;;  %4555 = vmatpush1.bf16.msra.mxu1 %v6221_v56  ;;  %v4221_v32 = vpop.f32.mrf.mxu0  ;;  %v6283_v55 = vld [vmem:[#allocation4 + $0x66c] ss:$28 sps:$4 sm:$0xff]  }
 0x228   :  { %v6837_v6 = vadd.f32 %v4260_v1, %v4220_v0  ;;  %4586 = vmatprep.mubr.bf16.mxu1 %v6715_v16  ;;  %v4222_v11 = vadd.f32 %v4221_v32, %v1860_v59  ;;  %v4262_v42 = vpop.f32.mrf.mxu1  ;;  %4515 = vmatprep.subr.bf16.mxu0 %v6226_v60  ;;  %v6278_v56 = vld [vmem:[#allocation4 + $0x2e8] ss:$28 sps:$4 sm:$0xff]   ;;  %v6286_v60 = vld [vmem:[#allocation4 + $0x2b4] ss:$28 sps:$4 sm:$0xff]   ;;  %v6292_v1 = vld [vmem:[#allocation4 + $0x27c] ss:$28 sps:$4 sm:$0xff]  }
 0x229   :  { %4556 = vmatprep.subr.bf16.mxu1 %v6229_v62  ;;  %v4223_v8 = vpop.f32.mrf.mxu0  ;;  %v6281_v59 = vld [vmem:[#allocation4 + $0x668] ss:$28 sps:$4 sm:$0xff]   ;;  %v6284_v62 = vld [vmem:[#allocation4 + $0x2b0] ss:$28 sps:$4 sm:$0xff]   ;;  %v6290_v32 = vld [vmem:[#allocation4 + $0x278] ss:$28 sps:$4 sm:$0xff]  }
 0x22a   :  { %v6840_v15 = vadd.f32 %v4262_v42, %v4222_v11  ;;  %v4264_v18 = vpop.f32.mrf.mxu1  ;;  %4516 = vmatpush1.bf16.msra.mxu0 %v6224_v2  ;;  %v6287_v0 = vld [vmem:[#allocation4 + $0x630] ss:$28 sps:$4 sm:$0xff]   ;;  %v6295_v2 = vld [vmem:[#allocation4 + $0x5fc] ss:$28 sps:$4 sm:$0xff]   ;;  %v6301_v11 = vld [vmem:[#allocation4 + $0x5c4] ss:$28 sps:$4 sm:$0xff]  }
 0x22b   :  { %4557 = vmatpush1.bf16.msra.mxu1 %v6227_v4  ;;  %v4224_v61 = vpop.f32.mrf.mxu0  ;;  %4517 = vmatprep.subr.bf16.mxu0 %v6232_v53  ;;  %v6293_v4 = vld [vmem:[#allocation4 + $0x5f8] ss:$28 sps:$4 sm:$0xff]   ;;  %v6298_v53 = vld [vmem:[#allocation4 + $0x244] ss:$28 sps:$4 sm:$0xff]   ;;  %v6304_v8 = vld [vmem:[#allocation4 + $0x20c] ss:$28 sps:$4 sm:$0xff]  }
 0x22c   :  { %v4265_v57 = vpop.f32.mrf.mxu1  ;;  %4558 = vmatprep.subr.bf16.mxu1 %v6235_v7  ;;  %v6296_v42 = vld [vmem:[#allocation4 + $0x240] ss:$28 sps:$4 sm:$0xff]   ;;  %v6307_v18 = vld [vmem:[#allocation4 + $0x58c] ss:$28 sps:$4 sm:$0xff]  }
 0x22d   :  { %v6299_v7 = vld [vmem:[#allocation4 + $0x5c0] ss:$28 sps:$4 sm:$0xff]   ;;  %v6305_v61 = vld [vmem:[#allocation4 + $0x588] ss:$28 sps:$4 sm:$0xff]   ;;  %v6308_v57 = vld [vmem:[#allocation4 + $0x1d0] ss:$28 sps:$4 sm:$0xff]  }
 0x22e   :  { %4518 = vmatpush1.bf16.msra.mxu0 %v6230_v40  ;;  %v6302_v40 = vld [vmem:[#allocation4 + $0x208] ss:$28 sps:$4 sm:$0xff]  }
 0x22f   :  { %4559 = vmatpush1.bf16.msra.mxu1 %v6233_v19  ;;  %4519 = vmatprep.subr.bf16.mxu0 %v6238_v20  ;;  %v6310_v19 = vld [vmem:[#allocation4 + $0x1d4] ss:$28 sps:$4 sm:$0xff]  }
 0x230   :  { %4560 = vmatprep.subr.bf16.mxu1 %v6241_v21  ;;  %v6313_v20 = vld [vmem:[#allocation4 + $0x554] ss:$28 sps:$4 sm:$0xff]  }
 0x231   :  { %v6311_v21 = vld [vmem:[#allocation4 + $0x550] ss:$28 sps:$4 sm:$0xff]  }
 0x232   :  { %4520 = vmatpush1.bf16.msra.mxu0 %v6236_v44  ;;  %v6316_v44 = vld [vmem:[#allocation4 + $0x89c] ss:$28 sps:$4 sm:$0xff]  }
 0x233   :  { %4561 = vmatpush1.bf16.msra.mxu1 %v6239_v14  ;;  %4521 = vmatprep.subr.bf16.mxu0 %v6244_v63  ;;  %v6319_v14 = vld [vmem:[#allocation4 + $0xc1c] ss:$28 sps:$4 sm:$0xff]  }
 0x234   :  { %4562 = vmatprep.subr.bf16.mxu1 %v6247_v23  ;;  %v6314_v63 = vld [vmem:[#allocation4 + $0x898] ss:$28 sps:$4 sm:$0xff]  }
 0x235   :  { %v6317_v23 = vld [vmem:[#allocation4 + $0xc18] ss:$28 sps:$4 sm:$0xff]  }
 0x236   :  { %4522 = vmatpush1.bf16.msra.mxu0 %v6242_v47  ;;  %v6322_v47 = vld [vmem:[#allocation4 + $0x864] ss:$28 sps:$4 sm:$0xff]  }
 0x237   :  { %4563 = vmatpush1.bf16.msra.mxu1 %v6245_v24  ;;  %4523 = vmatprep.subr.bf16.mxu0 %v6250_v25  ;;  %v6325_v25 = vld [vmem:[#allocation4 + $0xbe4] ss:$28 sps:$4 sm:$0xff]  }
 0x238   :  { %4564 = vmatprep.subr.bf16.mxu1 %v6253_v3 }
 0x23a   :  { %4524 = vmatpush1.bf16.msra.mxu0 %v6248_v28 }
 0x23b   :  { %4565 = vmatpush1.bf16.msra.mxu1 %v6251_v22  ;;  %4525 = vmatprep.subr.bf16.mxu0 %v6256_v10  ;;  %v6320_v22 = vld [vmem:[#allocation4 + $0x860] ss:$28 sps:$4 sm:$0xff]  }
 0x23c   :  { %4566 = vmatprep.subr.bf16.mxu1 %v6259_v12  ;;  %v6323_v12 = vld [vmem:[#allocation4 + $0xbe0] ss:$28 sps:$4 sm:$0xff]  }
 0x23e   :  { %4526 = vmatpush1.bf16.msra.mxu0 %v6254_v33  ;;  %v6328_v33 = vld [vmem:[#allocation4 + $0x82c] ss:$28 sps:$4 sm:$0xff]  }
 0x23f   :  { %4567 = vmatpush1.bf16.msra.mxu1 %v6257_v13  ;;  %4527 = vmatprep.subr.bf16.mxu0 %v6262_v34 }
 0x240   :  { %4568 = vmatprep.subr.bf16.mxu1 %v6265_v36 }
 0x242   :  { %4528 = vmatpush1.bf16.msra.mxu0 %v6260_v38  ;;  %v6331_v38 = vld [vmem:[#allocation4 + $0xbac] ss:$28 sps:$4 sm:$0xff]  }
 0x243   :  { %4569 = vmatpush1.bf16.msra.mxu1 %v6263_v26  ;;  %4529 = vmatprep.subr.bf16.mxu0 %v6268_v35 }
 0x244   :  { %4570 = vmatprep.subr.bf16.mxu1 %v6271_v41 }
 0x246   :  { %4530 = vmatpush2.bf16.msra.mxu0 %v6266_v43  ;;  %v6326_v43 = vld [vmem:[#allocation4 + $0x828] ss:$28 sps:$4 sm:$0xff]  }
 0x247   :  { %4571 = vmatpush2.bf16.msra.mxu1 %v6269_v45  ;;  %4531 = vmatprep.subr.bf16.mxu0 %v6274_v46  ;;  %v6329_v46 = vld [vmem:[#allocation4 + $0xba8] ss:$28 sps:$4 sm:$0xff]  }
 0x248   :  { %4572 = vmatprep.subr.bf16.mxu1 %v6277_v49  ;;  %v6334_v49 = vld [vmem:[#allocation4 + $0x7f4] ss:$28 sps:$4 sm:$0xff]  }
 0x24a   :  { %4532 = vmatpush2.bf16.msra.mxu0 %v6272_v50 }
 0x24b   :  { %4573 = vmatpush2.bf16.msra.mxu1 %v6275_v51  ;;  %4533 = vmatprep.subr.bf16.mxu0 %v6280_v52 }
 0x24c   :  { %4574 = vmatprep.subr.bf16.mxu1 %v6283_v55  ;;  %v6337_v55 = vld [vmem:[#allocation4 + $0xb74] ss:$28 sps:$4 sm:$0xff]  }
 0x24e   :  { %4534 = vmatpush2.bf16.msra.mxu0 %v6278_v56 }
 0x24f   :  { %4575 = vmatpush2.bf16.msra.mxu1 %v6281_v59  ;;  %4535 = vmatprep.subr.bf16.mxu0 %v6286_v60 }
 0x250   :  { %4576 = vmatprep.subr.bf16.mxu1 %v6289_v27 }
 0x252   :  { %4536 = vmatpush2.bf16.msra.mxu0 %v6284_v62  ;;  %v6332_v62 = vld [vmem:[#allocation4 + $0x7f0] ss:$28 sps:$4 sm:$0xff]  }
 0x253   :  { %4577 = vmatpush2.bf16.msra.mxu1 %v6287_v0  ;;  %4537 = vmatprep.subr.bf16.mxu0 %v6292_v1  ;;  %v6335_v0 = vld [vmem:[#allocation4 + $0xb70] ss:$28 sps:$4 sm:$0xff]   ;;  %v6340_v1 = vld [vmem:[#allocation4 + $0x7bc] ss:$28 sps:$4 sm:$0xff]  }
 0x254   :  { %4578 = vmatprep.subr.bf16.mxu1 %v6295_v2 }
 0x256   :  { %4538 = vmatpush2.bf16.msra.mxu0 %v6290_v32 }
 0x257   :  { %4579 = vmatpush2.bf16.msra.mxu1 %v6293_v4  ;;  %4539 = vmatprep.subr.bf16.mxu0 %v6298_v53 }
 0x258   :  { %4580 = vmatprep.subr.bf16.mxu1 %v6301_v11  ;;  %v6343_v11 = vld [vmem:[#allocation4 + $0xb3c] ss:$28 sps:$4 sm:$0xff]  }
 0x25a   :  { %4540 = vmatpush2.bf16.msra.mxu0 %v6296_v42 }
 0x25b   :  { %4581 = vmatpush2.bf16.msra.mxu1 %v6299_v7  ;;  %4541 = vmatprep.subr.bf16.mxu0 %v6304_v8 }
 0x25c   :  { %4582 = vmatprep.subr.bf16.mxu1 %v6307_v18 }
 0x25e   :  { %4542 = vmatpush2.bf16.msra.mxu0 %v6302_v40  ;;  %v6338_v40 = vld [vmem:[#allocation4 + $0x7b8] ss:$28 sps:$4 sm:$0xff]  }
 0x25f   :  { %4583 = vmatpush2.bf16.msra.mxu1 %v6305_v61  ;;  %4543 = vmatprep.subr.bf16.mxu0 %v6310_v19  ;;  %v6341_v61 = vld [vmem:[#allocation4 + $0xb38] ss:$28 sps:$4 sm:$0xff]   ;;  %v6346_v19 = vld [vmem:[#allocation4 + $0x784] ss:$28 sps:$4 sm:$0xff]  }
 0x260   :  { %4584 = vmatprep.subr.bf16.mxu1 %v6313_v20 }
 0x262   :  { %4544 = vmatpush2.bf16.msra.mxu0 %v6308_v57 }
 0x263   :  { %4585 = vmatpush2.bf16.msra.mxu1 %v6311_v21  ;;  %4595 = vmatprep.subr.bf16.mxu0 %v6316_v44 }
 0x264   :  { %4636 = vmatprep.subr.bf16.mxu1 %v6319_v14  ;;  %v6349_v14 = vld [vmem:[#allocation4 + $0xb04] ss:$28 sps:$4 sm:$0xff]  }
 0x265   :  { %4546 = vmatmul.mubr.bf16.vlgmr.msra.gmra.mxu0 %v6717_v39  ;;  %v4301_v24 = vpop.f32.mrf.mxu0 }
 0x266   :  { %4587 = vmatmul.mubr.bf16.vlgmr.msra.gmra.mxu1 %v6720_v31  ;;  %v4302_v3 = vadd.f32 %v4301_v24, %v6837_v6  ;;  %v4342_v28 = vpop.f32.mrf.mxu1  ;;  %4596 = vmatpush1.bf16.msra.mxu0 %v6314_v63 }
 0x267   :  { %4627 = vmatprep.mubr.bf16.mxu0 %v6805_v17  ;;  %4637 = vmatpush1.bf16.msra.mxu1 %v6317_v23  ;;  %v4303_v10 = vpop.f32.mrf.mxu0 }
 0x268   :  { %v4343_v13 = vadd.f32 %v4342_v28, %v4302_v3  ;;  %4668 = vmatprep.mubr.bf16.mxu1 %v6807_v29  ;;  %v4304_v34 = vadd.f32 %v4303_v10, %v6840_v15  ;;  %v4344_v36 = vpop.f32.mrf.mxu1  ;;  %4597 = vmatprep.subr.bf16.mxu0 %v6322_v47  ;;  %v6347_v3 = vld [vmem:[#allocation4 + $0xb00] ss:$28 sps:$4 sm:$0xff]   ;;  %v6352_v28 = vld [vmem:[#allocation4 + $0x74c] ss:$28 sps:$4 sm:$0xff]  }
 0x269   :  { %4638 = vmatprep.subr.bf16.mxu1 %v6325_v25  ;;  %v4305_v26 = vpop.f32.mrf.mxu0  ;;  %v6344_v25 = vld [vmem:[#allocation4 + $0x780] ss:$28 sps:$4 sm:$0xff]  }
 0x26a   :  { %v6848_v6 = vmax.f32 %v4343_v13, 0.0  ;;  %v4345_v35 = vadd.f32 %v4344_v36, %v4304_v34  ;;  %v4346_v41 = vpop.f32.mrf.mxu1  ;;  %4598 = vmatpush1.bf16.msra.mxu0 %v6320_v22  ;;  %v6355_v13 = vld [vmem:[#allocation4 + $0xacc] ss:$28 sps:$4 sm:$0xff]  }
 0x26b   :  { %4639 = vmatpush1.bf16.msra.mxu1 %v6323_v12  ;;  %v4306_v45 = vpop.f32.mrf.mxu0  ;;  %4599 = vmatprep.subr.bf16.mxu0 %v6328_v33  ;;  %v6353_v41 = vld [vmem:[#allocation4 + $0xac8] ss:$28 sps:$4 sm:$0xff]  }
 0x26c   :  { %v4844_v50 = vrot.slane %v6848_v6, 4  ;;  %v4893_v15 = vmul.f32 %v6848_v6, %v6848_v6  ;;  %v6853_v51 = vmax.f32 %v4345_v35, 0.0  ;;  %v4347_v52 = vpop.f32.mrf.mxu1  ;;  %4640 = vmatprep.subr.bf16.mxu1 %v6331_v38  ;;  %v6350_v35 = vld [vmem:[#allocation4 + $0x748] ss:$28 sps:$4 sm:$0xff]  }
 0x26e   :  { %v4845_v56 = vadd.f32 %v4844_v50, %v6848_v6  ;;  %v4900_v59 = vrot.slane %v4893_v15, 4  ;;  %v4850_v60 = vrot.slane %v6853_v51, 4  ;;  %v4894_v27 = vmul.f32 %v6853_v51, %v6853_v51  ;;  %4600 = vmatpush1.bf16.msra.mxu0 %v6326_v43  ;;  %v6358_v43 = vld [vmem:[#allocation4 + $0x714] ss:$28 sps:$4 sm:$0xff]  }
 0x26f   :  { %4641 = vmatpush1.bf16.msra.mxu1 %v6329_v46  ;;  %4601 = vmatprep.subr.bf16.mxu0 %v6334_v49  ;;  %v6361_v50 = vld [vmem:[#allocation4 + $0xa94] ss:$28 sps:$4 sm:$0xff]  }
 0x270   :  { %v4846_v2 = vrot.slane %v4845_v56, 2  ;;  %v4901_v32 = vadd.f32 %v4900_v59, %v4893_v15  ;;  %v4851_v4 = vadd.f32 %v4850_v60, %v6853_v51  ;;  %v4906_v53 = vrot.slane %v4894_v27, 4  ;;  %4642 = vmatprep.subr.bf16.mxu1 %v6337_v55  ;;  %v6356_v55 = vld [vmem:[#allocation4 + $0x710] ss:$28 sps:$4 sm:$0xff]   ;;  %v6364_v59 = vld [vmem:[#allocation4 + $0xa5c] ss:$28 sps:$4 sm:$0xff]  }
 0x272   :  { %v4847_v42 = vadd.f32 %v4846_v2, %v4845_v56  ;;  %v4902_v7 = vrot.slane %v4901_v32, 2  ;;  %v4852_v8 = vrot.slane %v4851_v4, 2  ;;  %v4907_v18 = vadd.f32 %v4906_v53, %v4894_v27  ;;  %4602 = vmatpush1.bf16.msra.mxu0 %v6332_v62  ;;  %v6359_v56 = vld [vmem:[#allocation4 + $0xa90] ss:$28 sps:$4 sm:$0xff]   ;;  %v6367_v62 = vld [vmem:[#allocation4 + $0xddc] ss:$28 sps:$4 sm:$0xff]  }
 0x273   :  { %4643 = vmatpush1.bf16.msra.mxu1 %v6335_v0  ;;  %4603 = vmatprep.subr.bf16.mxu0 %v6340_v1  ;;  %v6362_v1 = vld [vmem:[#allocation4 + $0xa58] ss:$28 sps:$4 sm:$0xff]   ;;  %v6368_v53 = vld [vmem:[#allocation4 + $0xa20] ss:$28 sps:$4 sm:$0xff]  }
 0x274   :  { %v4848_v20 = vrot.slane %v4847_v42, 1  ;;  %v4903_v57 = vadd.f32 %v4902_v7, %v4901_v32  ;;  %v4853_v21 = vadd.f32 %v4852_v8, %v4851_v4  ;;  %v4908_v44 = vrot.slane %v4907_v18, 2  ;;  %4644 = vmatprep.subr.bf16.mxu1 %v6343_v11  ;;  %v6365_v2 = vld [vmem:[#allocation4 + $0xdd8] ss:$28 sps:$4 sm:$0xff]   ;;  %v6370_v32 = vld [vmem:[#allocation4 + $0xa24] ss:$28 sps:$4 sm:$0xff]  }
 0x275   :  { %v6373_v4 = vld [vmem:[#allocation4 + $0xda4] ss:$28 sps:$4 sm:$0xff]   ;;  %v6379_v7 = vld [vmem:[#allocation4 + $0xd6c] ss:$28 sps:$4 sm:$0xff]  }
 0x276   :  { %v4849_v63 = vadd.f32 %v4848_v20, %v4847_v42  ;;  %v4904_v23 = vrot.slane %v4903_v57, 1  ;;  %v4854_v47 = vrot.slane %v4853_v21, 1  ;;  %v4909_v24 = vadd.f32 %v4908_v44, %v4907_v18  ;;  %4604 = vmatpush1.bf16.msra.mxu0 %v6338_v40  ;;  %v6371_v11 = vld [vmem:[#allocation4 + $0xda0] ss:$28 sps:$4 sm:$0xff]   ;;  %v6376_v42 = vld [vmem:[#allocation4 + $0x9ec] ss:$28 sps:$4 sm:$0xff]  }
 0x277   :  { %4645 = vmatpush1.bf16.msra.mxu1 %v6341_v61  ;;  %4605 = vmatprep.subr.bf16.mxu0 %v6346_v19  ;;  %v6374_v8 = vld [vmem:[#allocation4 + $0x9e8] ss:$28 sps:$4 sm:$0xff]   ;;  %v6382_v40 = vld [vmem:[#allocation4 + $0x9b4] ss:$28 sps:$4 sm:$0xff]  }
 0x278   :  { %v6860_v22 = vmul.f32 0.125, %v4849_v63  ;;  %v4905_v10 = vadd.f32 %v4904_v23, %v4903_v57  ;;  %v4855_v12 = vadd.f32 %v4854_v47, %v4853_v21  ;;  %v4910_v33 = vrot.slane %v4909_v24, 1  ;;  %4646 = vmatprep.subr.bf16.mxu1 %v6349_v14  ;;  %v6377_v18 = vld [vmem:[#allocation4 + $0xd68] ss:$28 sps:$4 sm:$0xff]   ;;  %v6385_v61 = vld [vmem:[#allocation4 + $0xd34] ss:$28 sps:$4 sm:$0xff]  }
 0x279   :  { %v6380_v19 = vld [vmem:[#allocation4 + $0x9b0] ss:$28 sps:$4 sm:$0xff]   ;;  %v6388_v21 = vld [vmem:[#allocation4 + $0x97c] ss:$28 sps:$4 sm:$0xff]   ;;  %v6870_v14 = vsub.s32 4, %v6642_v9 }
 0x27a   :  { %v4942_v34 = vmul.f32 0.125, %v4905_v10  ;;  %v4949_v36 = vmul.f32 %v6860_v22, %v6860_v22  ;;  %v6864_v38 = vmul.f32 0.125, %v4855_v12  ;;  %v4911_v26 = vadd.f32 %v4910_v33, %v4909_v24  ;;  %4606 = vmatpush1.bf16.msra.mxu0 %v6344_v25  ;;  %v6383_v57 = vld [vmem:[#allocation4 + $0xd30] ss:$28 sps:$4 sm:$0xff]   ;;  %v6391_v63 = vld [vmem:[#allocation4 + $0xcfc] ss:$28 sps:$4 sm:$0xff]  }
 0x27b   :  { %4647 = vmatpush1.bf16.msra.mxu1 %v6347_v3  ;;  %4607 = vmatprep.subr.bf16.mxu0 %v6352_v28  ;;  %v6386_v25 = vld [vmem:[#allocation4 + $0x978] ss:$28 sps:$4 sm:$0xff]   ;;  %v6394_v28 = vld [vmem:[#allocation4 + $0x944] ss:$28 sps:$4 sm:$0xff]   ;;  %v6876_v33 = vsub.s32 5, %v6642_v9 }
 0x27c   :  { %v4956_v45 = vsub.f32 %v4942_v34, %v4949_v36  ;;  %v4943_v46 = vmul.f32 0.125, %v4911_v26  ;;  %v4950_v49 = vmul.f32 %v6864_v38, %v6864_v38  ;;  %4648 = vmatprep.subr.bf16.mxu1 %v6355_v13  ;;  %v6389_v3 = vld [vmem:[#allocation4 + $0xcf8] ss:$28 sps:$4 sm:$0xff]   ;;  %v6397_v34 = vld [vmem:[#allocation4 + $0xcc4] ss:$28 sps:$4 sm:$0xff]  }
 0x27e   :  { %v4963_v15 = vmax.f32 %v4956_v45, 0.0  ;;  %v4957_v52 = vsub.f32 %v4943_v46, %v4950_v49  ;;  %4608 = vmatpush1.bf16.msra.mxu0 %v6350_v35  ;;  %v6400_v45 = vld [vmem:[#allocation4 + $0x90c] ss:$28 sps:$4 sm:$0xff]  }
 0x27f   :  { %4649 = vmatpush1.bf16.msra.mxu1 %v6353_v41  ;;  %4609 = vmatprep.subr.bf16.mxu0 %v6358_v43  ;;  %v6392_v41 = vld [vmem:[#allocation4 + $0x940] ss:$28 sps:$4 sm:$0xff]  }
 0x280   :  { %v4970_v60 = vadd.f32 1e-05, %v4963_v15  ;;  %v4964_v27 = vmax.f32 %v4957_v52, 0.0  ;;  %4650 = vmatprep.subr.bf16.mxu1 %v6361_v50  ;;  %v6395_v43 = vld [vmem:[#allocation4 + $0xcc0] ss:$28 sps:$4 sm:$0xff]  }
 0x281   :  { %v6403_v50 = vld [vmem:[#allocation4 + $0xc8c] ss:$28 sps:$4 sm:$0xff]  }
 0x282   :  { %6490 = vrsqrt.f32 %v4970_v60  ;;  %v4971_v0 = vadd.f32 1e-05, %v4964_v27  ;;  %4610 = vmatpush1.bf16.msra.mxu0 %v6356_v55  ;;  %v6406_v27 = vld [vmem:[#allocation4 + $0x8d4] ss:$28 sps:$4 sm:$0xff]  }
 0x283   :  { %4651 = vmatpush1.bf16.msra.mxu1 %v6359_v56  ;;  %4611 = vmatprep.subr.bf16.mxu0 %v6364_v59  ;;  %v6398_v59 = vld [vmem:[#allocation4 + $0x908] ss:$28 sps:$4 sm:$0xff]  }
 0x284   :  { %6492 = vrsqrt.f32 %v4971_v0  ;;  %4652 = vmatprep.subr.bf16.mxu1 %v6367_v62  ;;  %v6409_v0 = vld [vmem:[#allocation4 + $0xc54] ss:$28 sps:$4 sm:$0xff]  }
 0x286   :  { %4612 = vmatpush2.bf16.msra.mxu0 %v6362_v1  ;;  %v6404_v1 = vld [vmem:[#allocation4 + $0x8d0] ss:$28 sps:$4 sm:$0xff]  }
 0x287   :  { %4653 = vmatpush2.bf16.msra.mxu1 %v6365_v2  ;;  %4613 = vmatprep.subr.bf16.mxu0 %v6370_v32  ;;  %v6410_v32 = vld [vmem:[#allocation4 + $0x360] ss:$28 sps:$4 sm:$0xff]  }
 0x288   :  { %4654 = vmatprep.subr.bf16.mxu1 %v6373_v4  ;;  %v6411_v4 = vld [vmem:[#allocation4 + $0x6e0] ss:$28 sps:$4 sm:$0xff]  }
 0x28a   :  { %4614 = vmatpush2.bf16.msra.mxu0 %v6368_v53 }
 0x28b   :  { %4655 = vmatpush2.bf16.msra.mxu1 %v6371_v11  ;;  %4615 = vmatprep.subr.bf16.mxu0 %v6376_v42  ;;  %v6412_v42 = vld [vmem:[#allocation4 + $0x1a0] ss:$28 sps:$4 sm:$0xff]  }
 0x28c   :  { %4656 = vmatprep.subr.bf16.mxu1 %v6379_v7  ;;  %v6413_v7 = vld [vmem:[#allocation4 + $0x520] ss:$28 sps:$4 sm:$0xff]  }
 0x28e   :  { %4616 = vmatpush2.bf16.msra.mxu0 %v6374_v8  ;;  %v6899_v8 = vld [vmem:[#allocation6 + $0x18] sm:$0xff] }
 0x28f   :  { %v6491_v20 = vpop.eup %6490  ;;  %4657 = vmatpush2.bf16.msra.mxu1 %v6377_v18  ;;  %4617 = vmatprep.subr.bf16.mxu0 %v6382_v40  ;;  %v1868_v18 = vrot.slane %v6899_v8, %v6824_v48  ;;  %v6414_v40 = vld [vmem:[#allocation4 + $0x328] ss:$28 sps:$4 sm:$0xff]  }
 0x290   :  { %v4984_v44 = vmul.f32 %v6826_v54, %v6491_v20  ;;  %4658 = vmatprep.subr.bf16.mxu1 %v6385_v61 }
 0x291   :  { %v6493_v23 = vpop.eup %6492 }
 0x292   :  { %v5026_v47 = vmul.f32 %v4984_v44, %v6860_v22  ;;  %v4985_v24 = vmul.f32 %v6830_v58, %v6493_v23  ;;  %4618 = vmatpush2.bf16.msra.mxu0 %v6380_v19  ;;  %v4994_v10 = vrot.slane %v4984_v44, %v6870_v14  ;;  %v6880_v22 = vsub.s32 6, %v6642_v9  ;;  %v6415_v19 = vld [vmem:[#allocation4 + $0x6a8] ss:$28 sps:$4 sm:$0xff]   ;;  %v6418_v23 = vld [vmem:[#allocation4 + $0x2f0] ss:$28 sps:$4 sm:$0xff]  }
 0x293   :  { %4659 = vmatpush2.bf16.msra.mxu1 %v6383_v57  ;;  %4619 = vmatprep.subr.bf16.mxu0 %v6388_v21  ;;  %v6416_v21 = vld [vmem:[#allocation4 + $0x168] ss:$28 sps:$4 sm:$0xff]  }
 0x294   :  { %v5040_v12 = vrot.slane %v5026_v47, 7  ;;  %v5027_v13 = vmul.f32 %v4985_v24, %v6864_v38  ;;  %4660 = vmatprep.subr.bf16.mxu1 %v6391_v63  ;;  %v4998_v26 = vrot.slane %v4985_v24, %v6870_v14  ;;  %v5019_v46 = vmul.f32 %v4994_v10, %v6848_v6  ;;  %v6401_v6 = vld [vmem:[#allocation4 + $0xc88] ss:$28 sps:$4 sm:$0xff]  }
 0x295   :  { %v5099_v15 = vrot.slane %v6826_v54, %v6880_v22  ;;  %v5103_v60 = vrot.slane %v6830_v58, %v6880_v22  ;;  %v6417_v63 = vld [vmem:[#allocation4 + $0x4e8] ss:$28 sps:$4 sm:$0xff]  }
 0x296   :  { %v5054_v36 = vsub.f32 %v6826_v54, %v5040_v12  ;;  %v5041_v35 = vrot.slane %v5027_v13, 7  ;;  %4620 = vmatpush2.bf16.msra.mxu0 %v6386_v25  ;;  %v5020_v55 = vmul.f32 %v4998_v26, %v6853_v51  ;;  %v6407_v51 = vld [vmem:[#allocation4 + $0xc50] ss:$28 sps:$4 sm:$0xff]  }
 0x297   :  { %4661 = vmatpush2.bf16.msra.mxu1 %v6389_v3  ;;  %4621 = vmatprep.subr.bf16.mxu0 %v6394_v28  ;;  %v6419_v3 = vld [vmem:[#allocation4 + $0x670] ss:$28 sps:$4 sm:$0xff]  }
 0x298   :  { %v5064_v38 = vrot.slane %v5054_v36, %v6876_v33  ;;  %v5055_v49 = vsub.f32 %v6830_v58, %v5041_v35  ;;  %4662 = vmatprep.subr.bf16.mxu1 %v6397_v34  ;;  %v6895_v58 = vld [vmem:[#allocation6 + $0x10] sm:$0xff] }
 0x299   :  { %v1864_v11 = vrot.slane %v6895_v58, %v6824_v48  ;;  %v6420_v13 = vld [vmem:[#allocation4 + $0x130] ss:$28 sps:$4 sm:$0xff]   ;;  %v6422_v36 = vld [vmem:[#allocation4 + $0x2b8] ss:$28 sps:$4 sm:$0xff]  }
 0x29a   :  { %v5089_v52 = vadd.f32 %v5064_v38, %v5019_v46  ;;  %v5068_v56 = vrot.slane %v5055_v49, %v6876_v33  ;;  %4622 = vmatpush2.bf16.msra.mxu0 %v6392_v41  ;;  %v6421_v34 = vld [vmem:[#allocation4 + $0x4b0] ss:$28 sps:$4 sm:$0xff]   ;;  %v6423_v35 = vld [vmem:[#allocation4 + $0x638] ss:$28 sps:$4 sm:$0xff]   ;;  %v6428_v46 = vld [vmem:[#allocation4 + $0xc0] ss:$28 sps:$4 sm:$0xff]  }
 0x29b   :  { %4663 = vmatpush2.bf16.msra.mxu1 %v6395_v43  ;;  %4623 = vmatprep.subr.bf16.mxu0 %v6400_v45  ;;  %v6425_v41 = vld [vmem:[#allocation4 + $0x478] ss:$28 sps:$4 sm:$0xff]   ;;  %v6426_v43 = vld [vmem:[#allocation4 + $0x280] ss:$28 sps:$4 sm:$0xff]   ;;  %v6430_v49 = vld [vmem:[#allocation4 + $0x248] ss:$28 sps:$4 sm:$0xff]  }
 0x29c   :  { %v5090_v62 = vadd.f32 %v5068_v56, %v5020_v55  ;;  %4664 = vmatprep.subr.bf16.mxu1 %v6403_v50  ;;  %v5124_v54 = vmul.f32 %v5099_v15, %v5089_v52  ;;  %v6427_v45 = vld [vmem:[#allocation4 + $0x600] ss:$28 sps:$4 sm:$0xff]   ;;  %v6431_v50 = vld [vmem:[#allocation4 + $0x5c8] ss:$28 sps:$4 sm:$0xff]   ;;  %v6434_v55 = vld [vmem:[#allocation4 + $0x210] ss:$28 sps:$4 sm:$0xff]  }
 0x29d   :  { %v6429_v38 = vld [vmem:[#allocation4 + $0x440] ss:$28 sps:$4 sm:$0xff]   ;;  %v6432_v15 = vld [vmem:[#allocation4 + $0x88] ss:$28 sps:$4 sm:$0xff]   ;;  %v6435_v56 = vld [vmem:[#allocation4 + $0x590] ss:$28 sps:$4 sm:$0xff]  }
 0x29e   :  { %4624 = vmatpush2.bf16.msra.mxu0 %v6398_v59  ;;  %v5125_v2 = vmul.f32 %v5103_v60, %v5090_v62  ;;  %v6433_v52 = vld [vmem:[#allocation4 + $0x408] ss:$28 sps:$4 sm:$0xff]   ;;  %v6436_v59 = vld [vmem:[#allocation4 + $0x50] ss:$28 sps:$4 sm:$0xff]   ;;  %v6440_v62 = vld [vmem:[#allocation4 + $0x18] ss:$28 sps:$4 sm:$0xff]  }
 0x29f   :  { %4665 = vmatpush2.bf16.msra.mxu1 %v6401_v6  ;;  %4625 = vmatprep.subr.bf16.mxu0 %v6406_v27  ;;  %v6437_v60 = vld [vmem:[#allocation4 + $0x3d0] ss:$28 sps:$4 sm:$0xff]   ;;  %v6438_v6 = vld [vmem:[#allocation4 + $0x1d8] ss:$28 sps:$4 sm:$0xff]  }
 0x2a0   :  { %4666 = vmatprep.subr.bf16.mxu1 %v6409_v0  ;;  %v6893_v53 = vadd.f32 %v5125_v2, %v5124_v54  ;;  %v6439_v27 = vld [vmem:[#allocation4 + $0x558] ss:$28 sps:$4 sm:$0xff]   ;;  %v6443_v54 = vld [vmem:[#allocation4 + $0xde0] ss:$28 sps:$4 sm:$0xff]  }
 0x2a1   :  { %v6441_v0 = vld [vmem:[#allocation4 + $0x398] ss:$28 sps:$4 sm:$0xff]   ;;  %v6444_v2 = vld [vmem:[#allocation4 + $0x8a0] ss:$28 sps:$4 sm:$0xff]  }
 0x2a2   :  { %4626 = vmatpush2.bf16.msra.mxu0 %v6404_v1  ;;  %v6442_v1 = vld [vmem:[#allocation4 + $0xa60] ss:$28 sps:$4 sm:$0xff]  }
 0x2a3   :  { %4667 = vmatpush2.bf16.msra.mxu1 %v6407_v51  ;;  %5737 = vmatprep.subr.bf16.mxu0 %v6410_v32  ;;  %v6445_v51 = vld [vmem:[#allocation4 + $0xc20] ss:$28 sps:$4 sm:$0xff]   ;;  %v6446_v32 = vld [vmem:[#allocation4 + $0xa28] ss:$28 sps:$4 sm:$0xff]  }
 0x2a4   :  { %5759 = vmatprep.subr.bf16.mxu1 %v6411_v4  ;;  %v6447_v4 = vld [vmem:[#allocation4 + $0xda8] ss:$28 sps:$4 sm:$0xff]  }
 0x2a5   :  { %v4383_v61 = vpop.f32.mrf.mxu0  ;;  %4628 = vmatmul.mubr.bf16.vlgmr.msra.gmra.mxu0 %v6809_v5 }
 0x2a6   :  { %v4384_v20 = vadd.f32 %v4383_v61, %v1864_v11  ;;  %v4424_v57 = vpop.f32.mrf.mxu1  ;;  %4669 = vmatmul.mubr.bf16.vlgmr.msra.gmra.mxu1 %v6812_v30  ;;  %5738 = vmatpush3.bf16.msra.mxu0 %v6412_v42  ;;  %v6448_v11 = vld [vmem:[#allocation4 + $0x868] ss:$28 sps:$4 sm:$0xff]   ;;  %v6454_v61 = vld [vmem:[#allocation4 + $0x9b8] ss:$28 sps:$4 sm:$0xff]  }
 0x2a7   :  { %4709 = vmatprep.mubr.bf16.mxu0 %v6713_v37  ;;  %5760 = vmatpush3.bf16.msra.mxu1 %v6413_v7  ;;  %v4385_v44 = vpop.f32.mrf.mxu0  ;;  %v6449_v42 = vld [vmem:[#allocation4 + $0xbe8] ss:$28 sps:$4 sm:$0xff]   ;;  %v6450_v7 = vld [vmem:[#allocation4 + $0x9f0] ss:$28 sps:$4 sm:$0xff]  }
 0x2a8   :  { %v6906_v47 = vadd.f32 %v4424_v57, %v4384_v20  ;;  %4749 = vmatprep.mubr.bf16.mxu1 %v6715_v16  ;;  %v4386_v24 = vadd.f32 %v4385_v44, %v1868_v18  ;;  %v4426_v25 = vpop.f32.mrf.mxu1  ;;  %5739 = vmatprep.subr.bf16.mxu0 %v6414_v40  ;;  %v6424_v16 = vld [vmem:[#allocation4 + $0xf8] ss:$28 sps:$4 sm:$0xff]   ;;  %v6451_v18 = vld [vmem:[#allocation4 + $0xd70] ss:$28 sps:$4 sm:$0xff]   ;;  %v6458_v20 = vld [vmem:[#allocation4 + $0x980] ss:$28 sps:$4 sm:$0xff]  }
 0x2a9   :  { %v4387_v28 = vpop.f32.mrf.mxu0  ;;  %5761 = vmatprep.subr.bf16.mxu1 %v6415_v19  ;;  %v6452_v40 = vld [vmem:[#allocation4 + $0x830] ss:$28 sps:$4 sm:$0xff]   ;;  %v6456_v19 = vld [vmem:[#allocation4 + $0x7f8] ss:$28 sps:$4 sm:$0xff]   ;;  %v6459_v57 = vld [vmem:[#allocation4 + $0xd00] ss:$28 sps:$4 sm:$0xff]  }
 0x2aa   :  { %v6909_v10 = vadd.f32 %v4426_v25, %v4386_v24  ;;  %v4428_v12 = vpop.f32.mrf.mxu1  ;;  %5740 = vmatpush3.bf16.msra.mxu0 %v6416_v21  ;;  %v6461_v21 = vld [vmem:[#allocation4 + $0xb40] ss:$28 sps:$4 sm:$0xff]   ;;  %v6462_v44 = vld [vmem:[#allocation4 + $0x948] ss:$28 sps:$4 sm:$0xff]   ;;  %v6466_v25 = vld [vmem:[#allocation4 + $0x910] ss:$28 sps:$4 sm:$0xff]  }
 0x2ab   :  { %5762 = vmatpush3.bf16.msra.mxu1 %v6417_v63  ;;  %v4388_v37 = vpop.f32.mrf.mxu0  ;;  %5741 = vmatprep.subr.bf16.mxu0 %v6418_v23  ;;  %v6463_v63 = vld [vmem:[#allocation4 + $0xcc8] ss:$28 sps:$4 sm:$0xff]   ;;  %v6468_v28 = vld [vmem:[#allocation4 + $0x750] ss:$28 sps:$4 sm:$0xff]  }
 0x2ac   :  { %v4429_v26 = vpop.f32.mrf.mxu1  ;;  %5763 = vmatprep.subr.bf16.mxu1 %v6419_v3  ;;  %v6464_v23 = vld [vmem:[#allocation4 + $0x788] ss:$28 sps:$4 sm:$0xff]   ;;  %v6467_v3 = vld [vmem:[#allocation4 + $0xc90] ss:$28 sps:$4 sm:$0xff]   ;;  %v6471_v37 = vld [vmem:[#allocation4 + $0xc58] ss:$28 sps:$4 sm:$0xff]  }
 0x2ad   :  { %v6465_v24 = vld [vmem:[#allocation4 + $0xb08] ss:$28 sps:$4 sm:$0xff]   ;;  %v6469_v12 = vld [vmem:[#allocation4 + $0xad0] ss:$28 sps:$4 sm:$0xff]  }
 0x2ae   :  { %5742 = vmatpush3.bf16.msra.mxu0 %v6420_v13  ;;  %v6470_v13 = vld [vmem:[#allocation4 + $0x8d8] ss:$28 sps:$4 sm:$0xff]  }
 0x2af   :  { %5764 = vmatpush3.bf16.msra.mxu1 %v6421_v34  ;;  %5743 = vmatprep.subr.bf16.mxu0 %v6422_v36  ;;  %v6472_v34 = vld [vmem:[#allocation4 + $0x718] ss:$28 sps:$4 sm:$0xff]  }
 0x2b0   :  { %5765 = vmatprep.subr.bf16.mxu1 %v6423_v35  ;;  %v6473_v36 = vld [vmem:[#allocation4 + $0xa98] ss:$28 sps:$4 sm:$0xff]  }
 0x2b2   :  { %5744 = vmatpush3.bf16.msra.mxu0 %v6424_v16 }
 0x2b3   :  { %5766 = vmatpush3.bf16.msra.mxu1 %v6425_v41  ;;  %5745 = vmatprep.subr.bf16.mxu0 %v6426_v43 }
 0x2b4   :  { %5767 = vmatprep.subr.bf16.mxu1 %v6427_v45 }
 0x2b6   :  { %5746 = vmatpush3.bf16.msra.mxu0 %v6428_v46 }
 0x2b7   :  { %5768 = vmatpush3.bf16.msra.mxu1 %v6429_v38  ;;  %5747 = vmatprep.subr.bf16.mxu0 %v6430_v49 }
 0x2b8   :  { %5769 = vmatprep.subr.bf16.mxu1 %v6431_v50 }
 0x2ba   :  { %5748 = vmatpush3.bf16.msra.mxu0 %v6432_v15 }
 0x2bb   :  { %5770 = vmatpush3.bf16.msra.mxu1 %v6433_v52  ;;  %5749 = vmatprep.subr.bf16.mxu0 %v6434_v55 }
 0x2bc   :  { %5771 = vmatprep.subr.bf16.mxu1 %v6435_v56 }
 0x2be   :  { %5750 = vmatpush3.bf16.msra.mxu0 %v6436_v59 }
 0x2bf   :  { %5772 = vmatpush3.bf16.msra.mxu1 %v6437_v60  ;;  %5751 = vmatprep.subr.bf16.mxu0 %v6438_v6 }
 0x2c0   :  { %5773 = vmatprep.subr.bf16.mxu1 %v6439_v27 }
 0x2c2   :  { %5752 = vmatpush3.bf16.msra.mxu0 %v6440_v62 }
 0x2c3   :  { %5774 = vmatpush3.bf16.msra.mxu1 %v6441_v0  ;;  %5781 = vmatprep.subr.bf16.mxu0 %v6442_v1 }
 0x2c4   :  { %5803 = vmatprep.subr.bf16.mxu1 %v6443_v54 }
 0x2c5   :  { %4710 = vmatmul.mubr.bf16.vlgmr.msra.gmra.mxu0 %v6717_v39  ;;  %v6453_v39 = vld [vmem:[#allocation4 + $0xbb0] ss:$28 sps:$4 sm:$0xff]  }
 0x2c6   :  { %4750 = vmatmul.mubr.bf16.vlgmr.msra.gmra.mxu1 %v6720_v31  ;;  %5782 = vmatpush3.bf16.msra.mxu0 %v6444_v2  ;;  %v6455_v31 = vld [vmem:[#allocation4 + $0xd38] ss:$28 sps:$4 sm:$0xff]  }
 0x2c7   :  { %4789 = vmatprep.mubr.bf16.mxu0 %v6805_v17  ;;  %5804 = vmatpush3.bf16.msra.mxu1 %v6445_v51  ;;  %v6457_v17 = vld [vmem:[#allocation4 + $0xb78] ss:$28 sps:$4 sm:$0xff]  }
 0x2c8   :  { %4829 = vmatprep.mubr.bf16.mxu1 %v6807_v29  ;;  %5783 = vmatprep.subr.bf16.mxu0 %v6446_v32  ;;  %v6460_v29 = vld [vmem:[#allocation4 + $0x7c0] ss:$28 sps:$4 sm:$0xff]  }
 0x2c9   :  { %5805 = vmatprep.subr.bf16.mxu1 %v6447_v4 }
 0x2ca   :  { %5784 = vmatpush3.bf16.msra.mxu0 %v6448_v11 }
 0x2cb   :  { %5806 = vmatpush3.bf16.msra.mxu1 %v6449_v42  ;;  %5785 = vmatprep.subr.bf16.mxu0 %v6450_v7 }
 0x2cc   :  { %5807 = vmatprep.subr.bf16.mxu1 %v6451_v18 }
 0x2ce   :  { %5786 = vmatpush3.bf16.msra.mxu0 %v6452_v40 }
 0x2cf   :  { %5808 = vmatpush3.bf16.msra.mxu1 %v6453_v39  ;;  %5787 = vmatprep.subr.bf16.mxu0 %v6454_v61 }
 0x2d0   :  { %5809 = vmatprep.subr.bf16.mxu1 %v6455_v31 }
 0x2d2   :  { %5788 = vmatpush3.bf16.msra.mxu0 %v6456_v19 }
 0x2d3   :  { %5810 = vmatpush3.bf16.msra.mxu1 %v6457_v17  ;;  %5789 = vmatprep.subr.bf16.mxu0 %v6458_v20 }
 0x2d4   :  { %5811 = vmatprep.subr.bf16.mxu1 %v6459_v57 }
 0x2d6   :  { %5790 = vmatpush3.bf16.msra.mxu0 %v6460_v29 }
 0x2d7   :  { %5812 = vmatpush3.bf16.msra.mxu1 %v6461_v21  ;;  %5791 = vmatprep.subr.bf16.mxu0 %v6462_v44 }
 0x2d8   :  { %5813 = vmatprep.subr.bf16.mxu1 %v6463_v63 }
 0x2da   :  { %5792 = vmatpush3.bf16.msra.mxu0 %v6464_v23 }
 0x2db   :  { %5814 = vmatpush3.bf16.msra.mxu1 %v6465_v24  ;;  %5793 = vmatprep.subr.bf16.mxu0 %v6466_v25 }
 0x2dc   :  { %5815 = vmatprep.subr.bf16.mxu1 %v6467_v3 }
 0x2de   :  { %5794 = vmatpush3.bf16.msra.mxu0 %v6468_v28 }
 0x2df   :  { %5816 = vmatpush3.bf16.msra.mxu1 %v6469_v12  ;;  %5795 = vmatprep.subr.bf16.mxu0 %v6470_v13 }
 0x2e0   :  { %5817 = vmatprep.subr.bf16.mxu1 %v6471_v37 }
 0x2e2   :  { %5796 = vmatpush3.bf16.msra.mxu0 %v6472_v34 }
 0x2e3   :  { %5818 = vmatpush3.bf16.msra.mxu1 %v6473_v36 }
 0x2e5   :  { %v4465_v26 = vpop.f32.mrf.mxu0  ;;  %4790 = vmatmul.mubr.bf16.vlgmr.msra.gmra.mxu0 %v6809_v5 }
 0x2e6   :  { %v4466_v35 = vadd.f32 %v4465_v26, %v6906_v47  ;;  %v4506_v16 = vpop.f32.mrf.mxu1  ;;  %4830 = vmatmul.mubr.bf16.vlgmr.msra.gmra.mxu1 %v6812_v30 }
 0x2e7   :  { %v4467_v41 = vpop.f32.mrf.mxu0 }
 0x2e8   :  { %v4507_v43 = vadd.f32 %v4506_v16, %v4466_v35  ;;  %v4468_v45 = vadd.f32 %v4467_v41, %v6909_v10  ;;  %v4508_v46 = vpop.f32.mrf.mxu1 }
 0x2e9   :  { %v4469_v38 = vpop.f32.mrf.mxu0 }
 0x2ea   :  { %v4839_v49 = vmax.f32 %v4507_v43, 0.0  ;;  %v4509_v50 = vadd.f32 %v4508_v46, %v4468_v45  ;;  %v4510_v15 = vpop.f32.mrf.mxu1 }
 0x2eb   :  { %v4470_v52 = vpop.f32.mrf.mxu0 }
 0x2ec   :  { %v4856_v55 = vrot.slane %v4839_v49, 4  ;;  %v4895_v56 = vmul.f32 %v4839_v49, %v4839_v49  ;;  %v4840_v59 = vmax.f32 %v4509_v50, 0.0  ;;  %v4511_v60 = vpop.f32.mrf.mxu1  ;;  %v5107_v52 = vrot.slane %v6895_v58, %v6880_v22 }
 0x2ee   :  { %v4857_v5 = vadd.f32 %v4856_v55, %v4839_v49  ;;  %v4912_v6 = vrot.slane %v4895_v56, 4  ;;  %v4862_v47 = vrot.slane %v4840_v59, 4  ;;  %v4896_v27 = vmul.f32 %v4840_v59, %v4840_v59 }
 0x2f0   :  { %v4858_v62 = vrot.slane %v4857_v5, 2  ;;  %v4913_v30 = vadd.f32 %v4912_v6, %v4895_v56  ;;  %v4863_v0 = vadd.f32 %v4862_v47, %v4840_v59  ;;  %v4918_v1 = vrot.slane %v4896_v27, 4 }
 0x2f2   :  { %v4859_v54 = vadd.f32 %v4858_v62, %v4857_v5  ;;  %v4914_v10 = vrot.slane %v4913_v30, 2  ;;  %v4864_v2 = vrot.slane %v4863_v0, 2  ;;  %v4919_v51 = vadd.f32 %v4918_v1, %v4896_v27 }
 0x2f3   :  { %v5111_v5 = vrot.slane %v6899_v8, %v6880_v22 }
 0x2f4   :  { %v4860_v32 = vrot.slane %v4859_v54, 1  ;;  %v4915_v4 = vadd.f32 %v4914_v10, %v4913_v30  ;;  %v4865_v11 = vadd.f32 %v4864_v2, %v4863_v0  ;;  %v4920_v42 = vrot.slane %v4919_v51, 2  ;;  %v6934_v30 = vld [vmem:[#allocation6 + $0x20] sm:$0xff] }
 0x2f5   :  { %v1872_v0 = vrot.slane %v6934_v30, %v6824_v48 }
 0x2f6   :  { %v4861_v7 = vadd.f32 %v4860_v32, %v4859_v54  ;;  %v4916_v18 = vrot.slane %v4915_v4, 1  ;;  %v4866_v40 = vrot.slane %v4865_v11, 1  ;;  %v4921_v39 = vadd.f32 %v4920_v42, %v4919_v51 }
 0x2f8   :  { %v4888_v61 = vmul.f32 0.125, %v4861_v7  ;;  %v4917_v31 = vadd.f32 %v4916_v18, %v4915_v4  ;;  %v4867_v19 = vadd.f32 %v4866_v40, %v4865_v11  ;;  %v4922_v17 = vrot.slane %v4921_v39, 1 }
 0x2fa   :  { %v4944_v20 = vmul.f32 0.125, %v4917_v31  ;;  %v4951_v57 = vmul.f32 %v4888_v61, %v4888_v61  ;;  %v4889_v29 = vmul.f32 0.125, %v4867_v19  ;;  %v4923_v21 = vadd.f32 %v4922_v17, %v4921_v39 }
 0x2fc   :  { %v4958_v44 = vsub.f32 %v4944_v20, %v4951_v57  ;;  %v4945_v63 = vmul.f32 0.125, %v4923_v21  ;;  %v4952_v23 = vmul.f32 %v4889_v29, %v4889_v29 }
 0x2fe   :  { %v4965_v24 = vmax.f32 %v4958_v44, 0.0  ;;  %v4959_v25 = vsub.f32 %v4945_v63, %v4952_v23 }
 0x300   :  { %v4972_v3 = vadd.f32 1e-05, %v4965_v24  ;;  %v4966_v28 = vmax.f32 %v4959_v25, 0.0 }
 0x302   :  { %6494 = vrsqrt.f32 %v4972_v3  ;;  %v4973_v12 = vadd.f32 1e-05, %v4966_v28 }
 0x304   :  { %6496 = vrsqrt.f32 %v4973_v12 }
 0x30f   :  { %v6495_v13 = vpop.eup %6494 }
 0x310   :  { %v4986_v37 = vmul.f32 %v6895_v58, %v6495_v13 }
 0x311   :  { %v6497_v34 = vpop.eup %6496 }
 0x312   :  { %v5028_v36 = vmul.f32 %v4986_v37, %v4888_v61  ;;  %v4987_v26 = vmul.f32 %v6899_v8, %v6497_v34  ;;  %v5002_v35 = vrot.slane %v4986_v37, %v6870_v14 }
 0x314   :  { %v5042_v16 = vrot.slane %v5028_v36, 7  ;;  %v5029_v41 = vmul.f32 %v4987_v26, %v4889_v29  ;;  %v5006_v45 = vrot.slane %v4987_v26, %v6870_v14  ;;  %v5021_v38 = vmul.f32 %v5002_v35, %v4839_v49 }
 0x316   :  { %v5056_v43 = vsub.f32 %v6895_v58, %v5042_v16  ;;  %v5043_v46 = vrot.slane %v5029_v41, 7  ;;  %v5022_v56 = vmul.f32 %v5006_v45, %v4840_v59  ;;  %v6938_v58 = vld [vmem:[#allocation6 + $0x28] sm:$0xff] }
 0x317   :  { %v1876_v59 = vrot.slane %v6938_v58, %v6824_v48 }
 0x318   :  { %v5072_v50 = vrot.slane %v5056_v43, %v6876_v33  ;;  %v5057_v15 = vsub.f32 %v6899_v8, %v5043_v46 }
 0x31a   :  { %v5091_v55 = vadd.f32 %v5072_v50, %v5021_v38  ;;  %v5076_v60 = vrot.slane %v5057_v15, %v6876_v33 }
 0x31c   :  { %v5092_v6 = vadd.f32 %v5076_v60, %v5022_v56  ;;  %v5126_v47 = vmul.f32 %v5107_v52, %v5091_v55 }
 0x31e   :  { %v5127_v27 = vmul.f32 %v5111_v5, %v5092_v6  ;;  %v5132_v62 = vadd.f32 %v6893_v53, %v5126_v47 }
 0x320   :  { %v6932_v49 = vadd.f32 %v5132_v62, %v5127_v27 }
 0x325   :  { %v4547_v1 = vpop.f32.mrf.mxu0 }
 0x326   :  { %v4548_v54 = vadd.f32 %v4547_v1, %v1872_v0  ;;  %v4588_v8 = vpop.f32.mrf.mxu1 }
 0x327   :  { %v4549_v10 = vpop.f32.mrf.mxu0 }
 0x328   :  { %v4589_v2 = vadd.f32 %v4588_v8, %v4548_v54  ;;  %v4550_v51 = vadd.f32 %v4549_v10, %v1876_v59  ;;  %v4590_v32 = vpop.f32.mrf.mxu1 }
 0x329   :  { %v4551_v53 = vpop.f32.mrf.mxu0 }
 0x32a   :  { %v4591_v4 = vadd.f32 %v4590_v32, %v4550_v51  ;;  %v4592_v11 = vpop.f32.mrf.mxu1 }
 0x32b   :  { %v4552_v42 = vpop.f32.mrf.mxu0 }
 0x32c   :  { %v4593_v7 = vpop.f32.mrf.mxu1 }
 0x365   :  { %v4629_v18 = vpop.f32.mrf.mxu0 }
 0x366   :  { %v4630_v40 = vadd.f32 %v4629_v18, %v4589_v2  ;;  %v4670_v39 = vpop.f32.mrf.mxu1 }
 0x367   :  { %v4631_v61 = vpop.f32.mrf.mxu0 }
 0x368   :  { %v4671_v31 = vadd.f32 %v4670_v39, %v4630_v40  ;;  %v4632_v19 = vadd.f32 %v4631_v61, %v4591_v4  ;;  %v4672_v17 = vpop.f32.mrf.mxu1 }
 0x369   :  { %v4633_v20 = vpop.f32.mrf.mxu0 }
 0x36a   :  { %v6942_v57 = vmax.f32 %v4671_v31, 0.0  ;;  %v4673_v29 = vadd.f32 %v4672_v17, %v4632_v19  ;;  %v4674_v21 = vpop.f32.mrf.mxu1 }
 0x36b   :  { %v4634_v44 = vpop.f32.mrf.mxu0 }
 0x36c   :  { %v4868_v63 = vrot.slane %v6942_v57, 4  ;;  %v4897_v23 = vmul.f32 %v6942_v57, %v6942_v57  ;;  %v6947_v24 = vmax.f32 %v4673_v29, 0.0  ;;  %v4675_v25 = vpop.f32.mrf.mxu1 }
 0x36e   :  { %v4869_v3 = vadd.f32 %v4868_v63, %v6942_v57  ;;  %v4924_v28 = vrot.slane %v4897_v23, 4  ;;  %v4874_v12 = vrot.slane %v6947_v24, 4  ;;  %v4898_v13 = vmul.f32 %v6947_v24, %v6947_v24 }
 0x370   :  { %v4870_v37 = vrot.slane %v4869_v3, 2  ;;  %v4925_v34 = vadd.f32 %v4924_v28, %v4897_v23  ;;  %v4875_v36 = vadd.f32 %v4874_v12, %v6947_v24  ;;  %v4930_v26 = vrot.slane %v4898_v13, 4 }
 0x372   :  { %v4871_v35 = vadd.f32 %v4870_v37, %v4869_v3  ;;  %v4926_v16 = vrot.slane %v4925_v34, 2  ;;  %v4876_v41 = vrot.slane %v4875_v36, 2  ;;  %v4931_v43 = vadd.f32 %v4930_v26, %v4898_v13 }
 0x373   :  { %v5115_v37 = vrot.slane %v6934_v30, %v6880_v22 }
 0x374   :  { %v4872_v45 = vrot.slane %v4871_v35, 1  ;;  %v4927_v46 = vadd.f32 %v4926_v16, %v4925_v34  ;;  %v4877_v38 = vadd.f32 %v4876_v41, %v4875_v36  ;;  %v4932_v50 = vrot.slane %v4931_v43, 2 }
 0x376   :  { %v4873_v15 = vadd.f32 %v4872_v45, %v4871_v35  ;;  %v4928_v52 = vrot.slane %v4927_v46, 1  ;;  %v4878_v55 = vrot.slane %v4877_v38, 1  ;;  %v4933_v56 = vadd.f32 %v4932_v50, %v4931_v43  ;;  %v6514_v45 = vld [vmem:[#allocation6 + $0x30] sm:$0xff] }
 0x377   :  { %v5119_v35 = vrot.slane %v6938_v58, %v6880_v22 }
 0x378   :  { %v4890_v60 = vmul.f32 0.125, %v4873_v15  ;;  %v4929_v5 = vadd.f32 %v4928_v52, %v4927_v46  ;;  %v4879_v6 = vadd.f32 %v4878_v55, %v4877_v38  ;;  %v4934_v47 = vrot.slane %v4933_v56, 1 }
 0x379   :  { %v1880_v46 = vrot.slane %v6514_v45, %v6824_v48 }
 0x37a   :  { %v4946_v27 = vmul.f32 0.125, %v4929_v5  ;;  %v4953_v62 = vmul.f32 %v4890_v60, %v4890_v60  ;;  %v4891_v0 = vmul.f32 0.125, %v4879_v6  ;;  %v4935_v59 = vadd.f32 %v4934_v47, %v4933_v56 }
 0x37c   :  { %v4960_v1 = vsub.f32 %v4946_v27, %v4953_v62  ;;  %v4947_v54 = vmul.f32 0.125, %v4935_v59  ;;  %v4954_v8 = vmul.f32 %v4891_v0, %v4891_v0 }
 0x37e   :  { %v4967_v10 = vmax.f32 %v4960_v1, 0.0  ;;  %v4961_v2 = vsub.f32 %v4947_v54, %v4954_v8 }
 0x380   :  { %v4974_v51 = vadd.f32 1e-05, %v4967_v10  ;;  %v4968_v32 = vmax.f32 %v4961_v2, 0.0 }
 0x382   :  { %6498 = vrsqrt.f32 %v4974_v51  ;;  %v4975_v53 = vadd.f32 1e-05, %v4968_v32 }
 0x384   :  { %6500 = vrsqrt.f32 %v4975_v53 }
 0x385   :  { %v5753_v4 = vpop.f32.mrf.mxu0 }
 0x386   :  { %v5775_v11 = vpop.f32.mrf.mxu1 }
 0x387   :  { %v5754_v42 = vpop.f32.mrf.mxu0 }
 0x388   :  { %v5776_v7 = vpop.f32.mrf.mxu1  ;;  %v5755_v38 = vadd.f32 %v5754_v42, %v5753_v4 }
 0x389   :  { %v5756_v18 = vpop.f32.mrf.mxu0  ;;  %v5777_v52 = vadd.f32 %v5776_v7, %v5775_v11 }
 0x38a   :  { %v5778_v40 = vpop.f32.mrf.mxu1  ;;  %v4712_v15 = vadd.f32 %v5755_v38, %v1880_v46 }
 0x38b   :  { %v5757_v39 = vpop.f32.mrf.mxu0 }
 0x38c   :  { %v5779_v61 = vpop.f32.mrf.mxu1  ;;  %v4752_v56 = vadd.f32 %v5777_v52, %v4712_v15 }
 0x38f   :  { %v6499_v31 = vpop.eup %6498 }
 0x390   :  { %v4988_v19 = vmul.f32 %v6934_v30, %v6499_v31 }
 0x391   :  { %v6501_v17 = vpop.eup %6500 }
 0x392   :  { %v4989_v20 = vmul.f32 %v6938_v58, %v6501_v17  ;;  %v5030_v29 = vmul.f32 %v4988_v19, %v4890_v60  ;;  %v5010_v21 = vrot.slane %v4988_v19, %v6870_v14 }
 0x394   :  { %v5031_v44 = vmul.f32 %v4989_v20, %v4891_v0  ;;  %v5044_v63 = vrot.slane %v5030_v29, 7  ;;  %v5014_v23 = vrot.slane %v4989_v20, %v6870_v14  ;;  %v5023_v28 = vmul.f32 %v5010_v21, %v6942_v57 }
 0x396   :  { %v5045_v25 = vrot.slane %v5031_v44, 7  ;;  %v5058_v3 = vsub.f32 %v6934_v30, %v5044_v63  ;;  %v5024_v34 = vmul.f32 %v5014_v23, %v6947_v24 }
 0x398   :  { %v5059_v12 = vsub.f32 %v6938_v58, %v5045_v25  ;;  %v5080_v13 = vrot.slane %v5058_v3, %v6876_v33  ;;  %v5123_v3 = vrot.slane %v6514_v45, %v6880_v22 }
 0x39a   :  { %v5084_v36 = vrot.slane %v5059_v12, %v6876_v33  ;;  %v5093_v26 = vadd.f32 %v5080_v13, %v5023_v28 }
 0x39c   :  { %v5094_v16 = vadd.f32 %v5084_v36, %v5024_v34  ;;  %v5128_v41 = vmul.f32 %v5115_v37, %v5093_v26  ;;  %v5141_v37 = vsub.s32 7, %v6642_v9  ;;  %v6515_v34 = vld [vmem:[#allocation6] sm:$0xff] }
 0x39e   :  { %v5129_v43 = vmul.f32 %v5119_v35, %v5094_v16  ;;  %v5134_v57 = vadd.f32 %v6932_v49, %v5128_v41  ;;  %v5142_v36 = vrot.slane %v6515_v34, %v5141_v37 }
 0x3a0   :  { %v5135_v50 = vadd.f32 %v5134_v57, %v5129_v43 }
 0x3a5   :  { %v5797_v30 = vpop.f32.mrf.mxu0 }
 0x3a6   :  { %v5819_v24 = vpop.f32.mrf.mxu1 }
 0x3a7   :  { %v5798_v55 = vpop.f32.mrf.mxu0 }
 0x3a8   :  { %v5799_v60 = vadd.f32 %v5798_v55, %v5797_v30  ;;  %v5820_v5 = vpop.f32.mrf.mxu1 }
 0x3a9   :  { %v5800_v6 = vpop.f32.mrf.mxu0  ;;  %v5821_v47 = vadd.f32 %v5820_v5, %v5819_v24 }
 0x3aa   :  { %v4792_v58 = vadd.f32 %v5799_v60, %v4752_v56  ;;  %v5822_v27 = vpop.f32.mrf.mxu1 }
 0x3ab   :  { %v5801_v62 = vpop.f32.mrf.mxu0 }
 0x3ac   :  { %v4832_v0 = vadd.f32 %v5821_v47, %v4792_v58  ;;  %v5823_v49 = vpop.f32.mrf.mxu1 }
 0x3ae   :  { %v4843_v59 = vmax.f32 %v4832_v0, 0.0 }
 0x3b0   :  { %v4880_v1 = vrot.slane %v4843_v59, 4  ;;  %v4899_v48 = vmul.f32 %v4843_v59, %v4843_v59 }
 0x3b2   :  { %v4881_v54 = vadd.f32 %v4880_v1, %v4843_v59  ;;  %v4936_v8 = vrot.slane %v4899_v48, 4 }
 0x3b4   :  { %v4882_v10 = vrot.slane %v4881_v54, 2  ;;  %v4937_v2 = vadd.f32 %v4936_v8, %v4899_v48 }
 0x3b6   :  { %v4883_v51 = vadd.f32 %v4882_v10, %v4881_v54  ;;  %v4938_v32 = vrot.slane %v4937_v2, 2 }
 0x3b8   :  { %v4939_v53 = vadd.f32 %v4938_v32, %v4937_v2  ;;  %v4884_v4 = vrot.slane %v4883_v51, 1 }
 0x3ba   :  { %v4940_v11 = vrot.slane %v4939_v53, 1  ;;  %v4885_v42 = vadd.f32 %v4884_v4, %v4883_v51 }
 0x3bc   :  { %v4941_v7 = vadd.f32 %v4940_v11, %v4939_v53  ;;  %v4892_v18 = vmul.f32 0.125, %v4885_v42 }
 0x3be   :  { %v4948_v40 = vmul.f32 0.125, %v4941_v7  ;;  %v4955_v39 = vmul.f32 %v4892_v18, %v4892_v18 }
 0x3c0   :  { %v4962_v61 = vsub.f32 %v4948_v40, %v4955_v39 }
 0x3c2   :  { %v4969_v31 = vmax.f32 %v4962_v61, 0.0 }
 0x3c4   :  { %v4976_v19 = vadd.f32 1e-05, %v4969_v31 }
 0x3c6   :  { %6502 = vrsqrt.f32 %v4976_v19 }
 0x3d3   :  { %v6503_v17 = vpop.eup %6502 }
 0x3d4   :  { %v4990_v20 = vmul.f32 %v6514_v45, %v6503_v17 }
 0x3d6   :  { %v5032_v29 = vmul.f32 %v4990_v20, %v4892_v18  ;;  %v5018_v21 = vrot.slane %v4990_v20, %v6870_v14 }
 0x3d8   :  { %v5046_v44 = vrot.slane %v5032_v29, 7  ;;  %v5025_v23 = vmul.f32 %v5018_v21, %v4843_v59 }
 0x3da   :  { %v5060_v63 = vsub.f32 %v6514_v45, %v5046_v44 }
 0x3dc   :  { %v5088_v25 = vrot.slane %v5060_v63, %v6876_v33 }
 0x3de   :  { %v5095_v28 = vadd.f32 %v5088_v25, %v5025_v23 }
 0x3e0   :  { %v5130_v12 = vmul.f32 %v5123_v3, %v5095_v28 }
 0x3e2   :  { %v5136_v13 = vadd.f32 %v5135_v50, %v5130_v12 }
 0x3e4   :  { %5137 = vadd.xlane.f32.xlu0 %v5136_v13 }
 0x46d   :  { %v5138_v26 = vpop.xlane.xlu0 %5137 }
 0x46e   :  { %v5143_v35 = vadd.f32 %v5142_v36, %v5138_v26 }
 0x470   :  { %v5736_v16 = vmul.f32 -1.442695, %v5143_v35 }
 0x472   :  { %6504 = vpow2.f32 %v5736_v16 }
 0x47f   :  { %v6505_v14 = vpop.eup %6504 }
 0x480   :  { %v5147_v41 = vadd.f32 1.0, %v6505_v14 }
 0x482   :  { %6506 = vrcp.f32 %v5147_v41 }
 0x48f   :  { %v6507_v43 = vpop.eup %6506 }
 0x490   :  { %5151 = vst.msk [vmem:[%s6981_s4] sm:$0xff] %vm5150_vm0, %v6507_v43 }
 0x491   :  { %5156 = vsyncpa [#allocation3], 1 }
 0x492   :  { %5157 = vsyncpa [#allocation5], 1 }

</bundles_post_ra>
